<compile_context>
chip_gen: v7x
topology: tpu7x:2x2x1
jax: 0.10.0
libtpu: 0.0.40
codegen_flags: <defaults>
</compile_context>

<pallas_src>
import jax
import jax.numpy as jnp
from jax import lax
from jax.experimental import pallas as pl
from jax.experimental.pallas import tpu as pltpu


def _round_up(v, m):
    return ((v + m - 1) // m) * m


def _vmem_limit_bytes():
    # Generation-aware VMEM budget: ~75% of physical (96 MiB on v5e/v6e,
    # 48 MiB on v7x); conservative 48 MiB fallback if the query fails.
    cap = 64 * 1024 * 1024
    try:
        cap = int(pltpu.get_tpu_info().vmem_capacity_bytes)
    except Exception:
        pass
    return max(32 * 1024 * 1024, (cap * 3) // 4)


def _make_kernel(*, nph, taps1, taps2, off2, lwin, l1, same_shape, use_xid,
                 gate_stage1, cdt, fold1, fold2, cin, cin8, cmid, cmid8,
                 lane_chunk):
    """taps1: (phase, flat window base) per conv2a tap (stride folded in).
       taps2: flat window base per conv2b1 tap.
       off2 : flat offset of the valid region inside the padded buffers.
       fold1/fold2: pack the 9 taps into one MXU contraction (narrow K).
    """

    def kernel(*refs):
        (x_ref, m1_ref, s2a_ref, b2a_ref, w2a_ref,
         s2b_ref, b2b_ref, w2b_ref, m2_ref) = refs[:9]
        pos = 9
        xid_ref = w1_ref = None
        if use_xid:
            xid_ref = refs[pos]
            pos += 1
        elif not same_shape:
            w1_ref = refs[pos]
            pos += 1
        out_ref, xbr_ref = refs[pos], refs[pos + 1]
        a_scr, h_scr, s3_scr, s4_scr = refs[pos + 2:pos + 6]

        j = pl.program_id(1)          # Cout-tile index (innermost grid axis)

        def stage1():
            # ---- bn_branch2a + ReLU (f32 elementwise), lane-chunked.
            # xbr gets the raw result; the conv path gets a halo-masked
            # compute-dtype copy written into the zero-haloed scratch.
            sc_a = s2a_ref[...]
            bi_a = b2a_ref[...]
            for p in range(nph):
                for c0 in range(0, l1, lane_chunk):
                    cs = min(lane_chunk, l1 - c0)
                    xin = x_ref[0, p, :, c0:c0 + cs].astype(jnp.float32)
                    a_raw = jnp.maximum(xin * sc_a + bi_a, 0.0)
                    xbr_ref[0, p, :, c0:c0 + cs] = a_raw.astype(xbr_ref.dtype)
                    a_scr[p, :, c0:c0 + cs] = (
                        a_raw * m1_ref[p, :, c0:c0 + cs]).astype(cdt)

            # ---- conv_branch2a: 9 static-offset window taps.
            if fold1:
                # Pack taps along the contraction: one deep MXU matmul.
                if cin8 != cin:
                    for t in range(9):
                        s3_scr[t * cin8 + cin:(t + 1) * cin8, :] = jnp.zeros(
                            (cin8 - cin, lwin), cdt)
                for t, (p, base) in enumerate(taps1):
                    s3_scr[t * cin8:t * cin8 + cin, :] = (
                        a_scr[p, :, base:base + lwin])
                acc1 = jnp.dot(w2a_ref[...], s3_scr[...],
                               preferred_element_type=jnp.float32)
            else:
                p0, b0 = taps1[0]
                s3_scr[...] = jnp.dot(w2a_ref[0], a_scr[p0, :, b0:b0 + lwin],
                                      preferred_element_type=jnp.float32)
                for t in range(1, 9):
                    p, base = taps1[t]
                    s3_scr[...] += jnp.dot(
                        w2a_ref[t], a_scr[p, :, base:base + lwin],
                        preferred_element_type=jnp.float32)
                acc1 = s3_scr[...]

            # ---- bn_branch2b1 + ReLU, written into the zero-haloed h.
            # Only the (small) halo columns are zeroed -- the valid window is
            # fully overwritten, and this stays correct under megacore.
            h = (jnp.maximum(acc1 * s2b_ref[...] + b2b_ref[...], 0.0)
                 * m2_ref[...])
            h_scr[:, 0:off2] = jnp.zeros((cmid, off2), cdt)
            h_scr[:, off2 + lwin:l1] = jnp.zeros((cmid, l1 - off2 - lwin), cdt)
            h_scr[:, off2:off2 + lwin] = h.astype(cdt)

            if fold2:
                if cmid8 != cmid:
                    for t in range(9):
                        s4_scr[t * cmid8 + cmid:(t + 1) * cmid8, :] = jnp.zeros(
                            (cmid8 - cmid, lwin), cdt)
                for t, base in enumerate(taps2):
                    s4_scr[t * cmid8:t * cmid8 + cmid, :] = (
                        h_scr[:, base:base + lwin])

        # Stage 1 is Cout-tile invariant: run it once per image and reuse the
        # scratches for the remaining Cout tiles.
        if gate_stage1:
            pl.when(j == 0)(stage1)
        else:
            stage1()

        # ---- conv_branch2b1 for this Cout tile.
        if fold2:
            acc2 = jnp.dot(w2b_ref[...], s4_scr[...],
                           preferred_element_type=jnp.float32)
        else:
            b0 = taps2[0]
            s4_scr[...] = jnp.dot(w2b_ref[0], h_scr[:, b0:b0 + lwin],
                                  preferred_element_type=jnp.float32)
            for t in range(1, 9):
                base = taps2[t]
                s4_scr[...] += jnp.dot(w2b_ref[t], h_scr[:, base:base + lwin],
                                       preferred_element_type=jnp.float32)
            acc2 = s4_scr[...]

        # ---- branch1: identity (same_shape) or strided 1x1 projection.
        if same_shape:
            if use_xid:
                br1 = xid_ref[0, 0, :, off2:off2 + lwin].astype(jnp.float32)
            else:
                br1 = x_ref[0, 0, :, off2:off2 + lwin].astype(jnp.float32)
        else:
            br1 = jnp.dot(w1_ref[...], a_scr[0, :, off2:off2 + lwin],
                          preferred_element_type=jnp.float32)

        out_ref[0] = (acc2 + br1).astype(out_ref.dtype)

    return kernel


def resblock_pallas(x, params, *, stride=1, first_dilation=None, dilation=1,
                    eps=1e-5, compute_dtype=jnp.bfloat16, input_dtype=None,
                    tile_cout=None, fold_taps=None):
    """x: (N, Cin, H, W) NCHW.  Returns (out, x_bn_relu), both NCHW, x.dtype."""
    N, Cin, H, W = x.shape
    if first_dilation is None:
        first_dilation = dilation
    d1, d2, s = int(first_dilation), int(dilation), int(stride)
    if input_dtype is None:
        input_dtype = compute_dtype       # halve HBM reads of x by default

    w2a = params["conv2a_w"]                      # (Cmid, Cin, 3, 3)
    w2b = params["conv2b1_w"]                     # (Cout, Cmid, 3, 3)
    Cmid, Cout = w2a.shape[0], w2b.shape[0]
    same_shape = (Cin == Cout) and (s == 1)

    Ho = (H - 1) // s + 1
    Wo = (W - 1) // s + 1
    PAD = max(-(-d1 // s), d2)                    # halo shared by both stages
    Wp = Wo + 2 * PAD                             # padded row width
    Lwin = _round_up(Ho * Wp, 128)                # window / accumulator width
    L1 = _round_up(2 * PAD * Wp + 2 * PAD + Lwin, 128)  # padded buffer length
    nph = s * s

    # ---- Cout tiling (grid axis 1).  256-wide tiles suit v6e/v7x MXUs.
    if tile_cout is None:
        if Cout <= 256:
            TCo = Cout
        elif Cout % 256 == 0:
            TCo = 256
        elif Cout % 128 == 0:
            TCo = 128
        else:
            TCo = Cout
    else:
        TCo = int(tile_cout)
    if Cout % TCo != 0 or (TCo != Cout and TCo % 8 != 0):
        TCo = Cout
    nCo = Cout // TCo
    use_xid = same_shape and nCo > 1   # identity branch needs a channel tile

    # ---- fold the 9 taps into one MXU contraction when K is narrow.
    if fold_taps is None:
        fold1, fold2 = (Cin <= 128), (Cmid <= 128)
    else:
        fold1 = fold2 = bool(fold_taps)
    Cin8, Cmid8 = _round_up(Cin, 8), _round_up(Cmid, 8)

    # ---- phase-split + zero-pad x (and its validity mask) in the wrapper.
    def phase_pad(arr):                           # (B,C,H,W) -> (B,nph,C,L1)
        planes = []
        for py in range(s):
            for px in range(s):
                ph = arr[:, :, py::s, px::s]
                hp, wp_ = ph.shape[2], ph.shape[3]
                buf = jnp.zeros((arr.shape[0], arr.shape[1],
                                 Ho + 2 * PAD, Wp), arr.dtype)
                buf = buf.at[:, :, PAD:PAD + hp, PAD:PAD + wp_].set(ph)
                flat = buf.reshape(arr.shape[0], arr.shape[1], -1)
                flat = jnp.pad(flat,
                               ((0, 0), (0, 0), (0, L1 - flat.shape[-1])))
                planes.append(flat)
        return jnp.stack(planes, axis=1)

    x_ph = phase_pad(x.astype(input_dtype))                       # (N,nph,Cin,L1)
    mask1 = phase_pad(jnp.ones((1, 1, H, W), jnp.float32))[0]     # (nph,1,L1)

    # valid-output mask for the (Ho, Wp)-shaped window accumulator
    idx = jnp.arange(Lwin)
    mask2 = (((idx // Wp) < Ho) & ((idx % Wp) < Wo)).astype(
        jnp.float32).reshape(1, Lwin)

    # eval-mode BN -> per-channel scale / bias (kept in f32)
    def fold_bn(g, b, m, v):
        sc = g / jnp.sqrt(v + eps)
        return sc, b - m * sc

    s2a, b2a = fold_bn(*params["bn2a"])
    s2b, b2b = fold_bn(*params["bn2b1"])

    # tap-major weights; K-packed (zero-padded to 8-aligned tap segments) for
    # the fold path, cast to the MXU input dtype.
    w2a_tap = jnp.transpose(w2a, (2, 3, 0, 1)).reshape(9, Cmid, Cin)
    w2b_tap = jnp.transpose(w2b, (2, 3, 0, 1)).reshape(9, Cout, Cmid)
    if fold1:
        wtmp = jnp.zeros((9, Cmid, Cin8), w2a_tap.dtype)
        wtmp = wtmp.at[:, :, :Cin].set(w2a_tap)
        w2a_in = jnp.transpose(wtmp, (1, 0, 2)).reshape(Cmid, 9 * Cin8)
    else:
        w2a_in = w2a_tap
    if fold2:
        wtmp = jnp.zeros((9, Cout, Cmid8), w2b_tap.dtype)
        wtmp = wtmp.at[:, :, :Cmid].set(w2b_tap)
        w2b_in = jnp.transpose(wtmp, (1, 0, 2)).reshape(Cout, 9 * Cmid8)
    else:
        w2b_in = w2b_tap
    w2a_in = w2a_in.astype(compute_dtype)
    w2b_in = w2b_in.astype(compute_dtype)

    # static tap -> (phase, window base) mapping (polyphase stride folding)
    taps1 = []
    for kh in range(3):
        for kw in range(3):
            dy, dx = (kh - 1) * d1, (kw - 1) * d1
            py, qy = dy % s, dy // s
            px, qx = dx % s, dx // s
            taps1.append((py * s + px, (PAD + qy) * Wp + (PAD + qx)))
    taps2 = tuple((PAD + (kh - 1) * d2) * Wp + (PAD + (kw - 1) * d2)
                  for kh in range(3) for kw in range(3))
    off2 = PAD * Wp + PAD

    inputs = [x_ph, mask1,
              s2a.reshape(Cin, 1), b2a.reshape(Cin, 1), w2a_in,
              s2b.reshape(Cmid, 1), b2b.reshape(Cmid, 1), w2b_in, mask2]
    if use_xid:
        inputs.append(x_ph)   # channel-blocked view for the identity branch
    elif not same_shape:
        inputs.append(params["conv1_w"].reshape(Cout, Cin).astype(compute_dtype))

    kernel = _make_kernel(
        nph=nph, taps1=tuple(taps1), taps2=taps2, off2=off2, lwin=Lwin, l1=L1,
        same_shape=same_shape, use_xid=use_xid, gate_stage1=(nCo > 1),
        cdt=compute_dtype, fold1=fold1, fold2=fold2,
        cin=Cin, cin8=Cin8, cmid=Cmid, cmid8=Cmid8,
        lane_chunk=min(L1, 2048))

    scratch_shapes = [
        pltpu.VMEM((nph, Cin, L1), compute_dtype),                 # a_scr
        pltpu.VMEM((Cmid, L1), compute_dtype),                     # h_scr
        (pltpu.VMEM((9 * Cin8, Lwin), compute_dtype) if fold1
         else pltpu.VMEM((Cmid, Lwin), jnp.float32)),              # pack1/acc1
        (pltpu.VMEM((9 * Cmid8, Lwin), compute_dtype) if fold2
         else pltpu.VMEM((TCo, Lwin), jnp.float32)),               # pack2/acc2
    ]

    def build_in_specs(single_buf):
        def const(shape):
            nd = len(shape)
            imap = lambda n, j: (0,) * nd
            if single_buf:
                return pl.BlockSpec(shape, imap, pipeline_mode=pl.Buffered(1))
            return pl.BlockSpec(shape, imap)

        specs = [
            pl.BlockSpec((1, nph, Cin, L1), lambda n, j: (n, 0, 0, 0)),
            const((nph, 1, L1)),
            const((Cin, 1)), const((Cin, 1)),
            const(tuple(w2a_in.shape)),
            const((Cmid, 1)), const((Cmid, 1)),
            (pl.BlockSpec((TCo, 9 * Cmid8), lambda n, j: (j, 0)) if fold2
             else pl.BlockSpec((9, TCo, Cmid), lambda n, j: (0, j, 0))),
            const((1, Lwin)),
        ]
        if use_xid:
            specs.append(pl.BlockSpec((1, 1, TCo, L1),
                                      lambda n, j: (n, 0, j, 0)))
        elif not same_shape:
            specs.append(pl.BlockSpec((TCo, Cin), lambda n, j: (j, 0)))
        return specs

    out_specs = (pl.BlockSpec((1, TCo, Lwin), lambda n, j: (n, j, 0)),
                 pl.BlockSpec((1, nph, Cin, L1), lambda n, j: (n, 0, 0, 0)))
    out_shape = (jax.ShapeDtypeStruct((N, Cout, Lwin), x.dtype),
                 jax.ShapeDtypeStruct((N, nph, Cin, L1), x.dtype))

    def run(single_buf):
        return pl.pallas_call(
            kernel,
            grid=(N, nCo),
            in_specs=build_in_specs(single_buf),
            out_specs=out_specs,
            out_shape=out_shape,
            scratch_shapes=scratch_shapes,
            compiler_params=pltpu.CompilerParams(
                dimension_semantics=("parallel", "arbitrary"),
                vmem_limit_bytes=_vmem_limit_bytes()),
        )(*inputs)

    try:
        out, xbr = run(True)
    except Exception:
        # pl.Buffered(1) single-buffering of grid-invariant operands is a
        # pure VMEM optimization; fall back transparently if unsupported.
        out, xbr = run(False)

    # ---- strip lane padding / halos (cheap XLA slices & reshapes).
    out = out[:, :, :Ho * Wp].reshape(N, Cout, Ho, Wp)[:, :, :, :Wo]

    if s == 1:
        # Common (un-strided) case: no de-phasing transpose, just a slice.
        xbr = xbr[:, 0, :, :(Ho + 2 * PAD) * Wp].reshape(
            N, Cin, Ho + 2 * PAD, Wp)
        xbr = xbr[:, :, PAD:PAD + Ho, PAD:PAD + Wo]
    else:
        xbr = xbr[:, :, :, :(Ho + 2 * PAD) * Wp]
        xbr = xbr.reshape(N, nph, Cin, Ho + 2 * PAD, Wp)
        xbr = xbr[:, :, :, PAD:PAD + Ho, PAD:PAD + Wo]    # (N,nph,Cin,Ho,Wo)
        xbr = xbr.reshape(N, s, s, Cin, Ho, Wo)
        xbr = jnp.transpose(xbr, (0, 3, 4, 1, 5, 2))       # (N,Cin,Ho,s,Wo,s)
        xbr = xbr.reshape(N, Cin, Ho * s, Wo * s)[:, :, :H, :W]
    return out, xbr


# ---------------- pure-JAX reference (mirrors the PyTorch forward) -----------
def resblock_reference(x, params, *, stride=1, first_dilation=None, dilation=1,
                       eps=1e-5):
    if first_dilation is None:
        first_dilation = dilation

    def bn(t, p):
        g, b, m, v = (a[None, :, None, None] for a in p)
        return (t - m) / jnp.sqrt(v + eps) * g + b

    def conv(t, w, s, d, p):
        return lax.conv_general_dilated(
            t, w, (s, s), [(p, p), (p, p)], rhs_dilation=(d, d),
            dimension_numbers=("NCHW", "OIHW", "NCHW"))

    Cin = x.shape[1]
    Cout = params["conv2b1_w"].shape[0]
    same_shape = (Cin == Cout) and stride == 1

    branch2 = jax.nn.relu(bn(x, params["bn2a"]))
    x_bn_relu = branch2
    if not same_shape:
        branch1 = conv(branch2, params["conv1_w"], stride, 1, 0)
    else:
        branch1 = x
    branch2 = conv(branch2, params["conv2a_w"], stride, first_dilation,
                   first_dilation)
    branch2 = jax.nn.relu(bn(branch2, params["bn2b1"]))
    branch2 = conv(branch2, params["conv2b1_w"], 1, dilation, dilation)
    return branch1 + branch2, x_bn_relu


# ---------------- deterministic parameter init -------------------------------
def init_params(key, Cin, Cmid, Cout, same_shape):
    ks = jax.random.split(key, 11)

    def bn_params(k1, k2, k3, k4, C):
        gamma = jax.random.uniform(k1, (C,), jnp.float32, 0.5, 1.5)
        beta = 0.1 * jax.random.normal(k2, (C,), jnp.float32)
        mean = 0.1 * jax.random.normal(k3, (C,), jnp.float32)
        var = jax.random.uniform(k4, (C,), jnp.float32, 0.5, 1.5)
        return (gamma, beta, mean, var)

    p = {
        "bn2a": bn_params(ks[0], ks[1], ks[2], ks[3], Cin),
        "conv2a_w": 0.2 * jax.random.normal(ks[4], (Cmid, Cin, 3, 3),
                                            jnp.float32),
        "bn2b1": bn_params(ks[5], ks[6], ks[7], ks[8], Cmid),
        "conv2b1_w": 0.2 * jax.random.normal(ks[9], (Cout, Cmid, 3, 3),
                                             jnp.float32),
    }
    if not same_shape:
        p["conv1_w"] = 0.2 * jax.random.normal(ks[10], (Cout, Cin, 1, 1),
                                               jnp.float32)
    return p


if __name__ == "__main__":
    key = jax.random.PRNGKey(0)
    kx, kx16, kp1, kp2, kp3, kp4 = jax.random.split(key, 6)

    x4 = jax.random.normal(kx, (2, 4, 16, 16), jnp.float32)
    x16 = jax.random.normal(kx16, (2, 16, 16, 16), jnp.float32)

    configs = [
        # identity shortcut, dilation=2 (fold path, single Cout tile)
        dict(x=x4, mid=8, out=4, stride=1, dilation=2, tile_cout=None,
             fold=None, key=kp1),
        # projection shortcut + stride=2 polyphase (fold path)
        dict(x=x4, mid=8, out=8, stride=2, dilation=1, tile_cout=None,
             fold=None, key=kp2),
        # projection + stride=2 + Cout tiling (2 tiles of 8), fold path
        dict(x=x4, mid=16, out=16, stride=2, dilation=1, tile_cout=8,
             fold=None, key=kp3),
        # identity shortcut + Cout tiling (channel-tiled identity branch),
        # non-fold 9-matmul path with VMEM accumulator scratch
        dict(x=x16, mid=16, out=16, stride=1, dilation=2, tile_cout=8,
             fold=False, key=kp4),
    ]

    for ci, cfg in enumerate(configs):
        x = cfg["x"]
        Cin = x.shape[1]
        same = (Cin == cfg["out"]) and (cfg["stride"] == 1)
        params = init_params(cfg["key"], Cin, cfg["mid"], cfg["out"], same)

        ref_out, ref_xbr = resblock_reference(x, params, stride=cfg["stride"],
                                              dilation=cfg["dilation"])

        # exactness of the restructured algorithm (f32 MXU + f32 I/O path)
        o32, b32 = resblock_pallas(x, params, stride=cfg["stride"],
                                   dilation=cfg["dilation"],
                                   compute_dtype=jnp.float32,
                                   tile_cout=cfg["tile_cout"],
                                   fold_taps=cfg["fold"])
        o32, b32 = jax.block_until_ready((o32, b32))
        assert o32.shape == ref_out.shape, (ci, o32.shape, ref_out.shape)
        assert b32.shape == ref_xbr.shape, (ci, b32.shape, ref_xbr.shape)
        assert jnp.allclose(o32, ref_out, atol=1e-4, rtol=1e-4), \
            (ci, float(jnp.max(jnp.abs(o32 - ref_out))))
        assert jnp.allclose(b32, ref_xbr, atol=1e-5, rtol=1e-5), \
            (ci, float(jnp.max(jnp.abs(b32 - ref_xbr))))

        # default bf16 path (bf16 x in HBM + bf16 MXU inputs, f32 accum).
        # Loose tolerance: this is the quantized inference path; algorithmic
        # correctness is established by the exact f32 check above.
        if ci in (1, 3):
            out, xbr = resblock_pallas(x, params, stride=cfg["stride"],
                                       dilation=cfg["dilation"],
                                       tile_cout=cfg["tile_cout"],
                                       fold_taps=cfg["fold"])
            out, xbr = jax.block_until_ready((out, xbr))
            assert jnp.allclose(out, ref_out, atol=3e-1, rtol=1e-1), \
                (ci, float(jnp.max(jnp.abs(out - ref_out))))
            assert jnp.allclose(xbr, ref_xbr, atol=5e-2, rtol=5e-2), \
                (ci, float(jnp.max(jnp.abs(xbr - ref_xbr))))

    print("KERNEL_OK")
</pallas_src>

<mosaic_0001>
module attributes {stable_mosaic.version = 11 : i64} {
  func.func @kernel(%arg0: i32, %arg1: i32, %arg2: memref<1x1x4x512xf32, #tpu.memory_space<vmem>>, %arg3: memref<1x1x512xf32, #tpu.memory_space<vmem>>, %arg4: memref<4x1xf32, #tpu.memory_space<vmem>>, %arg5: memref<4x1xf32, #tpu.memory_space<vmem>>, %arg6: memref<8x72xf32, #tpu.memory_space<vmem>>, %arg7: memref<8x1xf32, #tpu.memory_space<vmem>>, %arg8: memref<8x1xf32, #tpu.memory_space<vmem>>, %arg9: memref<4x72xf32, #tpu.memory_space<vmem>>, %arg10: memref<1x384xf32, #tpu.memory_space<vmem>>, %arg11: memref<1x4x384xf32, #tpu.memory_space<vmem>>, %arg12: memref<1x1x4x512xf32, #tpu.memory_space<vmem>>, %arg13: memref<1x4x512xf32, #tpu.memory_space<vmem>>, %arg14: memref<8x512xf32, #tpu.memory_space<vmem>>, %arg15: memref<72x384xf32, #tpu.memory_space<vmem>>, %arg16: memref<72x384xf32, #tpu.memory_space<vmem>>) attributes {dimension_semantics = [#tpu.dimension_semantics<parallel>, #tpu.dimension_semantics<arbitrary>], iteration_bounds = array<i64: 2, 1>, scalar_prefetch = 0 : i64, scratch_operands = 4 : i64, tpu.core_type = #tpu.core_type<tc>, window_params = [{transform_indices = @transform_0, window_bounds = array<i64: 1, 1, 4, 512>}, {pipeline_mode = #tpu.pipeline_mode<synchronous>, transform_indices = @transform_1, window_bounds = array<i64: 1, 1, 512>}, {pipeline_mode = #tpu.pipeline_mode<synchronous>, transform_indices = @transform_2, window_bounds = array<i64: 4, 1>}, {pipeline_mode = #tpu.pipeline_mode<synchronous>, transform_indices = @transform_3, window_bounds = array<i64: 4, 1>}, {pipeline_mode = #tpu.pipeline_mode<synchronous>, transform_indices = @transform_4, window_bounds = array<i64: 8, 72>}, {pipeline_mode = #tpu.pipeline_mode<synchronous>, transform_indices = @transform_5, window_bounds = array<i64: 8, 1>}, {pipeline_mode = #tpu.pipeline_mode<synchronous>, transform_indices = @transform_6, window_bounds = array<i64: 8, 1>}, {transform_indices = @transform_7, window_bounds = array<i64: 4, 72>}, {pipeline_mode = #tpu.pipeline_mode<synchronous>, transform_indices = @transform_8, window_bounds = array<i64: 1, 384>}, {transform_indices = @transform_9, window_bounds = array<i64: 1, 4, 384>}, {transform_indices = @transform_10, window_bounds = array<i64: 1, 1, 4, 512>}]} {
    %c0 = arith.constant 0 : index
    %c0_0 = arith.constant 0 : index
    %0 = vector.load %arg4[%c0, %c0_0] : memref<4x1xf32, #tpu.memory_space<vmem>>, vector<4x1xf32>
    %c0_1 = arith.constant 0 : index
    %c0_2 = arith.constant 0 : index
    %1 = vector.load %arg5[%c0_1, %c0_2] : memref<4x1xf32, #tpu.memory_space<vmem>>, vector<4x1xf32>
    %c0_3 = arith.constant 0 : index
    %c0_4 = arith.constant 0 : index
    %c0_5 = arith.constant 0 : index
    %c0_6 = arith.constant 0 : index
    %2 = vector.load %arg2[%c0_3, %c0_4, %c0_5, %c0_6] : memref<1x1x4x512xf32, #tpu.memory_space<vmem>>, vector<1x1x4x512xf32>
    %3 = vector.shape_cast %2 : vector<1x1x4x512xf32> to vector<4x512xf32>
    %4 = vector.broadcast %0 : vector<4x1xf32> to vector<4x512xf32>
    %5 = arith.mulf %3, %4 : vector<4x512xf32>
    %6 = vector.broadcast %1 : vector<4x1xf32> to vector<4x512xf32>
    %7 = arith.addf %5, %6 : vector<4x512xf32>
    %cst = arith.constant 0.000000e+00 : f32
    %8 = vector.broadcast %cst : f32 to vector<4x512xf32>
    %9 = arith.maximumf %7, %8 : vector<4x512xf32>
    %c0_7 = arith.constant 0 : index
    %c0_8 = arith.constant 0 : index
    %c0_9 = arith.constant 0 : index
    %c0_10 = arith.constant 0 : index
    %10 = vector.load %arg12[%c0_7, %c0_8, %c0_9, %c0_10] : memref<1x1x4x512xf32, #tpu.memory_space<vmem>>, vector<1x1x4x512xf32>
    %11 = vector.shape_cast %10 : vector<1x1x4x512xf32> to vector<4x512xf32>
    %12 = vector.shape_cast %9 : vector<4x512xf32> to vector<1x1x4x512xf32>
    tpu.vector_store %arg12[%c0_7, %c0_8, %c0_9, %c0_10], %12 {strides = array<i32>} : memref<1x1x4x512xf32, #tpu.memory_space<vmem>>, vector<1x1x4x512xf32>,
    %c0_11 = arith.constant 0 : index
    %c0_12 = arith.constant 0 : index
    %c0_13 = arith.constant 0 : index
    %13 = vector.load %arg3[%c0_11, %c0_12, %c0_13] : memref<1x1x512xf32, #tpu.memory_space<vmem>>, vector<1x1x512xf32>
    %14 = vector.shape_cast %13 : vector<1x1x512xf32> to vector<1x512xf32>
    %15 = vector.broadcast %14 : vector<1x512xf32> to vector<4x512xf32>
    %16 = arith.mulf %9, %15 : vector<4x512xf32>
    %c0_14 = arith.constant 0 : index
    %c0_15 = arith.constant 0 : index
    %c0_16 = arith.constant 0 : index
    %17 = vector.load %arg13[%c0_14, %c0_15, %c0_16] : memref<1x4x512xf32, #tpu.memory_space<vmem>>, vector<1x4x512xf32>
    %18 = vector.shape_cast %17 : vector<1x4x512xf32> to vector<4x512xf32>
    %19 = vector.shape_cast %16 : vector<4x512xf32> to vector<1x4x512xf32>
    tpu.vector_store %arg13[%c0_14, %c0_15, %c0_16], %19 {strides = array<i32>} : memref<1x4x512xf32, #tpu.memory_space<vmem>>, vector<1x4x512xf32>,
    %cst_17 = arith.constant 0.000000e+00 : f32
    %20 = vector.broadcast %cst_17 : f32 to vector<4x384xf32>
    %c4 = arith.constant 4 : index
    %c0_18 = arith.constant 0 : index
    %21 = vector.load %arg15[%c4, %c0_18] : memref<72x384xf32, #tpu.memory_space<vmem>>, vector<4x384xf32>
    tpu.vector_store %arg15[%c4, %c0_18], %20 {strides = array<i32>} : memref<72x384xf32, #tpu.memory_space<vmem>>, vector<4x384xf32>,
    %cst_19 = arith.constant 0.000000e+00 : f32
    %22 = vector.broadcast %cst_19 : f32 to vector<4x384xf32>
    %c12 = arith.constant 12 : index
    %c0_20 = arith.constant 0 : index
    %23 = vector.load %arg15[%c12, %c0_20] : memref<72x384xf32, #tpu.memory_space<vmem>>, vector<4x384xf32>
    tpu.vector_store %arg15[%c12, %c0_20], %22 {strides = array<i32>} : memref<72x384xf32, #tpu.memory_space<vmem>>, vector<4x384xf32>,
    %cst_21 = arith.constant 0.000000e+00 : f32
    %24 = vector.broadcast %cst_21 : f32 to vector<4x384xf32>
    %c20 = arith.constant 20 : index
    %c0_22 = arith.constant 0 : index
    %25 = vector.load %arg15[%c20, %c0_22] : memref<72x384xf32, #tpu.memory_space<vmem>>, vector<4x384xf32>
    tpu.vector_store %arg15[%c20, %c0_22], %24 {strides = array<i32>} : memref<72x384xf32, #tpu.memory_space<vmem>>, vector<4x384xf32>,
    %cst_23 = arith.constant 0.000000e+00 : f32
    %26 = vector.broadcast %cst_23 : f32 to vector<4x384xf32>
    %c28 = arith.constant 28 : index
    %c0_24 = arith.constant 0 : index
    %27 = vector.load %arg15[%c28, %c0_24] : memref<72x384xf32, #tpu.memory_space<vmem>>, vector<4x384xf32>
    tpu.vector_store %arg15[%c28, %c0_24], %26 {strides = array<i32>} : memref<72x384xf32, #tpu.memory_space<vmem>>, vector<4x384xf32>,
    %cst_25 = arith.constant 0.000000e+00 : f32
    %28 = vector.broadcast %cst_25 : f32 to vector<4x384xf32>
    %c36 = arith.constant 36 : index
    %c0_26 = arith.constant 0 : index
    %29 = vector.load %arg15[%c36, %c0_26] : memref<72x384xf32, #tpu.memory_space<vmem>>, vector<4x384xf32>
    tpu.vector_store %arg15[%c36, %c0_26], %28 {strides = array<i32>} : memref<72x384xf32, #tpu.memory_space<vmem>>, vector<4x384xf32>,
    %cst_27 = arith.constant 0.000000e+00 : f32
    %30 = vector.broadcast %cst_27 : f32 to vector<4x384xf32>
    %c44 = arith.constant 44 : index
    %c0_28 = arith.constant 0 : index
    %31 = vector.load %arg15[%c44, %c0_28] : memref<72x384xf32, #tpu.memory_space<vmem>>, vector<4x384xf32>
    tpu.vector_store %arg15[%c44, %c0_28], %30 {strides = array<i32>} : memref<72x384xf32, #tpu.memory_space<vmem>>, vector<4x384xf32>,
    %cst_29 = arith.constant 0.000000e+00 : f32
    %32 = vector.broadcast %cst_29 : f32 to vector<4x384xf32>
    %c52 = arith.constant 52 : index
    %c0_30 = arith.constant 0 : index
    %33 = vector.load %arg15[%c52, %c0_30] : memref<72x384xf32, #tpu.memory_space<vmem>>, vector<4x384xf32>
    tpu.vector_store %arg15[%c52, %c0_30], %32 {strides = array<i32>} : memref<72x384xf32, #tpu.memory_space<vmem>>, vector<4x384xf32>,
    %cst_31 = arith.constant 0.000000e+00 : f32
    %34 = vector.broadcast %cst_31 : f32 to vector<4x384xf32>
    %c60 = arith.constant 60 : index
    %c0_32 = arith.constant 0 : index
    %35 = vector.load %arg15[%c60, %c0_32] : memref<72x384xf32, #tpu.memory_space<vmem>>, vector<4x384xf32>
    tpu.vector_store %arg15[%c60, %c0_32], %34 {strides = array<i32>} : memref<72x384xf32, #tpu.memory_space<vmem>>, vector<4x384xf32>,
    %cst_33 = arith.constant 0.000000e+00 : f32
    %36 = vector.broadcast %cst_33 : f32 to vector<4x384xf32>
    %c68 = arith.constant 68 : index
    %c0_34 = arith.constant 0 : index
    %37 = vector.load %arg15[%c68, %c0_34] : memref<72x384xf32, #tpu.memory_space<vmem>>, vector<4x384xf32>
    tpu.vector_store %arg15[%c68, %c0_34], %36 {strides = array<i32>} : memref<72x384xf32, #tpu.memory_space<vmem>>, vector<4x384xf32>,
    %c0_35 = arith.constant 0 : index
    %c0_36 = arith.constant 0 : index
    %c0_37 = arith.constant 0 : index
    %38 = vector.load %arg13[%c0_35, %c0_36, %c0_37] : memref<1x4x512xf32, #tpu.memory_space<vmem>>, vector<1x4x384xf32>
    %39 = vector.shape_cast %38 : vector<1x4x384xf32> to vector<4x384xf32>
    %c0_38 = arith.constant 0 : index
    %c0_39 = arith.constant 0 : index
    %40 = vector.load %arg15[%c0_38, %c0_39] : memref<72x384xf32, #tpu.memory_space<vmem>>, vector<4x384xf32>
    tpu.vector_store %arg15[%c0_38, %c0_39], %39 {strides = array<i32>} : memref<72x384xf32, #tpu.memory_space<vmem>>, vector<4x384xf32>,
    %c0_40 = arith.constant 0 : index
    %c0_41 = arith.constant 0 : index
    %c2 = arith.constant 2 : index
    %41 = vector.load %arg13[%c0_40, %c0_41, %c2] : memref<1x4x512xf32, #tpu.memory_space<vmem>>, vector<1x4x384xf32>
    %42 = vector.shape_cast %41 : vector<1x4x384xf32> to vector<4x384xf32>
    %c8 = arith.constant 8 : index
    %c0_42 = arith.constant 0 : index
    %43 = vector.load %arg15[%c8, %c0_42] : memref<72x384xf32, #tpu.memory_space<vmem>>, vector<4x384xf32>
    tpu.vector_store %arg15[%c8, %c0_42], %42 {strides = array<i32>} : memref<72x384xf32, #tpu.memory_space<vmem>>, vector<4x384xf32>,
    %c0_43 = arith.constant 0 : index
    %c0_44 = arith.constant 0 : index
    %c4_45 = arith.constant 4 : index
    %44 = vector.load %arg13[%c0_43, %c0_44, %c4_45] : memref<1x4x512xf32, #tpu.memory_space<vmem>>, vector<1x4x384xf32>
    %45 = vector.shape_cast %44 : vector<1x4x384xf32> to vector<4x384xf32>
    %c16 = arith.constant 16 : index
    %c0_46 = arith.constant 0 : index
    %46 = vector.load %arg15[%c16, %c0_46] : memref<72x384xf32, #tpu.memory_space<vmem>>, vector<4x384xf32>
    tpu.vector_store %arg15[%c16, %c0_46], %45 {strides = array<i32>} : memref<72x384xf32, #tpu.memory_space<vmem>>, vector<4x384xf32>,
    %c0_47 = arith.constant 0 : index
    %c0_48 = arith.constant 0 : index
    %c40 = arith.constant 40 : index
    %47 = vector.load %arg13[%c0_47, %c0_48, %c40] : memref<1x4x512xf32, #tpu.memory_space<vmem>>, vector<1x4x384xf32>
    %48 = vector.shape_cast %47 : vector<1x4x384xf32> to vector<4x384xf32>
    %c24 = arith.constant 24 : index
    %c0_49 = arith.constant 0 : index
    %49 = vector.load %arg15[%c24, %c0_49] : memref<72x384xf32, #tpu.memory_space<vmem>>, vector<4x384xf32>
    tpu.vector_store %arg15[%c24, %c0_49], %48 {strides = array<i32>} : memref<72x384xf32, #tpu.memory_space<vmem>>, vector<4x384xf32>,
    %c0_50 = arith.constant 0 : index
    %c0_51 = arith.constant 0 : index
    %c42 = arith.constant 42 : index
    %50 = vector.load %arg13[%c0_50, %c0_51, %c42] : memref<1x4x512xf32, #tpu.memory_space<vmem>>, vector<1x4x384xf32>
    %51 = vector.shape_cast %50 : vector<1x4x384xf32> to vector<4x384xf32>
    %c32 = arith.constant 32 : index
    %c0_52 = arith.constant 0 : index
    %52 = vector.load %arg15[%c32, %c0_52] : memref<72x384xf32, #tpu.memory_space<vmem>>, vector<4x384xf32>
    tpu.vector_store %arg15[%c32, %c0_52], %51 {strides = array<i32>} : memref<72x384xf32, #tpu.memory_space<vmem>>, vector<4x384xf32>,
    %c0_53 = arith.constant 0 : index
    %c0_54 = arith.constant 0 : index
    %c44_55 = arith.constant 44 : index
    %53 = vector.load %arg13[%c0_53, %c0_54, %c44_55] : memref<1x4x512xf32, #tpu.memory_space<vmem>>, vector<1x4x384xf32>
    %54 = vector.shape_cast %53 : vector<1x4x384xf32> to vector<4x384xf32>
    %c40_56 = arith.constant 40 : index
    %c0_57 = arith.constant 0 : index
    %55 = vector.load %arg15[%c40_56, %c0_57] : memref<72x384xf32, #tpu.memory_space<vmem>>, vector<4x384xf32>
    tpu.vector_store %arg15[%c40_56, %c0_57], %54 {strides = array<i32>} : memref<72x384xf32, #tpu.memory_space<vmem>>, vector<4x384xf32>,
    %c0_58 = arith.constant 0 : index
    %c0_59 = arith.constant 0 : index
    %c80 = arith.constant 80 : index
    %56 = vector.load %arg13[%c0_58, %c0_59, %c80] : memref<1x4x512xf32, #tpu.memory_space<vmem>>, vector<1x4x384xf32>
    %57 = vector.shape_cast %56 : vector<1x4x384xf32> to vector<4x384xf32>
    %c48 = arith.constant 48 : index
    %c0_60 = arith.constant 0 : index
    %58 = vector.load %arg15[%c48, %c0_60] : memref<72x384xf32, #tpu.memory_space<vmem>>, vector<4x384xf32>
    tpu.vector_store %arg15[%c48, %c0_60], %57 {strides = array<i32>} : memref<72x384xf32, #tpu.memory_space<vmem>>, vector<4x384xf32>,
    %c0_61 = arith.constant 0 : index
    %c0_62 = arith.constant 0 : index
    %c82 = arith.constant 82 : index
    %59 = vector.load %arg13[%c0_61, %c0_62, %c82] : memref<1x4x512xf32, #tpu.memory_space<vmem>>, vector<1x4x384xf32>
    %60 = vector.shape_cast %59 : vector<1x4x384xf32> to vector<4x384xf32>
    %c56 = arith.constant 56 : index
    %c0_63 = arith.constant 0 : index
    %61 = vector.load %arg15[%c56, %c0_63] : memref<72x384xf32, #tpu.memory_space<vmem>>, vector<4x384xf32>
    tpu.vector_store %arg15[%c56, %c0_63], %60 {strides = array<i32>} : memref<72x384xf32, #tpu.memory_space<vmem>>, vector<4x384xf32>,
    %c0_64 = arith.constant 0 : index
    %c0_65 = arith.constant 0 : index
    %c84 = arith.constant 84 : index
    %62 = vector.load %arg13[%c0_64, %c0_65, %c84] : memref<1x4x512xf32, #tpu.memory_space<vmem>>, vector<1x4x384xf32>
    %63 = vector.shape_cast %62 : vector<1x4x384xf32> to vector<4x384xf32>
    %c64 = arith.constant 64 : index
    %c0_66 = arith.constant 0 : index
    %64 = vector.load %arg15[%c64, %c0_66] : memref<72x384xf32, #tpu.memory_space<vmem>>, vector<4x384xf32>
    tpu.vector_store %arg15[%c64, %c0_66], %63 {strides = array<i32>} : memref<72x384xf32, #tpu.memory_space<vmem>>, vector<4x384xf32>,
    %c0_67 = arith.constant 0 : index
    %c0_68 = arith.constant 0 : index
    %65 = vector.load %arg6[%c0_67, %c0_68] : memref<8x72xf32, #tpu.memory_space<vmem>>, vector<8x72xf32>
    %c0_69 = arith.constant 0 : index
    %c0_70 = arith.constant 0 : index
    %66 = vector.load %arg15[%c0_69, %c0_70] : memref<72x384xf32, #tpu.memory_space<vmem>>, vector<72x384xf32>
    %cst_71 = arith.constant dense<0.000000e+00> : vector<8x384xf32>
    %67 = tpu.matmul %65, %66, %cst_71 {dimension_numbers = #tpu.dot_dimension_numbers<[1], [0], [0], [1], [0, 0, 1, 1], [], []>} : vector<8x72xf32>, vector<72x384xf32>, vector<8x384xf32> -> vector<8x384xf32>
    %c0_72 = arith.constant 0 : index
    %c0_73 = arith.constant 0 : index
    %68 = vector.load %arg7[%c0_72, %c0_73] : memref<8x1xf32, #tpu.memory_space<vmem>>, vector<8x1xf32>
    %69 = vector.broadcast %68 : vector<8x1xf32> to vector<8x384xf32>
    %70 = arith.mulf %67, %69 : vector<8x384xf32>
    %c0_74 = arith.constant 0 : index
    %c0_75 = arith.constant 0 : index
    %71 = vector.load %arg8[%c0_74, %c0_75] : memref<8x1xf32, #tpu.memory_space<vmem>>, vector<8x1xf32>
    %72 = vector.broadcast %71 : vector<8x1xf32> to vector<8x384xf32>
    %73 = arith.addf %70, %72 : vector<8x384xf32>
    %cst_76 = arith.constant 0.000000e+00 : f32
    %74 = vector.broadcast %cst_76 : f32 to vector<8x384xf32>
    %75 = arith.maximumf %73, %74 : vector<8x384xf32>
    %c0_77 = arith.constant 0 : index
    %c0_78 = arith.constant 0 : index
    %76 = vector.load %arg10[%c0_77, %c0_78] : memref<1x384xf32, #tpu.memory_space<vmem>>, vector<1x384xf32>
    %77 = vector.broadcast %76 : vector<1x384xf32> to vector<8x384xf32>
    %78 = arith.mulf %75, %77 : vector<8x384xf32>
    %cst_79 = arith.constant 0.000000e+00 : f32
    %79 = vector.broadcast %cst_79 : f32 to vector<8x42xf32>
    %c0_80 = arith.constant 0 : index
    %c0_81 = arith.constant 0 : index
    %80 = vector.load %arg14[%c0_80, %c0_81] : memref<8x512xf32, #tpu.memory_space<vmem>>, vector<8x42xf32>
    tpu.vector_store %arg14[%c0_80, %c0_81], %79 {strides = array<i32>} : memref<8x512xf32, #tpu.memory_space<vmem>>, vector<8x42xf32>,
    %cst_82 = arith.constant 0.000000e+00 : f32
    %81 = vector.broadcast %cst_82 : f32 to vector<8x86xf32>
    %c0_83 = arith.constant 0 : index
    %c426 = arith.constant 426 : index
    %82 = vector.load %arg14[%c0_83, %c426] : memref<8x512xf32, #tpu.memory_space<vmem>>, vector<8x86xf32>
    tpu.vector_store %arg14[%c0_83, %c426], %81 {strides = array<i32>} : memref<8x512xf32, #tpu.memory_space<vmem>>, vector<8x86xf32>,
    %c0_84 = arith.constant 0 : index
    %c42_85 = arith.constant 42 : index
    %83 = vector.load %arg14[%c0_84, %c42_85] : memref<8x512xf32, #tpu.memory_space<vmem>>, vector<8x384xf32>
    tpu.vector_store %arg14[%c0_84, %c42_85], %78 {strides = array<i32>} : memref<8x512xf32, #tpu.memory_space<vmem>>, vector<8x384xf32>,
    %c0_86 = arith.constant 0 : index
    %c0_87 = arith.constant 0 : index
    %84 = vector.load %arg14[%c0_86, %c0_87] : memref<8x512xf32, #tpu.memory_space<vmem>>, vector<8x384xf32>
    %c0_88 = arith.constant 0 : index
    %c0_89 = arith.constant 0 : index
    %85 = vector.load %arg16[%c0_88, %c0_89] : memref<72x384xf32, #tpu.memory_space<vmem>>, vector<8x384xf32>
    tpu.vector_store %arg16[%c0_88, %c0_89], %84 {strides = array<i32>} : memref<72x384xf32, #tpu.memory_space<vmem>>, vector<8x384xf32>,
    %c0_90 = arith.constant 0 : index
    %c2_91 = arith.constant 2 : index
    %86 = vector.load %arg14[%c0_90, %c2_91] : memref<8x512xf32, #tpu.memory_space<vmem>>, vector<8x384xf32>
    %c8_92 = arith.constant 8 : index
    %c0_93 = arith.constant 0 : index
    %87 = vector.load %arg16[%c8_92, %c0_93] : memref<72x384xf32, #tpu.memory_space<vmem>>, vector<8x384xf32>
    tpu.vector_store %arg16[%c8_92, %c0_93], %86 {strides = array<i32>} : memref<72x384xf32, #tpu.memory_space<vmem>>, vector<8x384xf32>,
    %c0_94 = arith.constant 0 : index
    %c4_95 = arith.constant 4 : index
    %88 = vector.load %arg14[%c0_94, %c4_95] : memref<8x512xf32, #tpu.memory_space<vmem>>, vector<8x384xf32>
    %c16_96 = arith.constant 16 : index
    %c0_97 = arith.constant 0 : index
    %89 = vector.load %arg16[%c16_96, %c0_97] : memref<72x384xf32, #tpu.memory_space<vmem>>, vector<8x384xf32>
    tpu.vector_store %arg16[%c16_96, %c0_97], %88 {strides = array<i32>} : memref<72x384xf32, #tpu.memory_space<vmem>>, vector<8x384xf32>,
    %c0_98 = arith.constant 0 : index
    %c40_99 = arith.constant 40 : index
    %90 = vector.load %arg14[%c0_98, %c40_99] : memref<8x512xf32, #tpu.memory_space<vmem>>, vector<8x384xf32>
    %c24_100 = arith.constant 24 : index
    %c0_101 = arith.constant 0 : index
    %91 = vector.load %arg16[%c24_100, %c0_101] : memref<72x384xf32, #tpu.memory_space<vmem>>, vector<8x384xf32>
    tpu.vector_store %arg16[%c24_100, %c0_101], %90 {strides = array<i32>} : memref<72x384xf32, #tpu.memory_space<vmem>>, vector<8x384xf32>,
    %c0_102 = arith.constant 0 : index
    %c42_103 = arith.constant 42 : index
    %92 = vector.load %arg14[%c0_102, %c42_103] : memref<8x512xf32, #tpu.memory_space<vmem>>, vector<8x384xf32>
    %c32_104 = arith.constant 32 : index
    %c0_105 = arith.constant 0 : index
    %93 = vector.load %arg16[%c32_104, %c0_105] : memref<72x384xf32, #tpu.memory_space<vmem>>, vector<8x384xf32>
    tpu.vector_store %arg16[%c32_104, %c0_105], %92 {strides = array<i32>} : memref<72x384xf32, #tpu.memory_space<vmem>>, vector<8x384xf32>,
    %c0_106 = arith.constant 0 : index
    %c44_107 = arith.constant 44 : index
    %94 = vector.load %arg14[%c0_106, %c44_107] : memref<8x512xf32, #tpu.memory_space<vmem>>, vector<8x384xf32>
    %c40_108 = arith.constant 40 : index
    %c0_109 = arith.constant 0 : index
    %95 = vector.load %arg16[%c40_108, %c0_109] : memref<72x384xf32, #tpu.memory_space<vmem>>, vector<8x384xf32>
    tpu.vector_store %arg16[%c40_108, %c0_109], %94 {strides = array<i32>} : memref<72x384xf32, #tpu.memory_space<vmem>>, vector<8x384xf32>,
    %c0_110 = arith.constant 0 : index
    %c80_111 = arith.constant 80 : index
    %96 = vector.load %arg14[%c0_110, %c80_111] : memref<8x512xf32, #tpu.memory_space<vmem>>, vector<8x384xf32>
    %c48_112 = arith.constant 48 : index
    %c0_113 = arith.constant 0 : index
    %97 = vector.load %arg16[%c48_112, %c0_113] : memref<72x384xf32, #tpu.memory_space<vmem>>, vector<8x384xf32>
    tpu.vector_store %arg16[%c48_112, %c0_113], %96 {strides = array<i32>} : memref<72x384xf32, #tpu.memory_space<vmem>>, vector<8x384xf32>,
    %c0_114 = arith.constant 0 : index
    %c82_115 = arith.constant 82 : index
    %98 = vector.load %arg14[%c0_114, %c82_115] : memref<8x512xf32, #tpu.memory_space<vmem>>, vector<8x384xf32>
    %c56_116 = arith.constant 56 : index
    %c0_117 = arith.constant 0 : index
    %99 = vector.load %arg16[%c56_116, %c0_117] : memref<72x384xf32, #tpu.memory_space<vmem>>, vector<8x384xf32>
    tpu.vector_store %arg16[%c56_116, %c0_117], %98 {strides = array<i32>} : memref<72x384xf32, #tpu.memory_space<vmem>>, vector<8x384xf32>,
    %c0_118 = arith.constant 0 : index
    %c84_119 = arith.constant 84 : index
    %100 = vector.load %arg14[%c0_118, %c84_119] : memref<8x512xf32, #tpu.memory_space<vmem>>, vector<8x384xf32>
    %c64_120 = arith.constant 64 : index
    %c0_121 = arith.constant 0 : index
    %101 = vector.load %arg16[%c64_120, %c0_121] : memref<72x384xf32, #tpu.memory_space<vmem>>, vector<8x384xf32>
    tpu.vector_store %arg16[%c64_120, %c0_121], %100 {strides = array<i32>} : memref<72x384xf32, #tpu.memory_space<vmem>>, vector<8x384xf32>,
    %c0_122 = arith.constant 0 : index
    %c0_123 = arith.constant 0 : index
    %102 = vector.load %arg9[%c0_122, %c0_123] : memref<4x72xf32, #tpu.memory_space<vmem>>, vector<4x72xf32>
    %c0_124 = arith.constant 0 : index
    %c0_125 = arith.constant 0 : index
    %103 = vector.load %arg16[%c0_124, %c0_125] : memref<72x384xf32, #tpu.memory_space<vmem>>, vector<72x384xf32>
    %cst_126 = arith.constant dense<0.000000e+00> : vector<4x384xf32>
    %104 = tpu.matmul %102, %103, %cst_126 {dimension_numbers = #tpu.dot_dimension_numbers<[1], [0], [0], [1], [0, 0, 1, 1], [], []>} : vector<4x72xf32>, vector<72x384xf32>, vector<4x384xf32> -> vector<4x384xf32>
    %c0_127 = arith.constant 0 : index
    %c0_128 = arith.constant 0 : index
    %c0_129 = arith.constant 0 : index
    %c42_130 = arith.constant 42 : index
    %105 = vector.load %arg2[%c0_127, %c0_128, %c0_129, %c42_130] : memref<1x1x4x512xf32, #tpu.memory_space<vmem>>, vector<1x1x4x384xf32>
    %106 = vector.shape_cast %105 : vector<1x1x4x384xf32> to vector<4x384xf32>
    %107 = arith.addf %104, %106 : vector<4x384xf32>
    %c0_131 = arith.constant 0 : index
    %c0_132 = arith.constant 0 : index
    %c0_133 = arith.constant 0 : index
    %108 = vector.load %arg11[%c0_131, %c0_132, %c0_133] : memref<1x4x384xf32, #tpu.memory_space<vmem>>, vector<1x4x384xf32>
    %109 = vector.shape_cast %108 : vector<1x4x384xf32> to vector<4x384xf32>
    %110 = vector.shape_cast %107 : vector<4x384xf32> to vector<1x4x384xf32>
    tpu.vector_store %arg11[%c0_131, %c0_132, %c0_133], %110 {strides = array<i32>} : memref<1x4x384xf32, #tpu.memory_space<vmem>>, vector<1x4x384xf32>,
    return
  }
  func.func @transform_0(%arg0: i32, %arg1: i32) -> (i32, i32, i32, i32) {
    %c0_i32 = arith.constant 0 : i32
    %c0_i32_0 = arith.constant 0 : i32
    %c0_i32_1 = arith.constant 0 : i32
    %c0_i32_2 = arith.constant 0 : i32
    return %arg0, %c0_i32, %c0_i32_0, %c0_i32_1 : i32, i32, i32, i32
  }
  func.func @transform_1(%arg0: i32, %arg1: i32) -> (i32, i32, i32) {
    %c0_i32 = arith.constant 0 : i32
    %c0_i32_0 = arith.constant 0 : i32
    %c0_i32_1 = arith.constant 0 : i32
    %c0_i32_2 = arith.constant 0 : i32
    return %c0_i32, %c0_i32_0, %c0_i32_1 : i32, i32, i32
  }
  func.func @transform_2(%arg0: i32, %arg1: i32) -> (i32, i32) {
    %c0_i32 = arith.constant 0 : i32
    %c0_i32_0 = arith.constant 0 : i32
    %c0_i32_1 = arith.constant 0 : i32
    return %c0_i32, %c0_i32_0 : i32, i32
  }
  func.func @transform_3(%arg0: i32, %arg1: i32) -> (i32, i32) {
    %c0_i32 = arith.constant 0 : i32
    %c0_i32_0 = arith.constant 0 : i32
    %c0_i32_1 = arith.constant 0 : i32
    return %c0_i32, %c0_i32_0 : i32, i32
  }
  func.func @transform_4(%arg0: i32, %arg1: i32) -> (i32, i32) {
    %c0_i32 = arith.constant 0 : i32
    %c0_i32_0 = arith.constant 0 : i32
    %c0_i32_1 = arith.constant 0 : i32
    return %c0_i32, %c0_i32_0 : i32, i32
  }
  func.func @transform_5(%arg0: i32, %arg1: i32) -> (i32, i32) {
    %c0_i32 = arith.constant 0 : i32
    %c0_i32_0 = arith.constant 0 : i32
    %c0_i32_1 = arith.constant 0 : i32
    return %c0_i32, %c0_i32_0 : i32, i32
  }
  func.func @transform_6(%arg0: i32, %arg1: i32) -> (i32, i32) {
    %c0_i32 = arith.constant 0 : i32
    %c0_i32_0 = arith.constant 0 : i32
    %c0_i32_1 = arith.constant 0 : i32
    return %c0_i32, %c0_i32_0 : i32, i32
  }
  func.func @transform_7(%arg0: i32, %arg1: i32) -> (i32, i32) {
    %c0_i32 = arith.constant 0 : i32
    %c0_i32_0 = arith.constant 0 : i32
    return %arg1, %c0_i32 : i32, i32
  }
  func.func @transform_8(%arg0: i32, %arg1: i32) -> (i32, i32) {
    %c0_i32 = arith.constant 0 : i32
    %c0_i32_0 = arith.constant 0 : i32
    %c0_i32_1 = arith.constant 0 : i32
    return %c0_i32, %c0_i32_0 : i32, i32
  }
  func.func @transform_9(%arg0: i32, %arg1: i32) -> (i32, i32, i32) {
    %c0_i32 = arith.constant 0 : i32
    %c0_i32_0 = arith.constant 0 : i32
    return %arg0, %arg1, %c0_i32 : i32, i32, i32
  }
  func.func @transform_10(%arg0: i32, %arg1: i32) -> (i32, i32, i32, i32) {
    %c0_i32 = arith.constant 0 : i32
    %c0_i32_0 = arith.constant 0 : i32
    %c0_i32_1 = arith.constant 0 : i32
    %c0_i32_2 = arith.constant 0 : i32
    return %arg0, %c0_i32, %c0_i32_0, %c0_i32_1 : i32, i32, i32, i32
  }
}

module attributes {stable_mosaic.version = 11 : i64} {
  func.func @kernel(%arg0: i32, %arg1: i32, %arg2: memref<1x1x4x512xf32, #tpu.memory_space<vmem>>, %arg3: memref<1x1x512xf32, #tpu.memory_space<vmem>>, %arg4: memref<4x1xf32, #tpu.memory_space<vmem>>, %arg5: memref<4x1xf32, #tpu.memory_space<vmem>>, %arg6: memref<8x72xf32, #tpu.memory_space<vmem>>, %arg7: memref<8x1xf32, #tpu.memory_space<vmem>>, %arg8: memref<8x1xf32, #tpu.memory_space<vmem>>, %arg9: memref<4x72xf32, #tpu.memory_space<vmem>>, %arg10: memref<1x384xf32, #tpu.memory_space<vmem>>, %arg11: memref<1x4x384xf32, #tpu.memory_space<vmem>>, %arg12: memref<1x1x4x512xf32, #tpu.memory_space<vmem>>, %arg13: memref<1x4x512xf32, #tpu.memory_space<vmem>>, %arg14: memref<8x512xf32, #tpu.memory_space<vmem>>, %arg15: memref<72x384xf32, #tpu.memory_space<vmem>>, %arg16: memref<72x384xf32, #tpu.memory_space<vmem>>) attributes {dimension_semantics = [#tpu.dimension_semantics<parallel>, #tpu.dimension_semantics<arbitrary>], iteration_bounds = array<i64: 2, 1>, scalar_prefetch = 0 : i64, scratch_operands = 4 : i64, tpu.core_type = #tpu.core_type<tc>, window_params = [{transform_indices = @transform_0, window_bounds = array<i64: 1, 1, 4, 512>}, {pipeline_mode = #tpu.pipeline_mode<synchronous>, transform_indices = @transform_1, window_bounds = array<i64: 1, 1, 512>}, {pipeline_mode = #tpu.pipeline_mode<synchronous>, transform_indices = @transform_2, window_bounds = array<i64: 4, 1>}, {pipeline_mode = #tpu.pipeline_mode<synchronous>, transform_indices = @transform_3, window_bounds = array<i64: 4, 1>}, {pipeline_mode = #tpu.pipeline_mode<synchronous>, transform_indices = @transform_4, window_bounds = array<i64: 8, 72>}, {pipeline_mode = #tpu.pipeline_mode<synchronous>, transform_indices = @transform_5, window_bounds = array<i64: 8, 1>}, {pipeline_mode = #tpu.pipeline_mode<synchronous>, transform_indices = @transform_6, window_bounds = array<i64: 8, 1>}, {transform_indices = @transform_7, window_bounds = array<i64: 4, 72>}, {pipeline_mode = #tpu.pipeline_mode<synchronous>, transform_indices = @transform_8, window_bounds = array<i64: 1, 384>}, {transform_indices = @transform_9, window_bounds = array<i64: 1, 4, 384>}, {transform_indices = @transform_10, window_bounds = array<i64: 1, 1, 4, 512>}]} {
    %c0 = arith.constant 0 : index
    %c0_0 = arith.constant 0 : index
    %0 = vector.load %arg4[%c0, %c0_0] : memref<4x1xf32, #tpu.memory_space<vmem>>, vector<4x1xf32>
    %c0_1 = arith.constant 0 : index
    %c0_2 = arith.constant 0 : index
    %1 = vector.load %arg5[%c0_1, %c0_2] : memref<4x1xf32, #tpu.memory_space<vmem>>, vector<4x1xf32>
    %c0_3 = arith.constant 0 : index
    %c0_4 = arith.constant 0 : index
    %c0_5 = arith.constant 0 : index
    %c0_6 = arith.constant 0 : index
    %2 = vector.load %arg2[%c0_3, %c0_4, %c0_5, %c0_6] : memref<1x1x4x512xf32, #tpu.memory_space<vmem>>, vector<1x1x4x512xf32>
    %3 = vector.shape_cast %2 : vector<1x1x4x512xf32> to vector<4x512xf32>
    %4 = vector.broadcast %0 : vector<4x1xf32> to vector<4x512xf32>
    %5 = arith.mulf %3, %4 : vector<4x512xf32>
    %6 = vector.broadcast %1 : vector<4x1xf32> to vector<4x512xf32>
    %7 = arith.addf %5, %6 : vector<4x512xf32>
    %cst = arith.constant 0.000000e+00 : f32
    %8 = vector.broadcast %cst : f32 to vector<4x512xf32>
    %9 = arith.maximumf %7, %8 : vector<4x512xf32>
    %c0_7 = arith.constant 0 : index
    %c0_8 = arith.constant 0 : index
    %c0_9 = arith.constant 0 : index
    %c0_10 = arith.constant 0 : index
    %10 = vector.load %arg12[%c0_7, %c0_8, %c0_9, %c0_10] : memref<1x1x4x512xf32, #tpu.memory_space<vmem>>, vector<1x1x4x512xf32>
    %11 = vector.shape_cast %10 : vector<1x1x4x512xf32> to vector<4x512xf32>
    %12 = vector.shape_cast %9 : vector<4x512xf32> to vector<1x1x4x512xf32>
    tpu.vector_store %arg12[%c0_7, %c0_8, %c0_9, %c0_10], %12 {strides = array<i32>} : memref<1x1x4x512xf32, #tpu.memory_space<vmem>>, vector<1x1x4x512xf32>,
    %c0_11 = arith.constant 0 : index
    %c0_12 = arith.constant 0 : index
    %c0_13 = arith.constant 0 : index
    %13 = vector.load %arg3[%c0_11, %c0_12, %c0_13] : memref<1x1x512xf32, #tpu.memory_space<vmem>>, vector<1x1x512xf32>
    %14 = vector.shape_cast %13 : vector<1x1x512xf32> to vector<1x512xf32>
    %15 = vector.broadcast %14 : vector<1x512xf32> to vector<4x512xf32>
    %16 = arith.mulf %9, %15 : vector<4x512xf32>
    %c0_14 = arith.constant 0 : index
    %c0_15 = arith.constant 0 : index
    %c0_16 = arith.constant 0 : index
    %17 = vector.load %arg13[%c0_14, %c0_15, %c0_16] : memref<1x4x512xf32, #tpu.memory_space<vmem>>, vector<1x4x512xf32>
    %18 = vector.shape_cast %17 : vector<1x4x512xf32> to vector<4x512xf32>
    %19 = vector.shape_cast %16 : vector<4x512xf32> to vector<1x4x512xf32>
    tpu.vector_store %arg13[%c0_14, %c0_15, %c0_16], %19 {strides = array<i32>} : memref<1x4x512xf32, #tpu.memory_space<vmem>>, vector<1x4x512xf32>,
    %cst_17 = arith.constant 0.000000e+00 : f32
    %20 = vector.broadcast %cst_17 : f32 to vector<4x384xf32>
    %c4 = arith.constant 4 : index
    %c0_18 = arith.constant 0 : index
    %21 = vector.load %arg15[%c4, %c0_18] : memref<72x384xf32, #tpu.memory_space<vmem>>, vector<4x384xf32>
    tpu.vector_store %arg15[%c4, %c0_18], %20 {strides = array<i32>} : memref<72x384xf32, #tpu.memory_space<vmem>>, vector<4x384xf32>,
    %cst_19 = arith.constant 0.000000e+00 : f32
    %22 = vector.broadcast %cst_19 : f32 to vector<4x384xf32>
    %c12 = arith.constant 12 : index
    %c0_20 = arith.constant 0 : index
    %23 = vector.load %arg15[%c12, %c0_20] : memref<72x384xf32, #tpu.memory_space<vmem>>, vector<4x384xf32>
    tpu.vector_store %arg15[%c12, %c0_20], %22 {strides = array<i32>} : memref<72x384xf32, #tpu.memory_space<vmem>>, vector<4x384xf32>,
    %cst_21 = arith.constant 0.000000e+00 : f32
    %24 = vector.broadcast %cst_21 : f32 to vector<4x384xf32>
    %c20 = arith.constant 20 : index
    %c0_22 = arith.constant 0 : index
    %25 = vector.load %arg15[%c20, %c0_22] : memref<72x384xf32, #tpu.memory_space<vmem>>, vector<4x384xf32>
    tpu.vector_store %arg15[%c20, %c0_22], %24 {strides = array<i32>} : memref<72x384xf32, #tpu.memory_space<vmem>>, vector<4x384xf32>,
    %cst_23 = arith.constant 0.000000e+00 : f32
    %26 = vector.broadcast %cst_23 : f32 to vector<4x384xf32>
    %c28 = arith.constant 28 : index
    %c0_24 = arith.constant 0 : index
    %27 = vector.load %arg15[%c28, %c0_24] : memref<72x384xf32, #tpu.memory_space<vmem>>, vector<4x384xf32>
    tpu.vector_store %arg15[%c28, %c0_24], %26 {strides = array<i32>} : memref<72x384xf32, #tpu.memory_space<vmem>>, vector<4x384xf32>,
    %cst_25 = arith.constant 0.000000e+00 : f32
    %28 = vector.broadcast %cst_25 : f32 to vector<4x384xf32>
    %c36 = arith.constant 36 : index
    %c0_26 = arith.constant 0 : index
    %29 = vector.load %arg15[%c36, %c0_26] : memref<72x384xf32, #tpu.memory_space<vmem>>, vector<4x384xf32>
    tpu.vector_store %arg15[%c36, %c0_26], %28 {strides = array<i32>} : memref<72x384xf32, #tpu.memory_space<vmem>>, vector<4x384xf32>,
    %cst_27 = arith.constant 0.000000e+00 : f32
    %30 = vector.broadcast %cst_27 : f32 to vector<4x384xf32>
    %c44 = arith.constant 44 : index
    %c0_28 = arith.constant 0 : index
    %31 = vector.load %arg15[%c44, %c0_28] : memref<72x384xf32, #tpu.memory_space<vmem>>, vector<4x384xf32>
    tpu.vector_store %arg15[%c44, %c0_28], %30 {strides = array<i32>} : memref<72x384xf32, #tpu.memory_space<vmem>>, vector<4x384xf32>,
    %cst_29 = arith.constant 0.000000e+00 : f32
    %32 = vector.broadcast %cst_29 : f32 to vector<4x384xf32>
    %c52 = arith.constant 52 : index
    %c0_30 = arith.constant 0 : index
    %33 = vector.load %arg15[%c52, %c0_30] : memref<72x384xf32, #tpu.memory_space<vmem>>, vector<4x384xf32>
    tpu.vector_store %arg15[%c52, %c0_30], %32 {strides = array<i32>} : memref<72x384xf32, #tpu.memory_space<vmem>>, vector<4x384xf32>,
    %cst_31 = arith.constant 0.000000e+00 : f32
    %34 = vector.broadcast %cst_31 : f32 to vector<4x384xf32>
    %c60 = arith.constant 60 : index
    %c0_32 = arith.constant 0 : index
    %35 = vector.load %arg15[%c60, %c0_32] : memref<72x384xf32, #tpu.memory_space<vmem>>, vector<4x384xf32>
    tpu.vector_store %arg15[%c60, %c0_32], %34 {strides = array<i32>} : memref<72x384xf32, #tpu.memory_space<vmem>>, vector<4x384xf32>,
    %cst_33 = arith.constant 0.000000e+00 : f32
    %36 = vector.broadcast %cst_33 : f32 to vector<4x384xf32>
    %c68 = arith.constant 68 : index
    %c0_34 = arith.constant 0 : index
    %37 = vector.load %arg15[%c68, %c0_34] : memref<72x384xf32, #tpu.memory_space<vmem>>, vector<4x384xf32>
    tpu.vector_store %arg15[%c68, %c0_34], %36 {strides = array<i32>} : memref<72x384xf32, #tpu.memory_space<vmem>>, vector<4x384xf32>,
    %c0_35 = arith.constant 0 : index
    %c0_36 = arith.constant 0 : index
    %c0_37 = arith.constant 0 : index
    %38 = vector.load %arg13[%c0_35, %c0_36, %c0_37] : memref<1x4x512xf32, #tpu.memory_space<vmem>>, vector<1x4x384xf32>
    %39 = vector.shape_cast %38 : vector<1x4x384xf32> to vector<4x384xf32>
    %c0_38 = arith.constant 0 : index
    %c0_39 = arith.constant 0 : index
    %40 = vector.load %arg15[%c0_38, %c0_39] : memref<72x384xf32, #tpu.memory_space<vmem>>, vector<4x384xf32>
    tpu.vector_store %arg15[%c0_38, %c0_39], %39 {strides = array<i32>} : memref<72x384xf32, #tpu.memory_space<vmem>>, vector<4x384xf32>,
    %c0_40 = arith.constant 0 : index
    %c0_41 = arith.constant 0 : index
    %c2 = arith.constant 2 : index
    %41 = vector.load %arg13[%c0_40, %c0_41, %c2] : memref<1x4x512xf32, #tpu.memory_space<vmem>>, vector<1x4x384xf32>
    %42 = vector.shape_cast %41 : vector<1x4x384xf32> to vector<4x384xf32>
    %c8 = arith.constant 8 : index
    %c0_42 = arith.constant 0 : index
    %43 = vector.load %arg15[%c8, %c0_42] : memref<72x384xf32, #tpu.memory_space<vmem>>, vector<4x384xf32>
    tpu.vector_store %arg15[%c8, %c0_42], %42 {strides = array<i32>} : memref<72x384xf32, #tpu.memory_space<vmem>>, vector<4x384xf32>,
    %c0_43 = arith.constant 0 : index
    %c0_44 = arith.constant 0 : index
    %c4_45 = arith.constant 4 : index
    %44 = vector.load %arg13[%c0_43, %c0_44, %c4_45] : memref<1x4x512xf32, #tpu.memory_space<vmem>>, vector<1x4x384xf32>
    %45 = vector.shape_cast %44 : vector<1x4x384xf32> to vector<4x384xf32>
    %c16 = arith.constant 16 : index
    %c0_46 = arith.constant 0 : index
    %46 = vector.load %arg15[%c16, %c0_46] : memref<72x384xf32, #tpu.memory_space<vmem>>, vector<4x384xf32>
    tpu.vector_store %arg15[%c16, %c0_46], %45 {strides = array<i32>} : memref<72x384xf32, #tpu.memory_space<vmem>>, vector<4x384xf32>,
    %c0_47 = arith.constant 0 : index
    %c0_48 = arith.constant 0 : index
    %c40 = arith.constant 40 : index
    %47 = vector.load %arg13[%c0_47, %c0_48, %c40] : memref<1x4x512xf32, #tpu.memory_space<vmem>>, vector<1x4x384xf32>
    %48 = vector.shape_cast %47 : vector<1x4x384xf32> to vector<4x384xf32>
    %c24 = arith.constant 24 : index
    %c0_49 = arith.constant 0 : index
    %49 = vector.load %arg15[%c24, %c0_49] : memref<72x384xf32, #tpu.memory_space<vmem>>, vector<4x384xf32>
    tpu.vector_store %arg15[%c24, %c0_49], %48 {strides = array<i32>} : memref<72x384xf32, #tpu.memory_space<vmem>>, vector<4x384xf32>,
    %c0_50 = arith.constant 0 : index
    %c0_51 = arith.constant 0 : index
    %c42 = arith.constant 42 : index
    %50 = vector.load %arg13[%c0_50, %c0_51, %c42] : memref<1x4x512xf32, #tpu.memory_space<vmem>>, vector<1x4x384xf32>
    %51 = vector.shape_cast %50 : vector<1x4x384xf32> to vector<4x384xf32>
    %c32 = arith.constant 32 : index
    %c0_52 = arith.constant 0 : index
    %52 = vector.load %arg15[%c32, %c0_52] : memref<72x384xf32, #tpu.memory_space<vmem>>, vector<4x384xf32>
    tpu.vector_store %arg15[%c32, %c0_52], %51 {strides = array<i32>} : memref<72x384xf32, #tpu.memory_space<vmem>>, vector<4x384xf32>,
    %c0_53 = arith.constant 0 : index
    %c0_54 = arith.constant 0 : index
    %c44_55 = arith.constant 44 : index
    %53 = vector.load %arg13[%c0_53, %c0_54, %c44_55] : memref<1x4x512xf32, #tpu.memory_space<vmem>>, vector<1x4x384xf32>
    %54 = vector.shape_cast %53 : vector<1x4x384xf32> to vector<4x384xf32>
    %c40_56 = arith.constant 40 : index
    %c0_57 = arith.constant 0 : index
    %55 = vector.load %arg15[%c40_56, %c0_57] : memref<72x384xf32, #tpu.memory_space<vmem>>, vector<4x384xf32>
    tpu.vector_store %arg15[%c40_56, %c0_57], %54 {strides = array<i32>} : memref<72x384xf32, #tpu.memory_space<vmem>>, vector<4x384xf32>,
    %c0_58 = arith.constant 0 : index
    %c0_59 = arith.constant 0 : index
    %c80 = arith.constant 80 : index
    %56 = vector.load %arg13[%c0_58, %c0_59, %c80] : memref<1x4x512xf32, #tpu.memory_space<vmem>>, vector<1x4x384xf32>
    %57 = vector.shape_cast %56 : vector<1x4x384xf32> to vector<4x384xf32>
    %c48 = arith.constant 48 : index
    %c0_60 = arith.constant 0 : index
    %58 = vector.load %arg15[%c48, %c0_60] : memref<72x384xf32, #tpu.memory_space<vmem>>, vector<4x384xf32>
    tpu.vector_store %arg15[%c48, %c0_60], %57 {strides = array<i32>} : memref<72x384xf32, #tpu.memory_space<vmem>>, vector<4x384xf32>,
    %c0_61 = arith.constant 0 : index
    %c0_62 = arith.constant 0 : index
    %c82 = arith.constant 82 : index
    %59 = vector.load %arg13[%c0_61, %c0_62, %c82] : memref<1x4x512xf32, #tpu.memory_space<vmem>>, vector<1x4x384xf32>
    %60 = vector.shape_cast %59 : vector<1x4x384xf32> to vector<4x384xf32>
    %c56 = arith.constant 56 : index
    %c0_63 = arith.constant 0 : index
    %61 = vector.load %arg15[%c56, %c0_63] : memref<72x384xf32, #tpu.memory_space<vmem>>, vector<4x384xf32>
    tpu.vector_store %arg15[%c56, %c0_63], %60 {strides = array<i32>} : memref<72x384xf32, #tpu.memory_space<vmem>>, vector<4x384xf32>,
    %c0_64 = arith.constant 0 : index
    %c0_65 = arith.constant 0 : index
    %c84 = arith.constant 84 : index
    %62 = vector.load %arg13[%c0_64, %c0_65, %c84] : memref<1x4x512xf32, #tpu.memory_space<vmem>>, vector<1x4x384xf32>
    %63 = vector.shape_cast %62 : vector<1x4x384xf32> to vector<4x384xf32>
    %c64 = arith.constant 64 : index
    %c0_66 = arith.constant 0 : index
    %64 = vector.load %arg15[%c64, %c0_66] : memref<72x384xf32, #tpu.memory_space<vmem>>, vector<4x384xf32>
    tpu.vector_store %arg15[%c64, %c0_66], %63 {strides = array<i32>} : memref<72x384xf32, #tpu.memory_space<vmem>>, vector<4x384xf32>,
    %c0_67 = arith.constant 0 : index
    %c0_68 = arith.constant 0 : index
    %65 = vector.load %arg6[%c0_67, %c0_68] : memref<8x72xf32, #tpu.memory_space<vmem>>, vector<8x72xf32>
    %c0_69 = arith.constant 0 : index
    %c0_70 = arith.constant 0 : index
    %66 = vector.load %arg15[%c0_69, %c0_70] : memref<72x384xf32, #tpu.memory_space<vmem>>, vector<72x384xf32>
    %cst_71 = arith.constant dense<0.000000e+00> : vector<8x384xf32>
    %67 = tpu.matmul %65, %66, %cst_71 {dimension_numbers = #tpu.dot_dimension_numbers<[1], [0], [0], [1], [0, 0, 1, 1], [], []>} : vector<8x72xf32>, vector<72x384xf32>, vector<8x384xf32> -> vector<8x384xf32>
    %c0_72 = arith.constant 0 : index
    %c0_73 = arith.constant 0 : index
    %68 = vector.load %arg7[%c0_72, %c0_73] : memref<8x1xf32, #tpu.memory_space<vmem>>, vector<8x1xf32>
    %69 = vector.broadcast %68 : vector<8x1xf32> to vector<8x384xf32>
    %70 = arith.mulf %67, %69 : vector<8x384xf32>
    %c0_74 = arith.constant 0 : index
    %c0_75 = arith.constant 0 : index
    %71 = vector.load %arg8[%c0_74, %c0_75] : memref<8x1xf32, #tpu.memory_space<vmem>>, vector<8x1xf32>
    %72 = vector.broadcast %71 : vector<8x1xf32> to vector<8x384xf32>
    %73 = arith.addf %70, %72 : vector<8x384xf32>
    %cst_76 = arith.constant 0.000000e+00 : f32
    %74 = vector.broadcast %cst_76 : f32 to vector<8x384xf32>
    %75 = arith.maximumf %73, %74 : vector<8x384xf32>
    %c0_77 = arith.constant 0 : index
    %c0_78 = arith.constant 0 : index
    %76 = vector.load %arg10[%c0_77, %c0_78] : memref<1x384xf32, #tpu.memory_space<vmem>>, vector<1x384xf32>
    %77 = vector.broadcast %76 : vector<1x384xf32> to vector<8x384xf32>
    %78 = arith.mulf %75, %77 : vector<8x384xf32>
    %cst_79 = arith.constant 0.000000e+00 : f32
    %79 = vector.broadcast %cst_79 : f32 to vector<8x42xf32>
    %c0_80 = arith.constant 0 : index
    %c0_81 = arith.constant 0 : index
    %80 = vector.load %arg14[%c0_80, %c0_81] : memref<8x512xf32, #tpu.memory_space<vmem>>, vector<8x42xf32>
    tpu.vector_store %arg14[%c0_80, %c0_81], %79 {strides = array<i32>} : memref<8x512xf32, #tpu.memory_space<vmem>>, vector<8x42xf32>,
    %cst_82 = arith.constant 0.000000e+00 : f32
    %81 = vector.broadcast %cst_82 : f32 to vector<8x86xf32>
    %c0_83 = arith.constant 0 : index
    %c426 = arith.constant 426 : index
    %82 = vector.load %arg14[%c0_83, %c426] : memref<8x512xf32, #tpu.memory_space<vmem>>, vector<8x86xf32>
    tpu.vector_store %arg14[%c0_83, %c426], %81 {strides = array<i32>} : memref<8x512xf32, #tpu.memory_space<vmem>>, vector<8x86xf32>,
    %c0_84 = arith.constant 0 : index
    %c42_85 = arith.constant 42 : index
    %83 = vector.load %arg14[%c0_84, %c42_85] : memref<8x512xf32, #tpu.memory_space<vmem>>, vector<8x384xf32>
    tpu.vector_store %arg14[%c0_84, %c42_85], %78 {strides = array<i32>} : memref<8x512xf32, #tpu.memory_space<vmem>>, vector<8x384xf32>,
    %c0_86 = arith.constant 0 : index
    %c0_87 = arith.constant 0 : index
    %84 = vector.load %arg14[%c0_86, %c0_87] : memref<8x512xf32, #tpu.memory_space<vmem>>, vector<8x384xf32>
    %c0_88 = arith.constant 0 : index
    %c0_89 = arith.constant 0 : index
    %85 = vector.load %arg16[%c0_88, %c0_89] : memref<72x384xf32, #tpu.memory_space<vmem>>, vector<8x384xf32>
    tpu.vector_store %arg16[%c0_88, %c0_89], %84 {strides = array<i32>} : memref<72x384xf32, #tpu.memory_space<vmem>>, vector<8x384xf32>,
    %c0_90 = arith.constant 0 : index
    %c2_91 = arith.constant 2 : index
    %86 = vector.load %arg14[%c0_90, %c2_91] : memref<8x512xf32, #tpu.memory_space<vmem>>, vector<8x384xf32>
    %c8_92 = arith.constant 8 : index
    %c0_93 = arith.constant 0 : index
    %87 = vector.load %arg16[%c8_92, %c0_93] : memref<72x384xf32, #tpu.memory_space<vmem>>, vector<8x384xf32>
    tpu.vector_store %arg16[%c8_92, %c0_93], %86 {strides = array<i32>} : memref<72x384xf32, #tpu.memory_space<vmem>>, vector<8x384xf32>,
    %c0_94 = arith.constant 0 : index
    %c4_95 = arith.constant 4 : index
    %88 = vector.load %arg14[%c0_94, %c4_95] : memref<8x512xf32, #tpu.memory_space<vmem>>, vector<8x384xf32>
    %c16_96 = arith.constant 16 : index
    %c0_97 = arith.constant 0 : index
    %89 = vector.load %arg16[%c16_96, %c0_97] : memref<72x384xf32, #tpu.memory_space<vmem>>, vector<8x384xf32>
    tpu.vector_store %arg16[%c16_96, %c0_97], %88 {strides = array<i32>} : memref<72x384xf32, #tpu.memory_space<vmem>>, vector<8x384xf32>,
    %c0_98 = arith.constant 0 : index
    %c40_99 = arith.constant 40 : index
    %90 = vector.load %arg14[%c0_98, %c40_99] : memref<8x512xf32, #tpu.memory_space<vmem>>, vector<8x384xf32>
    %c24_100 = arith.constant 24 : index
    %c0_101 = arith.constant 0 : index
    %91 = vector.load %arg16[%c24_100, %c0_101] : memref<72x384xf32, #tpu.memory_space<vmem>>, vector<8x384xf32>
    tpu.vector_store %arg16[%c24_100, %c0_101], %90 {strides = array<i32>} : memref<72x384xf32, #tpu.memory_space<vmem>>, vector<8x384xf32>,
    %c0_102 = arith.constant 0 : index
    %c42_103 = arith.constant 42 : index
    %92 = vector.load %arg14[%c0_102, %c42_103] : memref<8x512xf32, #tpu.memory_space<vmem>>, vector<8x384xf32>
    %c32_104 = arith.constant 32 : index
    %c0_105 = arith.constant 0 : index
    %93 = vector.load %arg16[%c32_104, %c0_105] : memref<72x384xf32, #tpu.memory_space<vmem>>, vector<8x384xf32>
    tpu.vector_store %arg16[%c32_104, %c0_105], %92 {strides = array<i32>} : memref<72x384xf32, #tpu.memory_space<vmem>>, vector<8x384xf32>,
    %c0_106 = arith.constant 0 : index
    %c44_107 = arith.constant 44 : index
    %94 = vector.load %arg14[%c0_106, %c44_107] : memref<8x512xf32, #tpu.memory_space<vmem>>, vector<8x384xf32>
    %c40_108 = arith.constant 40 : index
    %c0_109 = arith.constant 0 : index
    %95 = vector.load %arg16[%c40_108, %c0_109] : memref<72x384xf32, #tpu.memory_space<vmem>>, vector<8x384xf32>
    tpu.vector_store %arg16[%c40_108, %c0_109], %94 {strides = array<i32>} : memref<72x384xf32, #tpu.memory_space<vmem>>, vector<8x384xf32>,
    %c0_110 = arith.constant 0 : index
    %c80_111 = arith.constant 80 : index
    %96 = vector.load %arg14[%c0_110, %c80_111] : memref<8x512xf32, #tpu.memory_space<vmem>>, vector<8x384xf32>
    %c48_112 = arith.constant 48 : index
    %c0_113 = arith.constant 0 : index
    %97 = vector.load %arg16[%c48_112, %c0_113] : memref<72x384xf32, #tpu.memory_space<vmem>>, vector<8x384xf32>
    tpu.vector_store %arg16[%c48_112, %c0_113], %96 {strides = array<i32>} : memref<72x384xf32, #tpu.memory_space<vmem>>, vector<8x384xf32>,
    %c0_114 = arith.constant 0 : index
    %c82_115 = arith.constant 82 : index
    %98 = vector.load %arg14[%c0_114, %c82_115] : memref<8x512xf32, #tpu.memory_space<vmem>>, vector<8x384xf32>
    %c56_116 = arith.constant 56 : index
    %c0_117 = arith.constant 0 : index
    %99 = vector.load %arg16[%c56_116, %c0_117] : memref<72x384xf32, #tpu.memory_space<vmem>>, vector<8x384xf32>
    tpu.vector_store %arg16[%c56_116, %c0_117], %98 {strides = array<i32>} : memref<72x384xf32, #tpu.memory_space<vmem>>, vector<8x384xf32>,
    %c0_118 = arith.constant 0 : index
    %c84_119 = arith.constant 84 : index
    %100 = vector.load %arg14[%c0_118, %c84_119] : memref<8x512xf32, #tpu.memory_space<vmem>>, vector<8x384xf32>
    %c64_120 = arith.constant 64 : index
    %c0_121 = arith.constant 0 : index
    %101 = vector.load %arg16[%c64_120, %c0_121] : memref<72x384xf32, #tpu.memory_space<vmem>>, vector<8x384xf32>
    tpu.vector_store %arg16[%c64_120, %c0_121], %100 {strides = array<i32>} : memref<72x384xf32, #tpu.memory_space<vmem>>, vector<8x384xf32>,
    %c0_122 = arith.constant 0 : index
    %c0_123 = arith.constant 0 : index
    %102 = vector.load %arg9[%c0_122, %c0_123] : memref<4x72xf32, #tpu.memory_space<vmem>>, vector<4x72xf32>
    %c0_124 = arith.constant 0 : index
    %c0_125 = arith.constant 0 : index
    %103 = vector.load %arg16[%c0_124, %c0_125] : memref<72x384xf32, #tpu.memory_space<vmem>>, vector<72x384xf32>
    %cst_126 = arith.constant dense<0.000000e+00> : vector<4x384xf32>
    %104 = tpu.matmul %102, %103, %cst_126 {dimension_numbers = #tpu.dot_dimension_numbers<[1], [0], [0], [1], [0, 0, 1, 1], [], []>} : vector<4x72xf32>, vector<72x384xf32>, vector<4x384xf32> -> vector<4x384xf32>
    %c0_127 = arith.constant 0 : index
    %c0_128 = arith.constant 0 : index
    %c0_129 = arith.constant 0 : index
    %c42_130 = arith.constant 42 : index
    %105 = vector.load %arg2[%c0_127, %c0_128, %c0_129, %c42_130] : memref<1x1x4x512xf32, #tpu.memory_space<vmem>>, vector<1x1x4x384xf32>
    %106 = vector.shape_cast %105 : vector<1x1x4x384xf32> to vector<4x384xf32>
    %107 = arith.addf %104, %106 : vector<4x384xf32>
    %c0_131 = arith.constant 0 : index
    %c0_132 = arith.constant 0 : index
    %c0_133 = arith.constant 0 : index
    %108 = vector.load %arg11[%c0_131, %c0_132, %c0_133] : memref<1x4x384xf32, #tpu.memory_space<vmem>>, vector<1x4x384xf32>
    %109 = vector.shape_cast %108 : vector<1x4x384xf32> to vector<4x384xf32>
    %110 = vector.shape_cast %107 : vector<4x384xf32> to vector<1x4x384xf32>
    tpu.vector_store %arg11[%c0_131, %c0_132, %c0_133], %110 {strides = array<i32>} : memref<1x4x384xf32, #tpu.memory_space<vmem>>, vector<1x4x384xf32>,
    return
  }
  func.func @transform_0(%arg0: i32, %arg1: i32) -> (i32, i32, i32, i32) {
    %c0_i32 = arith.constant 0 : i32
    %c0_i32_0 = arith.constant 0 : i32
    %c0_i32_1 = arith.constant 0 : i32
    %c0_i32_2 = arith.constant 0 : i32
    return %arg0, %c0_i32, %c0_i32_0, %c0_i32_1 : i32, i32, i32, i32
  }
  func.func @transform_1(%arg0: i32, %arg1: i32) -> (i32, i32, i32) {
    %c0_i32 = arith.constant 0 : i32
    %c0_i32_0 = arith.constant 0 : i32
    %c0_i32_1 = arith.constant 0 : i32
    %c0_i32_2 = arith.constant 0 : i32
    return %c0_i32, %c0_i32_0, %c0_i32_1 : i32, i32, i32
  }
  func.func @transform_2(%arg0: i32, %arg1: i32) -> (i32, i32) {
    %c0_i32 = arith.constant 0 : i32
    %c0_i32_0 = arith.constant 0 : i32
    %c0_i32_1 = arith.constant 0 : i32
    return %c0_i32, %c0_i32_0 : i32, i32
  }
  func.func @transform_3(%arg0: i32, %arg1: i32) -> (i32, i32) {
    %c0_i32 = arith.constant 0 : i32
    %c0_i32_0 = arith.constant 0 : i32
    %c0_i32_1 = arith.constant 0 : i32
    return %c0_i32, %c0_i32_0 : i32, i32
  }
  func.func @transform_4(%arg0: i32, %arg1: i32) -> (i32, i32) {
    %c0_i32 = arith.constant 0 : i32
    %c0_i32_0 = arith.constant 0 : i32
    %c0_i32_1 = arith.constant 0 : i32
    return %c0_i32, %c0_i32_0 : i32, i32
  }
  func.func @transform_5(%arg0: i32, %arg1: i32) -> (i32, i32) {
    %c0_i32 = arith.constant 0 : i32
    %c0_i32_0 = arith.constant 0 : i32
    %c0_i32_1 = arith.constant 0 : i32
    return %c0_i32, %c0_i32_0 : i32, i32
  }
  func.func @transform_6(%arg0: i32, %arg1: i32) -> (i32, i32) {
    %c0_i32 = arith.constant 0 : i32
    %c0_i32_0 = arith.constant 0 : i32
    %c0_i32_1 = arith.constant 0 : i32
    return %c0_i32, %c0_i32_0 : i32, i32
  }
  func.func @transform_7(%arg0: i32, %arg1: i32) -> (i32, i32) {
    %c0_i32 = arith.constant 0 : i32
    %c0_i32_0 = arith.constant 0 : i32
    return %arg1, %c0_i32 : i32, i32
  }
  func.func @transform_8(%arg0: i32, %arg1: i32) -> (i32, i32) {
    %c0_i32 = arith.constant 0 : i32
    %c0_i32_0 = arith.constant 0 : i32
    %c0_i32_1 = arith.constant 0 : i32
    return %c0_i32, %c0_i32_0 : i32, i32
  }
  func.func @transform_9(%arg0: i32, %arg1: i32) -> (i32, i32, i32) {
    %c0_i32 = arith.constant 0 : i32
    %c0_i32_0 = arith.constant 0 : i32
    return %arg0, %arg1, %c0_i32 : i32, i32, i32
  }
  func.func @transform_10(%arg0: i32, %arg1: i32) -> (i32, i32, i32, i32) {
    %c0_i32 = arith.constant 0 : i32
    %c0_i32_0 = arith.constant 0 : i32
    %c0_i32_1 = arith.constant 0 : i32
    %c0_i32_2 = arith.constant 0 : i32
    return %arg0, %c0_i32, %c0_i32_0, %c0_i32_1 : i32, i32, i32, i32
  }
}

</mosaic_0001>

<bundles_post_ra>
// kernel: tpu_custom_call.1
= control target key start
LH: loop header
LB: loop body
LE: loop exit
PB: predicated region body
PF: predicated region fallthrough
CT: control target
= control target key end

     0   :  { %16 = vsyncpa [#allocation7], 0  ;;  %s2474_s0 = inlined_call_operand.hbm [shape: f32[2,1,4,512], index: 0, kind: input, shape index: {}]   ;;  %s2475_s1 = inlined_call_operand.vmem [shape: f32[1,1,512], index: 1, kind: input, shape index: {}]   ;;  %s2476_s2 = inlined_call_operand.vmem [shape: f32[4,1], index: 2, kind: input, shape index: {}]   ;;  %s2477_s3 = inlined_call_operand.vmem [shape: f32[4,1], index: 3, kind: input, shape index: {}]   ;;  %s2478_s4 = inlined_call_operand.vmem [shape: f32[8,72], index: 4, kind: input, shape index: {}]   ;;  %s2479_s5 = inlined_call_operand.vmem [shape: f32[8,1], index: 5, kind: input, shape index: {}]   ;;  %s2480_s6 = inlined_call_operand.vmem [shape: f32[8,1], index: 6, kind: input, shape index: {}]   ;;  %s2481_s7 = inlined_call_operand.vmem [shape: f32[4,72], index: 7, kind: input, shape index: {}]   ;;  %s2482_s8 = inlined_call_operand.vmem [shape: f32[1,384], index: 8, kind: input, shape index: {}]   ;;  %s2483_s9 = inlined_call_operand.hbm [shape: f32[2,4,384], index: 9, kind: output, shape index: {0}]   ;;  %s2484_s10 = inlined_call_operand.hbm [shape: f32[2,1,4,512], index: 10, kind: output, shape index: {1}]  }
   0x1   :  { %18 = vsyncpa [#allocation7 + $0x1], 0 }
   0x2   :  { %19 = vsyncpa [#allocation8], 0 }
   0x3   :  { %21 = vsyncpa [#allocation8 + $0x1], 0 }
   0x4   :  { %22 = vsyncpa [#allocation11], 0 }
   0x5   :  { %24 = vsyncpa [#allocation11 + $0x1], 0  ;;  %s2028_s13 = smov 0   ;;  %s2030_s14 = smov 0  }
   0x6   :  { %s2032_s15 = smov 0   ;;  %s2034_s16 = smov 0  }
   0x7   :  { %s2036_s17 = smov 0   ;;  %s2038_s18 = smov 0  }
   0x8 LB: > { %2494 = sst [smem:[#allocation15_spill]] %s1950_s17  ;;  %s1512_s19 = sadd.s32 4294967295, %s1954_s18   ;;  %s1954_s18 = sphi %s2038_s18, %s30_s18   ;;  %s1950_s17 = sphi %s2036_s17, %s2510_s17   ;;  %s1946_s16 = sphi %s2034_s16, %s2509_s16   ;;  %s1942_s15 = sphi %s2032_s15, %s2513_s15   ;;  %s1938_s14 = sphi %s2030_s14, %s2512_s14   ;;  %s1934_s13 = sphi %s2028_s13, %s2511_s13  }
   0x9   : > { %s1513_s20 = sadd.s32 4294967294, %s1954_s18   ;;  %s42_s21 = sadd.s32 1, %s1950_s17 }
   0xa   : > { %s49_s22 = sadd.s32 1, %s1942_s15  ;;  %p44_p0 = scmp.ge.s32.totalorder %s42_s21, 2 }
   0xb   : > { %p56_p1 = scmp.ne.s32.totalorder %s1942_s15, %s1938_s14  ;;  %p57_p2 = scmp.eq.s32.totalorder %s1954_s18, 0 }
   0xc   : > { %p62_p3 = scmp.ne.s32.totalorder %s1938_s14, %s1934_s13  ;;  %s2515_s21 = smov (%p44_p0, %s42_s21), 0 }
   0xd   : > { %2495 = sst [smem:[#allocation16_spill]] %s2515_s21  ;;  %p2069_p4 = por %p57_p2, %p56_p1 }
   0xe   : > { %p63_p5 = scmp.eq.s32.totalorder %s1512_s19, 0  ;;  %s46_s24 = ssub.s32 %s1950_s17, %s2515_s21 }
   0xf   : > { %p261_p6 = scmp.eq.s32.totalorder %s1512_s19, 1  ;;  %p47_p7 = scmp.eq.s32.totalorder %s46_s24, 0 }
  0x10   : > { %p2075_p8 = por %p63_p5, %p62_p3  ;;  %p267_p10 = scmp.eq.s32.totalorder %s1513_s20, 1 }
  0x11   : > { %p2079_p9 = por %p261_p6, %p56_p1  ;;  %p1672_p13 = scmp.lt.s32.totalorder %s1954_s18, 2 }
  0x12   : > { %s2084_s27 = scalar_select %p47_p7, %s1942_s15, %s49_s22  }
  0x13   : > { %s2498_s26 = scalar_select %p2079_p9, 1, 0 }
  0x14   : > { %p2086_p11 = por %p267_p10, %p62_p3  ;;  %s341_s29 = sand.u32 1, %s1942_s15  }
  0x15   : > { %s1517_s30 = sshll.u32 %s341_s29, 4  ;;  %s1533_s11 = sshll.u32 %s1950_s17, 8 }
  0x16   : > { %s2499_s28 = scalar_select %p2086_p11, 1, 0 }
  0x17   : > { %s2097_s24 = scalar_lea.hbm %s2474_s0, %s1533_s11  ;;  %s345_s20 = scalar_lea.vmem [#allocation6], %s1517_s30 }
  0x18   : > { %s353_s22 = sshll.u32 %s345_s20, 4  ;;  %p2103_p0 = pnand %p1672_p13, %p2069_p4  ;;  %s2099_s22 = int_to_ptr.vmem [resolvable:$true] %s353_s22 }
  0x19   : > { %s342_s12 = scalar_lea.sflag [#allocation7], %s341_s29  ;;  %s1810_s11 = scalar_lea.hbm %s2097_s24, 256 }
  0x1a   : > { %p1811_p3 = scmp.ne.s32.totalorder %s2097_s24, %s1810_s11  ;;  %p1812_p5 = pneg %p2103_p0 }
  0x1b   : > { %s1815_s23 = scalar_lea.hbm %s2474_s0, 512  ;;  %p1816_p4 = scmp.lt.u32.totalorder %s2097_s24, %s2474_s0 }
  0x1c   : > { %p1813_p6 = pnand %p1812_p5, %p1811_p3  ;;  %p1817_p10 = scmp.lt.u32.totalorder %s1815_s23, %s1810_s11 }
  0x1d   : > { %p1819_p12 = scmp.lt.u32.totalorder %s1810_s11, %s2097_s24 }
  0x1e   : > { %p1814_p7 = pneg %p1813_p6  ;;  %p1818_p13 = por %p1817_p10, %p1816_p4 }
  0x20   : > { %p1820_p1 = por %p1819_p12, %p1818_p13 }
  0x22   : > { %p1821_p2 = pnand %p1820_p1, %p1814_p7 }
  0x24   : > { %1824 = shalt.err (!%p1821_p2)
}
  0x25   : > { %s1825_s29 = scalar_lea.vmem %s2099_s22, 256  ;;  %s1956_s30 = smov [#allocation6]  }
  0x26   : > { %p1826_p3 = scmp.ne.s32.totalorder %s2099_s22, %s1825_s29  ;;  %s1830_s19 = sshll.u32 %s1956_s30, 4  ;;  %s1831_s19 = int_to_ptr.vmem [resolvable:$false] %s1830_s19 }
  0x27   : > { %s1832_s17 = scalar_lea.vmem %s1831_s19, 512  ;;  %p1833_p9 = scmp.lt.s32.totalorder %s2099_s22, %s1831_s19 }
  0x28   : > { %p1828_p6 = pnand %p1826_p3, %p1812_p5  ;;  %p1834_p4 = scmp.lt.s32.totalorder %s1832_s17, %s1825_s29 }
  0x2a   : > { %p1829_p11 = pneg %p1828_p6  ;;  %p1835_p10 = por %p1834_p4, %p1833_p9 }
  0x2c   : > { %p1836_p12 = pnand %p1835_p10, %p1829_p11 }
  0x2e   : > { %1839 = shalt.err (!%p1836_p12)
}
  0x2f   : > { %1664 = dma.hbm_to_vmem [thread:$0]  (!%p2103_p0), %s2097_s24, 256, %s2099_s22, %s342_s12  }
  0x30   : > { %p2501_p1 = scmp.lt.s32.totalorder %s1954_s18, 3  ;;  %p2502_p2 = scmp.ge.s32.totalorder %s1954_s18, 1 }
  0x32   : > { %p359_p5 = pnand %p2502_p2, %p2501_p1 }
  0x33   : > { %s2139_s11 = sand.u32 (!%p359_p5), 1, %s1938_s14  }
  0x34   : > { %362 = sbr.rel (%p359_p5) target bundleno = 1119 (0x45f), region = 56  ;;  %s1521_s23 = sshll.u32 (!%p359_p5), %s2139_s11, 4 }
  0x35   : > { %s365_s20 = scalar_lea.sflag (!%p359_p5), [#allocation7], %s2139_s11  ;;  %s2145_s21 = scalar_lea.vmem (!%p359_p5), [#allocation6], %s1521_s23 }
  0x3b   : > { %1921 = dma.done.wait (%p2075_p8), %s365_s20, 256  }
  0x3c   : > { %1923 = vsyncadd (%p2075_p8), %s365_s20, 4294967040  ;;  %v1957_v0 = vmov 0   ;;  %v418_v1 = vld [vmem:[%s2476_s2] sm:$0xf]  ;;  %v1958_v3 = vmov 0.0   ;;  %v429_v6 = vlaneseq  ;;  %v420_v17 = vld [vmem:[%s2145_s21] sm:$0xff] }
  0x3d   : > { %1736 = vset.pattern.permute.xlu0 %v1957_v0  ;;  %1737 = vset.pattern.permute.xlu1 %v1957_v0  ;;  %v419_v2 = vld [vmem:[%s2477_s3] sm:$0xf]  ;;  %481 = vst [vmem:[#allocation4 + $0x8] sm:$0xf0] %v1958_v3  ;;  %484 = vst [vmem:[#allocation4 + $0x20] sm:$0xf0] %v1958_v3 }
  0x3e   : > { %424 = vperm.xlu0 %1736, %v418_v1   ;;  %480 = vst [vmem:[#allocation4] sm:$0xf0] %v1958_v3  ;;  %482 = vst [vmem:[#allocation4 + $0x10] sm:$0xf0] %v1958_v3  ;;  %803 = vmatprep.mubr.f32.mxu0 %v1958_v3  ;;  %v1959_v4 = vmov 839922192  }
  0x3f   : > { %483 = vst [vmem:[#allocation4 + $0x18] sm:$0xf0] %v1958_v3  ;;  %485 = vst [vmem:[#allocation4 + $0x28] sm:$0xf0] %v1958_v3  ;;  %v427_v5 = vunpack.c.l.s4 %v1959_v4  ;;  %v2185_v8 = vshrl.u32 %v429_v6, 7  ;;  %v421_v18 = vld [vmem:[%s2145_s21 + $0x8] sm:$0xff] }
  0x40   : > { %486 = vst [vmem:[#allocation4 + $0x30] sm:$0xf0] %v1958_v3  ;;  %487 = vst [vmem:[#allocation4 + $0x38] sm:$0xf0] %v1958_v3  ;;  %v454_v15 = vld [vmem:[%s2475_s1] sm:$0xf] }
  0x41   : > { %488 = vst [vmem:[#allocation4 + $0x40] sm:$0xf0] %v1958_v3  ;;  %489 = vst [vmem:[#allocation4 + $0x48] sm:$0xf0] %v1958_v3  ;;  %v428_v7 = vunpack.c.0.s8 %v427_v5  ;;  %v458_v10 = vsub.s32 0, %v2185_v8  ;;  %v462_v11 = vsub.s32 1, %v2185_v8 }
  0x42   : > { %438 = vperm.xlu0 %1736, %v419_v2   ;;  %490 = vst [vmem:[#allocation4 + $0x50] sm:$0xf0] %v1958_v3  ;;  %491 = vst [vmem:[#allocation4 + $0x58] sm:$0xf0] %v1958_v3  ;;  %v466_v12 = vsub.s32 2, %v2185_v8  ;;  %v470_v13 = vsub.s32 3, %v2185_v8 }
  0x43   : > { %492 = vst [vmem:[#allocation4 + $0x60] sm:$0xf0] %v1958_v3  ;;  %493 = vst [vmem:[#allocation4 + $0x68] sm:$0xf0] %v1958_v3  ;;  %v431_v9 = vsub.s32 %v428_v7, %v2185_v8  ;;  %v459_v19 = vrot.slane %v454_v15, %v458_v10  ;;  %v463_v20 = vrot.slane %v454_v15, %v462_v11  ;;  %s2205_s19 = scalar_lea.vmem [#allocation10], %s1521_s23  ;;  %s1960_s17 = smov 126  }
  0x44   : > { %494 = vst [vmem:[#allocation4 + $0x70] sm:$0xf0] %v1958_v3  ;;  %495 = vst [vmem:[#allocation4 + $0x78] sm:$0xf0] %v1958_v3  ;;  %v467_v21 = vrot.slane %v454_v15, %v466_v12  ;;  %v471_v22 = vrot.slane %v454_v15, %v470_v13  ;;  %s1961_s20 = smov 124   ;;  %s2492_s23 = smov 88  }
  0x45   : > { %496 = vst [vmem:[#allocation4 + $0x80] sm:$0xf0] %v1958_v3  ;;  %497 = vst [vmem:[#allocation4 + $0x88] sm:$0xf0] %v1958_v3  ;;  %v472_v27 = vcombine.low %v459_v19, %v463_v20  ;;  %s2488_s24 = smov 86   ;;  %s2490_s22 = smov 48  }
  0x46   : > { %498 = vst [vmem:[#allocation4 + $0x90] sm:$0xf0] %v1958_v3  ;;  %499 = vst [vmem:[#allocation4 + $0x98] sm:$0xf0] %v1958_v3  ;;  %v473_v28 = vcombine.low %v467_v21, %v471_v22  ;;  %s1965_s12 = smov 84   ;;  %s1966_s29 = smov 46  }
  0x47   : > { %500 = vst [vmem:[#allocation4 + $0xa0] sm:$0xf0] %v1958_v3  ;;  %501 = vst [vmem:[#allocation4 + $0xa8] sm:$0xf0] %v1958_v3  ;;  %v1967_v38 = vmov 0.0|0.0   ;;  %s1968_s25 = smov 44  }
  0x48   : > { %502 = vst [vmem:[#allocation4 + $0xb0] sm:$0xf0] %v1958_v3  ;;  %503 = vst [vmem:[#allocation4 + $0xb8] sm:$0xf0] %v1958_v3  ;;  %1613 = vmatprep.subr.bf16.mxu1 %v1967_v38  ;;  %v880_v39 = vld [vmem:[%s2479_s5] sm:$0xff]  ;;  %vm1969_vm0 = vmmov 0  }
  0x49   : > { %504 = vst [vmem:[#allocation4 + $0xc0] sm:$0xf0] %v1958_v3  ;;  %505 = vst [vmem:[#allocation4 + $0xc8] sm:$0xf0] %v1958_v3  ;;  %1573 = vmatprep.mubr.msk.f32.mxu1 %vm1969_vm0, %v1958_v3  ;;  %v889_v40 = vld [vmem:[%s2480_s6] sm:$0xff]  ;;  %vm553_vm1 = vcmask 1014784  }
  0x4a   : > { %506 = vst [vmem:[#allocation4 + $0xd0] sm:$0xf0] %v1958_v3  ;;  %vm577_vm2 = vcmask 719872   ;;  %vm601_vm3 = vcmask 703488   ;;  %vm625_vm4 = vcmask 687104   ;;  %vm649_vm5 = vcmask 392192  }
  0x4b   : > { %vm529_vm6 = vcmask 1031168   ;;  %vm673_vm7 = vcmask 375808   ;;  %vm697_vm8 = vcmask 359424   ;;  %vm735_vm9 = vcmask 588800   ;;  %s2505_s30 = smov 48   ;;  %p2506_p9 = scmp.ne.s32.totalorder %s2498_s26, 0 }
  0x4c   : > { %vm921_vm10 = vcmask 343040   ;;  %vm923_vm11 = vcmask 1047888  }
  0x4d   : > { %922 = vst.msk [vmem:[#allocation3] sm:$0xff] %vm921_vm10, %v1958_v3 }
  0x4e   : > { %924 = vst.msk [vmem:[#allocation3 + $0x18] sm:$0xff] %vm923_vm11, %v1958_v3 }
  0xbd   : > { %v425_v14 = vpop.permute.xlu0 %424 }
  0xbe   : > { %v432_v16 = vrot.slane %v425_v14, %v431_v9 }
  0xc0   : > { %v434_v24 = vmul.f32 %v432_v16, %v420_v17  ;;  %v435_v25 = vmul.f32 %v432_v16, %v421_v18 }
  0xc1   : > { %v439_v23 = vpop.permute.xlu0 %438 }
  0xc2   : > { %v446_v26 = vrot.slane %v439_v23, %v431_v9 }
  0xc4   : > { %v448_v29 = vadd.f32 %v446_v26, %v434_v24  ;;  %v449_v30 = vadd.f32 %v446_v26, %v435_v25 }
  0xc6   : > { %v450_v31 = vmax.f32 %v448_v29, 0.0  ;;  %v451_v32 = vmax.f32 %v449_v30, 0.0 }
  0xc8   : > { %452 = vst [vmem:[%s2205_s19] sm:$0xff] %v450_v31  ;;  %453 = vst [vmem:[%s2205_s19 + $0x8] sm:$0xff] %v451_v32  ;;  %v476_v33 = vmul.f32 %v472_v27, %v450_v31  ;;  %v477_v34 = vmul.f32 %v473_v28, %v451_v32 }
  0xca   : > { %479 = vst [vmem:[#allocation2 + $0x8] sm:$0xff] %v477_v34  ;;  %525 = vrot.lane.b32.xlu1 %v477_v34, %s1960_s17  ;;  %521 = vrot.lane.b32.xlu0 %v476_v33, %s1960_s17  ;;  %v519_v35 = vcombine.high %v476_v33, %v476_v33  ;;  %512 = vst [vmem:[#allocation4] sm:$0xf] %v476_v33  ;;  %v520_v37 = vcombine.high %v477_v34, %v477_v34 }
  0xcc   : > { %513 = vst [vmem:[#allocation4 + $0x8] sm:$0xf] %v519_v35 }
  0xce   : > { %549 = vrot.lane.b32.xlu1 %v477_v34, %s1961_s20  ;;  %545 = vrot.lane.b32.xlu0 %v476_v33, %s1961_s20 }
  0xd1   : > { %v508_v36 = vld [vmem:[#allocation2 + $0x8] sm:$0xf]  ;;  %v708_v26 = vld [vmem:[#allocation4] sm:$0xff] }
  0xd2   : > { %573 = vrot.lane.b32.xlu1 %v477_v34, %s2492_s23  ;;  %593 = vrot.lane.b32.xlu0 %v476_v33, %s2488_s24  ;;  %514 = vst [vmem:[#allocation4 + $0x10] sm:$0xf] %v508_v36 }
  0xd3   : > { %v709_v25 = vld [vmem:[#allocation4 + $0x8] sm:$0xff] }
  0xd6   : > { %569 = vrot.lane.b32.xlu1 %v476_v33, %s2492_s23  ;;  %641 = vrot.lane.b32.xlu0 %v476_v33, %s2490_s22 }
  0xda   : > { %597 = vrot.lane.b32.xlu1 %v477_v34, %s2488_s24  ;;  %547 = vrot.lane.b32.xlu0 %v519_v35, %s1961_s20 }
  0xde   : > { %621 = vrot.lane.b32.xlu1 %v477_v34, %s1965_s12  ;;  %571 = vrot.lane.b32.xlu0 %v519_v35, %s2492_s23 }
  0xe2   : > { %617 = vrot.lane.b32.xlu1 %v476_v33, %s1965_s12  ;;  %551 = vrot.lane.b32.xlu0 %v520_v37, %s1961_s20 }
  0xe6   : > { %645 = vrot.lane.b32.xlu1 %v477_v34, %s2490_s22  ;;  %595 = vrot.lane.b32.xlu0 %v519_v35, %s2488_s24 }
  0xea   : > { %669 = vrot.lane.b32.xlu1 %v477_v34, %s1966_s29  ;;  %619 = vrot.lane.b32.xlu0 %v519_v35, %s1965_s12 }
  0xee   : > { %665 = vrot.lane.b32.xlu1 %v476_v33, %s1966_s29  ;;  %599 = vrot.lane.b32.xlu0 %v520_v37, %s2488_s24  ;;  %s2503_s24 = smov 88  }
  0xf2   : > { %643 = vrot.lane.b32.xlu0 %v519_v35, %s2490_s22  ;;  %523 = vrot.lane.b32.xlu1 %v519_v35, %s1960_s17 }
  0xf6   : > { %667 = vrot.lane.b32.xlu0 %v519_v35, %s1966_s29  ;;  %527 = vrot.lane.b32.xlu1 %v520_v37, %s1960_s17 }
  0xfa   : > { %647 = vrot.lane.b32.xlu0 %v520_v37, %s2490_s22  ;;  %575 = vrot.lane.b32.xlu1 %v520_v37, %s2492_s23  ;;  %s1970_s23 = smov 42   ;;  %s2504_s22 = smov 86  }
  0xfe   : > { %691 = vrot.lane.b32.xlu0 %v519_v35, %s1968_s25  ;;  %623 = vrot.lane.b32.xlu1 %v520_v37, %s1965_s12 }
 0x102   : > { %689 = vrot.lane.b32.xlu0 %v476_v33, %s1968_s25  ;;  %671 = vrot.lane.b32.xlu1 %v520_v37, %s1966_s29 }
 0x106   : > { %883 = vperm.xlu0 %1736, %v880_v39   ;;  %693 = vrot.lane.b32.xlu1 %v477_v34, %s1968_s25 }
 0x10a   : > { %695 = vrot.lane.b32.xlu1 %v520_v37, %s1968_s25 }
 0x10e   : > { %892 = vperm.xlu1 %1737, %v889_v40  }
 0x13c   : > { %v526_v41 = vpop.permute.xlu1 %525  ;;  %v522_v42 = vpop.permute.xlu0 %521 }
 0x140   : > { %v550_v43 = vpop.permute.xlu1 %549  ;;  %v546_v44 = vpop.permute.xlu0 %545 }
 0x144   : > { %v2250_v45 = vpop.permute.xlu1 %573  ;;  %v594_v46 = vpop.permute.xlu0 %593 }
 0x148   : > { %v570_v47 = vpop.permute.xlu1 %569  ;;  %v642_v48 = vpop.permute.xlu0 %641 }
 0x14c   : > { %v598_v49 = vpop.permute.xlu1 %597  ;;  %v548_v50 = vpop.permute.xlu0 %547 }
 0x14d   : > { %v554_v51 = vsel %vm553_vm1, %v546_v44, %v548_v50  ;;  %v555_v52 = vsel %vm553_vm1, %v548_v50, %v550_v43 }
 0x14e   : > { %560 = vst [vmem:[#allocation4 + $0x30] sm:$0xf] %v554_v51  ;;  %561 = vst [vmem:[#allocation4 + $0x38] sm:$0xf] %v555_v52 }
 0x150   : > { %v2254_v53 = vpop.permute.xlu1 %621  ;;  %v572_v54 = vpop.permute.xlu0 %571 }
 0x151   : > { %v578_v55 = vsel %vm577_vm2, %v570_v47, %v572_v54  ;;  %v579_v56 = vsel %vm577_vm2, %v572_v54, %v2250_v45 }
 0x152   : > { %584 = vst [vmem:[#allocation4 + $0x48] sm:$0xf] %v578_v55  ;;  %585 = vst [vmem:[#allocation4 + $0x50] sm:$0xf] %v579_v56 }
 0x154   : > { %v618_v57 = vpop.permute.xlu1 %617  ;;  %v552_v58 = vpop.permute.xlu0 %551 }
 0x155   : > { %v556_v59 = vsel %vm553_vm1, %v550_v43, %v552_v58  ;;  %v715_v34 = vld [vmem:[#allocation4 + $0x38] sm:$0xff] }
 0x156   : > { %562 = vst [vmem:[#allocation4 + $0x40] sm:$0xf] %v556_v59 }
 0x158   : > { %v646_v60 = vpop.permute.xlu1 %645  ;;  %v596_v61 = vpop.permute.xlu0 %595 }
 0x159   : > { %v602_v62 = vsel %vm601_vm3, %v594_v46, %v596_v61  ;;  %v603_v63 = vsel %vm601_vm3, %v596_v61, %v598_v49  ;;  %v718_v31 = vld [vmem:[#allocation4 + $0x50] sm:$0xff]  ;;  %v717_v39 = vld [vmem:[#allocation4 + $0x48] sm:$0xff] }
 0x15a   : > { %608 = vst [vmem:[#allocation4 + $0x60] sm:$0xf] %v602_v62  ;;  %609 = vst [vmem:[#allocation4 + $0x68] sm:$0xf] %v603_v63  ;;  %v1601_v37 = vpack.c.bf16 %v718_v31, %v715_v34 }
 0x15c   : > { %v2262_v0 = vpop.permute.xlu1 %669  ;;  %v620_v1 = vpop.permute.xlu0 %619 }
 0x15d   : > { %v626_v2 = vsel %vm625_vm4, %v618_v57, %v620_v1  ;;  %v627_v4 = vsel %vm625_vm4, %v620_v1, %v2254_v53  ;;  %v716_v54 = vld [vmem:[#allocation4 + $0x40] sm:$0xff] }
 0x15e   : > { %632 = vst [vmem:[#allocation4 + $0x78] sm:$0xf] %v626_v2  ;;  %633 = vst [vmem:[#allocation4 + $0x80] sm:$0xf] %v627_v4 }
 0x160   : > { %v666_v5 = vpop.permute.xlu1 %665  ;;  %v600_v6 = vpop.permute.xlu0 %599 }
 0x161   : > { %v604_v7 = vsel %vm601_vm3, %v598_v49, %v600_v6  ;;  %v721_v47 = vld [vmem:[#allocation4 + $0x68] sm:$0xff]  ;;  %v720_v58 = vld [vmem:[#allocation4 + $0x60] sm:$0xff] }
 0x162   : > { %610 = vst [vmem:[#allocation4 + $0x70] sm:$0xf] %v604_v7 }
 0x164   : > { %v644_v9 = vpop.permute.xlu0 %643  ;;  %v524_v13 = vpop.permute.xlu1 %523 }
 0x165   : > { %v650_v14 = vsel %vm649_vm5, %v642_v48, %v644_v9  ;;  %v651_v15 = vsel %vm649_vm5, %v644_v9, %v646_v60  ;;  %v530_v16 = vsel %vm529_vm6, %v522_v42, %v524_v13  ;;  %v531_v17 = vsel %vm529_vm6, %v524_v13, %v526_v41  ;;  %v724_v43 = vld [vmem:[#allocation4 + $0x80] sm:$0xff]  ;;  %v723_v51 = vld [vmem:[#allocation4 + $0x78] sm:$0xff] }
 0x166   : > { %656 = vst [vmem:[#allocation4 + $0x90] sm:$0xf] %v650_v14  ;;  %657 = vst [vmem:[#allocation4 + $0x98] sm:$0xf] %v651_v15  ;;  %v1605_v50 = vpack.c.bf16 %v724_v43, %v721_v47  ;;  %v1607_v59 = vpack.c.bf16 %v723_v51, %v720_v58 }
 0x167   : > { %536 = vst [vmem:[#allocation4 + $0x18] sm:$0xf] %v530_v16  ;;  %537 = vst [vmem:[#allocation4 + $0x20] sm:$0xf] %v531_v17  ;;  %v707_v17 = vld [vmem:[%s2478_s4] sm:$0xff] }
 0x168   : > { %v668_v18 = vpop.permute.xlu0 %667  ;;  %v528_v19 = vpop.permute.xlu1 %527 }
 0x169   : > { %v674_v20 = vsel %vm673_vm7, %v666_v5, %v668_v18  ;;  %v675_v21 = vsel %vm673_vm7, %v668_v18, %v2262_v0  ;;  %v532_v22 = vsel %vm529_vm6, %v526_v41, %v528_v19  ;;  %v710_v41 = vld [vmem:[#allocation4 + $0x10] sm:$0xff] }
 0x16a   : > { %680 = vst [vmem:[#allocation4 + $0xa8] sm:$0xf] %v674_v20  ;;  %681 = vst [vmem:[#allocation4 + $0xb0] sm:$0xf] %v675_v21 }
 0x16b   : > { %538 = vst [vmem:[#allocation4 + $0x28] sm:$0xf] %v532_v22 }
 0x16c   : > { %v648_v23 = vpop.permute.xlu0 %647  ;;  %v576_v24 = vpop.permute.xlu1 %575 }
 0x16d   : > { %v652_v27 = vsel %vm649_vm5, %v646_v60, %v648_v23  ;;  %v580_v28 = vsel %vm577_vm2, %v2250_v45, %v576_v24  ;;  %v714_v45 = vld [vmem:[#allocation4 + $0x30] sm:$0xff]  ;;  %v727_v60 = vld [vmem:[#allocation4 + $0x98] sm:$0xff] }
 0x16e   : > { %v712_v29 = vld [vmem:[#allocation4 + $0x20] sm:$0xff]  ;;  %v711_v30 = vld [vmem:[#allocation4 + $0x18] sm:$0xff]  ;;  %658 = vst [vmem:[#allocation4 + $0xa0] sm:$0xf] %v652_v27  ;;  %586 = vst [vmem:[#allocation4 + $0x58] sm:$0xf] %v580_v28  ;;  %v1603_v46 = vpack.c.bf16 %v717_v39, %v714_v45 }
 0x16f   : > { %v1597_v32 = vpack.c.bf16 %v712_v29, %v709_v25  ;;  %v1599_v33 = vpack.c.bf16 %v711_v30, %v708_v26  ;;  %v726_v5 = vld [vmem:[#allocation4 + $0x90] sm:$0xff] }
 0x170   : > { %v692_v35 = vpop.permute.xlu0 %691  ;;  %v624_v36 = vpop.permute.xlu1 %623  ;;  %v901_v23 = vld [vmem:[%s2482_s8] sm:$0x7] }
 0x171   : > { %1598 = vmatprep.subr.bf16.mxu0 %v1597_v32  ;;  %v628_v40 = vsel %vm625_vm4, %v2254_v53, %v624_v36  ;;  %v730_v56 = vld [vmem:[#allocation4 + $0xb0] sm:$0xff]  ;;  %v729_v63 = vld [vmem:[#allocation4 + $0xa8] sm:$0xff]  ;;  %v906_v29 = vrot.slane %v901_v23, %v458_v10 }
 0x172   : > { %1600 = vmatpush1.bf16.msra.mxu0 %v1599_v33  ;;  %v713_v42 = vld [vmem:[#allocation4 + $0x28] sm:$0xff]  ;;  %634 = vst [vmem:[#allocation4 + $0x88] sm:$0xf] %v628_v40  ;;  %v1609_v62 = vpack.c.bf16 %v730_v56, %v727_v60  ;;  %v1611_v6 = vpack.c.bf16 %v729_v63, %v726_v5  ;;  %v910_v33 = vrot.slane %v901_v23, %v462_v11 }
 0x173   : > { %1602 = vmatprep.subr.bf16.mxu0 %v1601_v37  ;;  %v1614_v44 = vpack.c.bf16 %v713_v42, %v710_v41  ;;  %v914_v37 = vrot.slane %v901_v23, %v466_v12 }
 0x174   : > { %v690_v48 = vpop.permute.xlu0 %689  ;;  %v672_v49 = vpop.permute.xlu1 %671 }
 0x175   : > { %1615 = vmatpush3.bf16.msra.mxu1 %v1614_v44  ;;  %v698_v52 = vsel %vm697_vm8, %v690_v48, %v692_v35  ;;  %v676_v53 = vsel %vm673_vm7, %v2262_v0, %v672_v49  ;;  %v719_v55 = vld [vmem:[#allocation4 + $0x58] sm:$0xff]  ;;  %v722_v0 = vld [vmem:[#allocation4 + $0x70] sm:$0xff]  ;;  %v728_v13 = vld [vmem:[#allocation4 + $0xa0] sm:$0xff] }
 0x176   : > { %1604 = vmatpush1.bf16.msra.mxu0 %v1603_v46  ;;  %1616 = vmatprep.subr.bf16.mxu1 %v1967_v38  ;;  %704 = vst [vmem:[#allocation4 + $0xc0] sm:$0xf] %v698_v52  ;;  %682 = vst [vmem:[#allocation4 + $0xb8] sm:$0xf] %v676_v53  ;;  %v1617_v57 = vpack.c.bf16 %v719_v55, %v716_v54  ;;  %v1178_v48 = vld [vmem:[%s2145_s21] sm:$0xff] }
 0x177   : > { %1606 = vmatprep.subr.bf16.mxu0 %v1605_v50  ;;  %v1182_v49 = vcombine.high %v1178_v48, %v1178_v48  ;;  %v1179_v50 = vld [vmem:[%s2145_s21 + $0x8] sm:$0xff] }
 0x178   : > { %v694_v61 = vpop.permute.xlu1 %693  ;;  %v1183_v51 = vcombine.high %v1179_v50, %v1179_v50 }
 0x179   : > { %1618 = vmatpush3.bf16.msra.mxu1 %v1617_v57  ;;  %v699_v1 = vsel %vm697_vm8, %v692_v35, %v694_v61  ;;  %v725_v2 = vld [vmem:[#allocation4 + $0x88] sm:$0xff] }
 0x17a   : > { %1608 = vmatpush1.bf16.msra.mxu0 %v1607_v59  ;;  %1619 = vmatprep.subr.bf16.mxu1 %v1967_v38  ;;  %705 = vst [vmem:[#allocation4 + $0xc8] sm:$0xf] %v699_v1  ;;  %v1620_v4 = vpack.c.bf16 %v725_v2, %v722_v0 }
 0x17b   : > { %1610 = vmatprep.subr.bf16.mxu0 %v1609_v62 }
 0x17c   : > { %v696_v7 = vpop.permute.xlu1 %695 }
 0x17d   : > { %1621 = vmatpush3.bf16.msra.mxu1 %v1620_v4  ;;  %v700_v9 = vsel %vm697_vm8, %v694_v61, %v696_v7  ;;  %v731_v14 = vld [vmem:[#allocation4 + $0xb8] sm:$0xff]  ;;  %v732_v18 = vld [vmem:[#allocation4 + $0xc0] sm:$0xff] }
 0x17e   : > { %1612 = vmatpush1.bf16.msra.mxu0 %v1611_v6  ;;  %1622 = vmatprep.subr.bf16.mxu1 %v1967_v38  ;;  %706 = vst [vmem:[#allocation4 + $0xd0] sm:$0xf] %v700_v9  ;;  %v1623_v15 = vpack.c.bf16 %v731_v14, %v728_v13 }
 0x181   : > { %1624 = vmatpush3.bf16.msra.mxu1 %v1623_v15  ;;  %v733_v16 = vld [vmem:[#allocation4 + $0xc8] sm:$0xff] }
 0x182   : > { %1571 = vmatprep.subr.mxu1 %v1958_v3  ;;  %755 = vmatprep.subr.mxu0 %v733_v16 }
 0x183   : > { %756 = vmatpush1.msra.mxu0 %v732_v18 }
 0x184   : > { %1523 = vmatmul.mubr.msk.f32.vlgmr.msra.gmra.mrb[0].mxu0 %vm735_vm9, %v707_v17 }
 0x185   : > { %v734_v19 = vld [vmem:[#allocation4 + $0xd0] sm:$0xff]  ;;  %1265 = vmatprep.mubr.f32.mxu0 %v1958_v3  ;;  %v884_v20 = vpop.permute.xlu0 %883 }
 0x186   : > { %1572 = vmatpush3.msra.mxu1 %v734_v19 }
 0x187   : > { %1574 = vmatmul.mubr.msk.f32.vlgmr.msra.gmra.mrb[0].mxu1 %vm735_vm9, %v707_v17  ;;  %1641 = vmatprep.subr.bf16.mxu1 %v1967_v38 }
 0x188   : > { %1594 = vmatprep.mubr.msk.f32.mxu1 %vm1969_vm0, %v1958_v3 }
 0x18d   : > { %v893_v22 = vpop.permute.xlu1 %892 }
 0x257   : > { %v805_v21 = vpop.f32.mrb[0].mxu0 }
 0x258   : > { %v886_v24 = vmul.f32 %v884_v20, %v805_v21  ;;  %v807_v25 = vpop.f32.mrb[1].mxu0 }
 0x259   : > { %v887_v26 = vmul.f32 %v884_v20, %v807_v25 }
 0x25a   : > { %v895_v27 = vadd.f32 %v893_v22, %v886_v24  ;;  %v876_v28 = vpop.f32.mrb[0].mxu1 }
 0x25b   : > { %v896_v30 = vadd.f32 %v893_v22, %v887_v26  ;;  %v888_v31 = vmul.f32 %v884_v20, %v876_v28  ;;  %v1575_v32 = vpop.f32.mrb[1].mxu1 }
 0x25c   : > { %v898_v34 = vmax.f32 %v895_v27, 0.0 }
 0x25d   : > { %v899_v35 = vmax.f32 %v896_v30, 0.0  ;;  %v897_v36 = vadd.f32 %v893_v22, %v888_v31 }
 0x25e   : > { %v918_v39 = vmul.f32 %v906_v29, %v898_v34 }
 0x25f   : > { %v900_v40 = vmax.f32 %v897_v36, 0.0  ;;  %v919_v41 = vmul.f32 %v910_v33, %v899_v35 }
 0x260   : > { %928 = vrot.lane.b32.xlu0 %v918_v39, %s1970_s23 }
 0x261   : > { %930 = vrot.lane.b32.xlu1 %v919_v41, %s1970_s23  ;;  %v920_v42 = vmul.f32 %v914_v37, %v900_v40 }
 0x264   : > { %932 = vrot.lane.b32.xlu0 %v920_v42, %s1970_s23  ;;  %s1384_s23 = sshll.u32 %s2205_s19, 4  ;;  %s1385_s23 = int_to_ptr.vmem [resolvable:$true] %s1384_s23 }
 0x2d2   : > { %v929_v10 = vpop.permute.xlu0 %928 }
 0x2d3   : > { %940 = vst.msk [vmem:[#allocation3] sm:$0xff] %vm923_vm11, %v929_v10  ;;  %v931_v43 = vpop.permute.xlu1 %930 }
 0x2d4   : > { %v2314_v11 = vsel %vm921_vm10, %v929_v10, %v931_v43 }
 0x2d6   : > { %v933_v44 = vpop.permute.xlu0 %932 }
 0x2d7   : > { %v2317_v45 = vsel %vm921_vm10, %v931_v43, %v933_v44  ;;  %943 = vst.msk [vmem:[#allocation3 + $0x18] sm:$0xff] %vm921_vm10, %v933_v44 }
 0x2d8   : > { %v1778_v47 = vpack.i.bf16 %v2317_v45, %v2314_v11 }
 0x2da   : > { %v2320_v8 = vld [vmem:[#allocation3] sm:$0xff] }
 0x2de   : > { %v953_v12 = vld [vmem:[#allocation3 + $0x18] sm:$0xff] }
 0x2df   : > { %v1738_v46 = vpack.i.bf16 %v953_v12, %v2320_v8 }
 0x2e1   : > { %1739 = vrot.lane.b32.xlu0 %v1738_v46, %s1960_s17  ;;  %1744 = vrot.lane.b32.xlu1 %v1738_v46, %s1961_s20 }
 0x2e5   : > { %1749 = vrot.lane.b32.xlu0 %v1738_v46, %s2503_s24  ;;  %1754 = vrot.lane.b32.xlu1 %v1738_v46, %s2504_s22 }
 0x2e9   : > { %1759 = vrot.lane.b32.xlu0 %v1738_v46, %s1965_s12  ;;  %1764 = vrot.lane.b32.xlu1 %v1738_v46, %s2505_s30 }
 0x2ed   : > { %1779 = vrot.lane.b32.xlu0 %v1778_v47, %s2503_s24  ;;  %1769 = vrot.lane.b32.xlu1 %v1778_v47, %s1960_s17  ;;  %s1354_s24 = scalar_lea.sflag [#allocation11], %s2139_s11 }
 0x2f1   : > { %1789 = vrot.lane.b32.xlu0 %v1778_v47, %s1965_s12  ;;  %1774 = vrot.lane.b32.xlu1 %v1778_v47, %s1961_s20  ;;  %s1534_s20 = sshll.u32 %s1946_s16, 8 }
 0x2f5   : > { %1799 = vrot.lane.b32.xlu0 %v1778_v47, %s1966_s29  ;;  %1784 = vrot.lane.b32.xlu1 %v1778_v47, %s2504_s22 }
 0x2f9   : > { %1804 = vrot.lane.b32.xlu0 %v1738_v46, %s1966_s29  ;;  %1794 = vrot.lane.b32.xlu1 %v1778_v47, %s2505_s30  ;;  %s1971_s30 = smov [#allocation10]  }
 0x2fa   : > { %s1844_s21 = sshll.u32 %s1971_s30, 4  ;;  %s1845_s21 = int_to_ptr.vmem [resolvable:$false] %s1844_s21 }
 0x2fb   : > { %s1846_s17 = scalar_lea.vmem %s1845_s21, 512  ;;  %p1847_p7 = scmp.lt.s32.totalorder %s1385_s23, %s1845_s21 }
 0x2fd   : > { %1137 = vrot.lane.b32.xlu0 %v2317_v45, %s1968_s25  ;;  %1135 = vrot.lane.b32.xlu1 %v2314_v11, %s1968_s25 }
 0x301   : > { %1139 = vrot.lane.b32.xlu0 %v953_v12, %s1968_s25  ;;  %1133 = vrot.lane.b32.xlu1 %v2320_v8, %s1968_s25  ;;  %s2396_s25 = scalar_lea.hbm %s2484_s10, %s1534_s20 }
 0x305   : > { %1184 = vrot.lane.b32.xlu1 %v1178_v48, %s2504_s22  ;;  %1186 = vrot.lane.b32.xlu0 %v1182_v49, %s2504_s22 }
 0x309   : > { %1188 = vrot.lane.b32.xlu1 %v1179_v50, %s2504_s22  ;;  %1190 = vrot.lane.b32.xlu0 %v1183_v51, %s2504_s22  ;;  %s1840_s22 = scalar_lea.vmem %s1385_s23, 256 }
 0x30a   : > { %p1841_p8 = scmp.ne.s32.totalorder %s1385_s23, %s1840_s22  ;;  %p1848_p13 = scmp.lt.s32.totalorder %s1846_s17, %s1840_s22 }
 0x30c   : > { %p1842_p11 = pnand %p1841_p8, %p2506_p9  ;;  %p1849_p3 = por %p1848_p13, %p1847_p7 }
 0x30e   : > { %p1843_p0 = pneg %p1842_p11 }
 0x310   : > { %p1850_p6 = pnand %p1849_p3, %p1843_p0 }
 0x353   : > { %v1740_v52 = vpop.permute.xlu0 %1739  ;;  %v1745_v53 = vpop.permute.xlu1 %1744 }
 0x354   : > { %v1742_v60 = vunpack.i.h.bf16 %v1740_v52  ;;  %v1741_v61 = vunpack.i.l.bf16 %v1740_v52  ;;  %v1747_v1 = vunpack.i.h.bf16 %v1745_v53  ;;  %v1746_v0 = vunpack.i.l.bf16 %v1745_v53 }
 0x357   : > { %v1750_v54 = vpop.permute.xlu0 %1749  ;;  %v1755_v55 = vpop.permute.xlu1 %1754 }
 0x358   : > { %v1752_v2 = vunpack.i.h.bf16 %v1750_v54  ;;  %v1751_v4 = vunpack.i.l.bf16 %v1750_v54  ;;  %v1757_v5 = vunpack.i.h.bf16 %v1755_v55  ;;  %v1756_v13 = vunpack.i.l.bf16 %v1755_v55 }
 0x35b   : > { %v1760_v56 = vpop.permute.xlu0 %1759  ;;  %v2352_v57 = vpop.permute.xlu1 %1764 }
 0x35c   : > { %v1762_v19 = vunpack.i.h.bf16 %v1760_v56  ;;  %v1761_v23 = vunpack.i.l.bf16 %v1760_v56  ;;  %v1767_v27 = vunpack.i.h.bf16 %v2352_v57  ;;  %v1766_v31 = vunpack.i.l.bf16 %v2352_v57 }
 0x35f   : > { %v1780_v58 = vpop.permute.xlu0 %1779  ;;  %v1770_v59 = vpop.permute.xlu1 %1769 }
 0x360   : > { %v1772_v62 = vunpack.i.h.bf16 %v1770_v59  ;;  %v1771_v63 = vunpack.i.l.bf16 %v1770_v59  ;;  %v1782_v6 = vunpack.i.h.bf16 %v1780_v58  ;;  %v1781_v14 = vunpack.i.l.bf16 %v1780_v58 }
 0x362   : > { %v968_v7 = vsel %vm529_vm6, %v1772_v62, %v1742_v60  ;;  %v966_v9 = vsel %vm529_vm6, %v1741_v61, %v1771_v63  ;;  %v967_v18 = vsel %vm529_vm6, %v1771_v63, %v1772_v62  ;;  %v1018_v28 = vsel %vm577_vm2, %v1782_v6, %v1752_v2 }
 0x363   : > { %v1642_v15 = vpack.c.bf16 %v968_v7, %v2317_v45  ;;  %v1790_v16 = vpop.permute.xlu0 %1789  ;;  %v1775_v17 = vpop.permute.xlu1 %1774  ;;  %v1627_v20 = vpack.c.bf16 %v966_v9, %v2320_v8  ;;  %v1625_v26 = vpack.c.bf16 %v967_v18, %v2314_v11  ;;  %v1016_v32 = vsel %vm577_vm2, %v1751_v4, %v1781_v14 }
 0x364   : > { %v1777_v21 = vunpack.i.h.bf16 %v1775_v17  ;;  %v1776_v22 = vunpack.i.l.bf16 %v1775_v17  ;;  %v1792_v24 = vunpack.i.h.bf16 %v1790_v16  ;;  %v1791_v25 = vunpack.i.l.bf16 %v1790_v16 }
 0x365   : > { %1643 = vmatpush3.bf16.msra.mxu1 %v1642_v15  ;;  %1626 = vmatprep.subr.bf16.mxu0 %v1625_v26  ;;  %v1017_v41 = vsel %vm577_vm2, %v1781_v14, %v1782_v6 }
 0x366   : > { %v991_v29 = vsel %vm553_vm1, %v1746_v0, %v1776_v22  ;;  %v993_v30 = vsel %vm553_vm1, %v1777_v21, %v1747_v1  ;;  %1644 = vmatprep.subr.bf16.mxu1 %v1967_v38  ;;  %v992_v36 = vsel %vm553_vm1, %v1776_v22, %v1777_v21  ;;  %1628 = vmatpush1.bf16.msra.mxu0 %v1627_v20 }
 0x367   : > { %v1645_v33 = vpack.c.bf16 %v1018_v28, %v993_v30  ;;  %v1800_v34 = vpop.permute.xlu0 %1799  ;;  %v1785_v35 = vpop.permute.xlu1 %1784  ;;  %v1631_v37 = vpack.c.bf16 %v1016_v32, %v991_v29  ;;  %v1068_v42 = vsel %vm625_vm4, %v1792_v24, %v1762_v19  ;;  %v1066_v10 = vsel %vm625_vm4, %v1761_v23, %v1791_v25 }
 0x368   : > { %v1787_v39 = vunpack.i.h.bf16 %v1785_v35  ;;  %v1786_v40 = vunpack.i.l.bf16 %v1785_v35  ;;  %v1629_v43 = vpack.c.bf16 %v1017_v41, %v992_v36  ;;  %v1067_v11 = vsel %vm625_vm4, %v1791_v25, %v1792_v24 }
 0x369   : > { %1646 = vmatpush3.bf16.msra.mxu1 %v1645_v33  ;;  %v1802_v44 = vunpack.i.h.bf16 %v1800_v34  ;;  %v1801_v46 = vunpack.i.l.bf16 %v1800_v34 }
 0x36a   : > { %v1041_v45 = vsel %vm601_vm3, %v1756_v13, %v1786_v40  ;;  %v1043_v8 = vsel %vm601_vm3, %v1787_v39, %v1757_v5  ;;  %1647 = vmatprep.subr.bf16.mxu1 %v1967_v38  ;;  %v1042_v12 = vsel %vm601_vm3, %v1786_v40, %v1787_v39  ;;  %1630 = vmatprep.subr.bf16.mxu0 %v1629_v43 }
 0x36b   : > { %v1635_v47 = vpack.c.bf16 %v1066_v10, %v1041_v45  ;;  %v1648_v48 = vpack.c.bf16 %v1068_v42, %v1043_v8  ;;  %v1805_v49 = vpop.permute.xlu0 %1804  ;;  %v1795_v50 = vpop.permute.xlu1 %1794  ;;  %v1633_v51 = vpack.c.bf16 %v1067_v11, %v1042_v12  ;;  %1632 = vmatpush1.bf16.msra.mxu0 %v1631_v37  ;;  %v1117_v1 = vsel %vm673_vm7, %v1801_v46, %v1802_v44 }
 0x36c   : > { %v1807_v52 = vunpack.i.h.bf16 %v1805_v49  ;;  %v1806_v53 = vunpack.i.l.bf16 %v1805_v49  ;;  %v1797_v54 = vunpack.i.h.bf16 %v1795_v50  ;;  %v1796_v55 = vunpack.i.l.bf16 %v1795_v50 }
 0x36d   : > { %1634 = vmatprep.subr.bf16.mxu0 %v1633_v51  ;;  %1649 = vmatpush3.bf16.msra.mxu1 %v1648_v48 }
 0x36e   : > { %v1116_v56 = vsel %vm673_vm7, %v1806_v53, %v1801_v46  ;;  %v1118_v57 = vsel %vm673_vm7, %v1802_v44, %v1807_v52  ;;  %v1091_v58 = vsel %vm649_vm5, %v1766_v31, %v1796_v55  ;;  %v1093_v59 = vsel %vm649_vm5, %v1797_v54, %v1767_v27  ;;  %1650 = vmatprep.subr.bf16.mxu1 %v1967_v38  ;;  %v1150_v38 = vld [vmem:[%s2481_s7] sm:$0xf] }
 0x36f   : > { %v1651_v60 = vpack.c.bf16 %v1118_v57, %v1093_v59  ;;  %v1138_v61 = vpop.permute.xlu0 %1137  ;;  %v1136_v62 = vpop.permute.xlu1 %1135  ;;  %v1092_v63 = vsel %vm649_vm5, %v1796_v55, %v1797_v54  ;;  %v1639_v0 = vpack.c.bf16 %v1116_v56, %v1091_v58  ;;  %1636 = vmatpush1.bf16.msra.mxu0 %v1635_v47 }
 0x370   : > { %v1637_v2 = vpack.c.bf16 %v1117_v1, %v1092_v63  ;;  %v1142_v7 = vsel %vm697_vm8, %v1136_v62, %v1138_v61 }
 0x371   : > { %1652 = vmatpush3.bf16.msra.mxu1 %v1651_v60 }
 0x372   : > { %1638 = vmatprep.subr.bf16.mxu0 %v1637_v2  ;;  %1592 = vmatprep.subr.mxu1 %v1958_v3 }
 0x373   : > { %v1140_v4 = vpop.permute.xlu0 %1139  ;;  %v1134_v5 = vpop.permute.xlu1 %1133  ;;  %1640 = vmatpush1.bf16.msra.mxu0 %v1639_v0 }
 0x374   : > { %v1143_v6 = vsel %vm697_vm8, %v1138_v61, %v1140_v4  ;;  %v1141_v9 = vsel %vm697_vm8, %v1134_v5, %v1136_v62  ;;  %1217 = vmatprep.subr.mxu0 %v1142_v7 }
 0x375   : > { %1593 = vmatpush3.msra.mxu1 %v1143_v6 }
 0x376   : > { %1595 = vmatmul.mubr.msk.f32.vlgmr.msra.gmra.mrb[2].mxu1 %vm735_vm9, %v1150_v38 }
 0x377   : > { %1218 = vmatpush1.msra.mxu0 %v1141_v9 }
 0x378   : > { %1525 = vmatmul.mubr.msk.f32.vlgmr.msra.gmra.mrb[2].mxu0 %vm735_vm9, %v1150_v38 }
 0x379   : > { %1853 = shalt.err (!%p1850_p6)
}
 0x37a   : > { %s1854_s19 = scalar_lea.hbm %s2396_s25, 256  ;;  %s1858_s29 = scalar_lea.hbm %s2484_s10, 512 }
 0x37b   : > { %p1855_p4 = scmp.ne.s32.totalorder %s2396_s25, %s1854_s19  ;;  %p1859_p1 = scmp.lt.u32.totalorder %s2396_s25, %s2484_s10 }
 0x37c   : > { %p1860_p2 = scmp.lt.u32.totalorder %s1858_s29, %s1854_s19  ;;  %p1862_p8 = scmp.lt.u32.totalorder %s1854_s19, %s2396_s25 }
 0x37d   : > { %p1856_p10 = pnand %p1855_p4, %p2506_p9 }
 0x37e   : > { %p1861_p5 = por %p1860_p2, %p1859_p1 }
 0x37f   : > { %p1857_p12 = pneg %p1856_p10 }
 0x380   : > { %p1863_p11 = por %p1862_p8, %p1861_p5 }
 0x382   : > { %p1864_p0 = pnand %p1863_p11, %p1857_p12 }
 0x384   : > { %1867 = shalt.err (!%p1864_p0)
}
 0x385   : > { %1658 = dma.vmem_to_hbm [thread:$0]  (%p2506_p9), %s1385_s23, 256, %s2396_s25, %s1354_s24   ;;  %v1187_v3 = vpop.permute.xlu0 %1186  ;;  %v1185_v13 = vpop.permute.xlu1 %1184 }
 0x386   : > { %s1653_s22 = smul.u32 12, %s2139_s11  ;;  %v1192_v20 = vsel %vm601_vm3, %v1185_v13, %v1187_v3  ;;  %s1349_s12 = scalar_lea.sflag [#allocation8], %s2139_s11 }
 0x387   : > { %s1654_s19 = smul.u32 192, %s1946_s16  ;;  %s1972_s29 = smov [#allocation9]  }
 0x388   : > { %s406_s17 = scalar_lea.vmem [#allocation9], %s1653_s22  ;;  %s1872_s30 = sshll.u32 %s1972_s29, 4  ;;  %s1873_s30 = int_to_ptr.vmem [resolvable:$false] %s1872_s30 }
 0x389   : > { %v1191_v14 = vpop.permute.xlu0 %1190  ;;  %v1189_v15 = vpop.permute.xlu1 %1188  ;;  %s1370_s25 = sshll.u32 %s406_s17, 4  ;;  %s2425_s20 = scalar_lea.hbm %s2483_s9, %s1654_s19  ;;  %s2427_s25 = int_to_ptr.vmem [resolvable:$true] %s1370_s25 }
 0x38a   : > { %v1194_v16 = vsel %vm601_vm3, %v1189_v15, %v1191_v14  ;;  %v1193_v23 = vsel %vm601_vm3, %v1187_v3, %v1189_v15  ;;  %s1868_s16 = scalar_lea.vmem %s2427_s25, 192  ;;  %s1874_s21 = scalar_lea.vmem %s1873_s30, 384 }
 0x38b   : > { %p1869_p7 = scmp.ne.s32.totalorder %s2427_s25, %s1868_s16  ;;  %p1875_p6 = scmp.lt.s32.totalorder %s2427_s25, %s1873_s30 }
 0x38c   : > { %p1876_p4 = scmp.lt.s32.totalorder %s1874_s21, %s1868_s16 }
 0x38d   : > { %p1870_p13 = pnand %p1869_p7, %p2506_p9 }
 0x38e   : > { %p1877_p10 = por %p1876_p4, %p1875_p6 }
 0x38f   : > { %p1871_p3 = pneg %p1870_p13 }
 0x391   : > { %p1878_p12 = pnand %p1877_p10, %p1871_p3 }
 0x449   : > { %v1338_v17 = vpop.f32.mrb[2].mxu1 }
 0x44a   : > { %v1339_v18 = vadd.f32 %v1338_v17, %v1194_v16  ;;  %v1596_v19 = vpop.f32.mrb[3].mxu1 }
 0x44b   : > { %v1267_v21 = vpop.f32.mrb[2].mxu0 }
 0x44c   : > { %1347 = vst [vmem:[%s406_s17 + $0x8] sm:$0xf] %v1339_v18  ;;  %v1268_v22 = vadd.f32 %v1267_v21, %v1192_v20  ;;  %v1269_v24 = vpop.f32.mrb[3].mxu0 }
 0x44d   : > { %v1270_v25 = vadd.f32 %v1269_v24, %v1193_v23 }
 0x44f   : > { %v1344_v26 = vcombine.low %v1268_v22, %v1270_v25 }
 0x451   : > { %1346 = vst [vmem:[%s406_s17] sm:$0xff] %v1344_v26 }
 0x452   : > { %1881 = shalt.err (!%p1878_p12)
}
 0x453   : > { %s1882_s11 = scalar_lea.hbm %s2425_s20, 192  ;;  %s1886_s19 = scalar_lea.hbm %s2483_s9, 384 }
 0x454   : > { %p1883_p1 = scmp.ne.s32.totalorder %s2425_s20, %s1882_s11  ;;  %p1887_p8 = scmp.lt.u32.totalorder %s2425_s20, %s2483_s9 }
 0x455   : > { %p1888_p11 = scmp.lt.u32.totalorder %s1886_s19, %s1882_s11  ;;  %p1890_p7 = scmp.lt.u32.totalorder %s1882_s11, %s2425_s20 }
 0x456   : > { %p1884_p2 = pnand %p1883_p1, %p2506_p9 }
 0x457   : > { %p1889_p0 = por %p1888_p11, %p1887_p8 }
 0x458   : > { %p1885_p5 = pneg %p1884_p2 }
 0x459   : > { %p1891_p13 = por %p1890_p7, %p1889_p0 }
 0x45b   : > { %p1892_p3 = pnand %p1891_p13, %p1885_p5 }
 0x45d   : > { %1895 = shalt.err (!%p1892_p3)
}
 0x45e   : > { %1657 = dma.vmem_to_hbm [thread:$0]  (%p2506_p9), %s2427_s25, 192, %s2425_s20, %s1349_s12  }
 0x45f PF: > { %s1396_s16 = sand.u32 1, %s1934_s13   ;;  %p2507_p6 = scmp.ne.s32.totalorder %s2499_s28, 0 }
 0x460   : > { %p2508_p4 = scmp.ge.s32.totalorder %s1954_s18, 2  ;;  %s1397_s29 = scalar_lea.sflag [#allocation8], %s1396_s16 }
 0x462   : > { %p1666_p10 = pnand %p2508_p4, %p2507_p6 }
 0x464   : > { %1925 = dma.done.wait (!%p1666_p10), %s1397_s29, 192  }
 0x465   : > { %1927 = vsyncadd (!%p1666_p10), %s1397_s29, 4294967104  ;;  %s1406_s30 = scalar_lea.sflag [#allocation11], %s1396_s16 }
 0x466   : > { %1929 = dma.done.wait (!%p1666_p10), %s1406_s30, 256  }
 0x467   : > { %1931 = vsyncadd (!%p1666_p10), %s1406_s30, 4294967040  ;;  %s30_s18 = sadd.s32 1, %s1954_s18   ;;  %s2509_s16 = sld [smem:[#allocation15_spill]] }
 0x468   : > { %p27_p12 = scmp.ge.s32.totalorder %s30_s18, 4   ;;  %s2510_s17 = sld [smem:[#allocation16_spill]] }
 0x469   : > { %s2511_s13 = smov %s1938_s14  ;;  %s2512_s14 = smov %s1942_s15 }
 0x46a   : > { %s2513_s15 = smov %s2084_s27  ;;  %29 = sbr.rel (!%p27_p12) target bundleno = 8 (0x8), region = 121 }
 0x471   :  { %1411 = vsyncpa [#allocation7], 1 }
 0x472   :  { %1413 = vsyncpa [#allocation7 + $0x1], 1 }
 0x473   :  { %1414 = vsyncpa [#allocation8], 1 }
 0x474   :  { %1416 = vsyncpa [#allocation8 + $0x1], 1 }
 0x475   :  { %1417 = vsyncpa [#allocation11], 1 }
 0x476   :  { %1419 = vsyncpa [#allocation11 + $0x1], 1 }

// kernel: tpu_custom_call.1
= control target key start
LH: loop header
LB: loop body
LE: loop exit
PB: predicated region body
PF: predicated region fallthrough
CT: control target
= control target key end

     0   :  { %16 = vsyncpa [#allocation7], 0  ;;  %s2474_s0 = inlined_call_operand.hbm [shape: f32[2,1,4,512], index: 0, kind: input, shape index: {}]   ;;  %s2475_s1 = inlined_call_operand.vmem [shape: f32[1,1,512], index: 1, kind: input, shape index: {}]   ;;  %s2476_s2 = inlined_call_operand.vmem [shape: f32[4,1], index: 2, kind: input, shape index: {}]   ;;  %s2477_s3 = inlined_call_operand.vmem [shape: f32[4,1], index: 3, kind: input, shape index: {}]   ;;  %s2478_s4 = inlined_call_operand.vmem [shape: f32[8,72], index: 4, kind: input, shape index: {}]   ;;  %s2479_s5 = inlined_call_operand.vmem [shape: f32[8,1], index: 5, kind: input, shape index: {}]   ;;  %s2480_s6 = inlined_call_operand.vmem [shape: f32[8,1], index: 6, kind: input, shape index: {}]   ;;  %s2481_s7 = inlined_call_operand.vmem [shape: f32[4,72], index: 7, kind: input, shape index: {}]   ;;  %s2482_s8 = inlined_call_operand.vmem [shape: f32[1,384], index: 8, kind: input, shape index: {}]   ;;  %s2483_s9 = inlined_call_operand.hbm [shape: f32[2,4,384], index: 9, kind: output, shape index: {0}]   ;;  %s2484_s10 = inlined_call_operand.hbm [shape: f32[2,1,4,512], index: 10, kind: output, shape index: {1}]  }
   0x1   :  { %18 = vsyncpa [#allocation7 + $0x1], 0 }
   0x2   :  { %19 = vsyncpa [#allocation8], 0 }
   0x3   :  { %21 = vsyncpa [#allocation8 + $0x1], 0 }
   0x4   :  { %22 = vsyncpa [#allocation11], 0 }
   0x5   :  { %24 = vsyncpa [#allocation11 + $0x1], 0  ;;  %s2028_s13 = smov 0   ;;  %s2030_s14 = smov 0  }
   0x6   :  { %s2032_s15 = smov 0   ;;  %s2034_s16 = smov 0  }
   0x7   :  { %s2036_s17 = smov 0   ;;  %s2038_s18 = smov 0  }
   0x8 LB: > { %2494 = sst [smem:[#allocation15_spill]] %s1950_s17  ;;  %s1512_s19 = sadd.s32 4294967295, %s1954_s18   ;;  %s1954_s18 = sphi %s2038_s18, %s30_s18   ;;  %s1950_s17 = sphi %s2036_s17, %s2510_s17   ;;  %s1946_s16 = sphi %s2034_s16, %s2509_s16   ;;  %s1942_s15 = sphi %s2032_s15, %s2513_s15   ;;  %s1938_s14 = sphi %s2030_s14, %s2512_s14   ;;  %s1934_s13 = sphi %s2028_s13, %s2511_s13  }
   0x9   : > { %s1513_s20 = sadd.s32 4294967294, %s1954_s18   ;;  %s42_s21 = sadd.s32 1, %s1950_s17 }
   0xa   : > { %s49_s22 = sadd.s32 1, %s1942_s15  ;;  %p44_p0 = scmp.ge.s32.totalorder %s42_s21, 2 }
   0xb   : > { %p56_p1 = scmp.ne.s32.totalorder %s1942_s15, %s1938_s14  ;;  %p57_p2 = scmp.eq.s32.totalorder %s1954_s18, 0 }
   0xc   : > { %p62_p3 = scmp.ne.s32.totalorder %s1938_s14, %s1934_s13  ;;  %s2515_s21 = smov (%p44_p0, %s42_s21), 0 }
   0xd   : > { %2495 = sst [smem:[#allocation16_spill]] %s2515_s21  ;;  %p2069_p4 = por %p57_p2, %p56_p1 }
   0xe   : > { %p63_p5 = scmp.eq.s32.totalorder %s1512_s19, 0  ;;  %s46_s24 = ssub.s32 %s1950_s17, %s2515_s21 }
   0xf   : > { %p261_p6 = scmp.eq.s32.totalorder %s1512_s19, 1  ;;  %p47_p7 = scmp.eq.s32.totalorder %s46_s24, 0 }
  0x10   : > { %p2075_p8 = por %p63_p5, %p62_p3  ;;  %p267_p10 = scmp.eq.s32.totalorder %s1513_s20, 1 }
  0x11   : > { %p2079_p9 = por %p261_p6, %p56_p1  ;;  %p1672_p13 = scmp.lt.s32.totalorder %s1954_s18, 2 }
  0x12   : > { %s2084_s27 = scalar_select %p47_p7, %s1942_s15, %s49_s22  }
  0x13   : > { %s2498_s26 = scalar_select %p2079_p9, 1, 0 }
  0x14   : > { %p2086_p11 = por %p267_p10, %p62_p3  ;;  %s341_s29 = sand.u32 1, %s1942_s15  }
  0x15   : > { %s1517_s30 = sshll.u32 %s341_s29, 4  ;;  %s1533_s11 = sshll.u32 %s1950_s17, 8 }
  0x16   : > { %s2499_s28 = scalar_select %p2086_p11, 1, 0 }
  0x17   : > { %s2097_s24 = scalar_lea.hbm %s2474_s0, %s1533_s11  ;;  %s345_s20 = scalar_lea.vmem [#allocation6], %s1517_s30 }
  0x18   : > { %s353_s22 = sshll.u32 %s345_s20, 4  ;;  %p2103_p0 = pnand %p1672_p13, %p2069_p4  ;;  %s2099_s22 = int_to_ptr.vmem [resolvable:$true] %s353_s22 }
  0x19   : > { %s342_s12 = scalar_lea.sflag [#allocation7], %s341_s29  ;;  %s1810_s11 = scalar_lea.hbm %s2097_s24, 256 }
  0x1a   : > { %p1811_p3 = scmp.ne.s32.totalorder %s2097_s24, %s1810_s11  ;;  %p1812_p5 = pneg %p2103_p0 }
  0x1b   : > { %s1815_s23 = scalar_lea.hbm %s2474_s0, 512  ;;  %p1816_p4 = scmp.lt.u32.totalorder %s2097_s24, %s2474_s0 }
  0x1c   : > { %p1813_p6 = pnand %p1812_p5, %p1811_p3  ;;  %p1817_p10 = scmp.lt.u32.totalorder %s1815_s23, %s1810_s11 }
  0x1d   : > { %p1819_p12 = scmp.lt.u32.totalorder %s1810_s11, %s2097_s24 }
  0x1e   : > { %p1814_p7 = pneg %p1813_p6  ;;  %p1818_p13 = por %p1817_p10, %p1816_p4 }
  0x20   : > { %p1820_p1 = por %p1819_p12, %p1818_p13 }
  0x22   : > { %p1821_p2 = pnand %p1820_p1, %p1814_p7 }
  0x24   : > { %1824 = shalt.err (!%p1821_p2)
}
  0x25   : > { %s1825_s29 = scalar_lea.vmem %s2099_s22, 256  ;;  %s1956_s30 = smov [#allocation6]  }
  0x26   : > { %p1826_p3 = scmp.ne.s32.totalorder %s2099_s22, %s1825_s29  ;;  %s1830_s19 = sshll.u32 %s1956_s30, 4  ;;  %s1831_s19 = int_to_ptr.vmem [resolvable:$false] %s1830_s19 }
  0x27   : > { %s1832_s17 = scalar_lea.vmem %s1831_s19, 512  ;;  %p1833_p9 = scmp.lt.s32.totalorder %s2099_s22, %s1831_s19 }
  0x28   : > { %p1828_p6 = pnand %p1826_p3, %p1812_p5  ;;  %p1834_p4 = scmp.lt.s32.totalorder %s1832_s17, %s1825_s29 }
  0x2a   : > { %p1829_p11 = pneg %p1828_p6  ;;  %p1835_p10 = por %p1834_p4, %p1833_p9 }
  0x2c   : > { %p1836_p12 = pnand %p1835_p10, %p1829_p11 }
  0x2e   : > { %1839 = shalt.err (!%p1836_p12)
}
  0x2f   : > { %1664 = dma.hbm_to_vmem [thread:$0]  (!%p2103_p0), %s2097_s24, 256, %s2099_s22, %s342_s12  }
  0x30   : > { %p2501_p1 = scmp.lt.s32.totalorder %s1954_s18, 3  ;;  %p2502_p2 = scmp.ge.s32.totalorder %s1954_s18, 1 }
  0x32   : > { %p359_p5 = pnand %p2502_p2, %p2501_p1 }
  0x33   : > { %s2139_s11 = sand.u32 (!%p359_p5), 1, %s1938_s14  }
  0x34   : > { %362 = sbr.rel (%p359_p5) target bundleno = 1119 (0x45f), region = 56  ;;  %s1521_s23 = sshll.u32 (!%p359_p5), %s2139_s11, 4 }
  0x35   : > { %s365_s20 = scalar_lea.sflag (!%p359_p5), [#allocation7], %s2139_s11  ;;  %s2145_s21 = scalar_lea.vmem (!%p359_p5), [#allocation6], %s1521_s23 }
  0x3b   : > { %1921 = dma.done.wait (%p2075_p8), %s365_s20, 256  }
  0x3c   : > { %1923 = vsyncadd (%p2075_p8), %s365_s20, 4294967040  ;;  %v1957_v0 = vmov 0   ;;  %v418_v1 = vld [vmem:[%s2476_s2] sm:$0xf]  ;;  %v1958_v3 = vmov 0.0   ;;  %v429_v6 = vlaneseq  ;;  %v420_v17 = vld [vmem:[%s2145_s21] sm:$0xff] }
  0x3d   : > { %1736 = vset.pattern.permute.xlu0 %v1957_v0  ;;  %1737 = vset.pattern.permute.xlu1 %v1957_v0  ;;  %v419_v2 = vld [vmem:[%s2477_s3] sm:$0xf]  ;;  %481 = vst [vmem:[#allocation4 + $0x8] sm:$0xf0] %v1958_v3  ;;  %484 = vst [vmem:[#allocation4 + $0x20] sm:$0xf0] %v1958_v3 }
  0x3e   : > { %424 = vperm.xlu0 %1736, %v418_v1   ;;  %480 = vst [vmem:[#allocation4] sm:$0xf0] %v1958_v3  ;;  %482 = vst [vmem:[#allocation4 + $0x10] sm:$0xf0] %v1958_v3  ;;  %803 = vmatprep.mubr.f32.mxu0 %v1958_v3  ;;  %v1959_v4 = vmov 839922192  }
  0x3f   : > { %483 = vst [vmem:[#allocation4 + $0x18] sm:$0xf0] %v1958_v3  ;;  %485 = vst [vmem:[#allocation4 + $0x28] sm:$0xf0] %v1958_v3  ;;  %v427_v5 = vunpack.c.l.s4 %v1959_v4  ;;  %v2185_v8 = vshrl.u32 %v429_v6, 7  ;;  %v421_v18 = vld [vmem:[%s2145_s21 + $0x8] sm:$0xff] }
  0x40   : > { %486 = vst [vmem:[#allocation4 + $0x30] sm:$0xf0] %v1958_v3  ;;  %487 = vst [vmem:[#allocation4 + $0x38] sm:$0xf0] %v1958_v3  ;;  %v454_v15 = vld [vmem:[%s2475_s1] sm:$0xf] }
  0x41   : > { %488 = vst [vmem:[#allocation4 + $0x40] sm:$0xf0] %v1958_v3  ;;  %489 = vst [vmem:[#allocation4 + $0x48] sm:$0xf0] %v1958_v3  ;;  %v428_v7 = vunpack.c.0.s8 %v427_v5  ;;  %v458_v10 = vsub.s32 0, %v2185_v8  ;;  %v462_v11 = vsub.s32 1, %v2185_v8 }
  0x42   : > { %438 = vperm.xlu0 %1736, %v419_v2   ;;  %490 = vst [vmem:[#allocation4 + $0x50] sm:$0xf0] %v1958_v3  ;;  %491 = vst [vmem:[#allocation4 + $0x58] sm:$0xf0] %v1958_v3  ;;  %v466_v12 = vsub.s32 2, %v2185_v8  ;;  %v470_v13 = vsub.s32 3, %v2185_v8 }
  0x43   : > { %492 = vst [vmem:[#allocation4 + $0x60] sm:$0xf0] %v1958_v3  ;;  %493 = vst [vmem:[#allocation4 + $0x68] sm:$0xf0] %v1958_v3  ;;  %v431_v9 = vsub.s32 %v428_v7, %v2185_v8  ;;  %v459_v19 = vrot.slane %v454_v15, %v458_v10  ;;  %v463_v20 = vrot.slane %v454_v15, %v462_v11  ;;  %s2205_s19 = scalar_lea.vmem [#allocation10], %s1521_s23  ;;  %s1960_s17 = smov 126  }
  0x44   : > { %494 = vst [vmem:[#allocation4 + $0x70] sm:$0xf0] %v1958_v3  ;;  %495 = vst [vmem:[#allocation4 + $0x78] sm:$0xf0] %v1958_v3  ;;  %v467_v21 = vrot.slane %v454_v15, %v466_v12  ;;  %v471_v22 = vrot.slane %v454_v15, %v470_v13  ;;  %s1961_s20 = smov 124   ;;  %s2492_s23 = smov 88  }
  0x45   : > { %496 = vst [vmem:[#allocation4 + $0x80] sm:$0xf0] %v1958_v3  ;;  %497 = vst [vmem:[#allocation4 + $0x88] sm:$0xf0] %v1958_v3  ;;  %v472_v27 = vcombine.low %v459_v19, %v463_v20  ;;  %s2488_s24 = smov 86   ;;  %s2490_s22 = smov 48  }
  0x46   : > { %498 = vst [vmem:[#allocation4 + $0x90] sm:$0xf0] %v1958_v3  ;;  %499 = vst [vmem:[#allocation4 + $0x98] sm:$0xf0] %v1958_v3  ;;  %v473_v28 = vcombine.low %v467_v21, %v471_v22  ;;  %s1965_s12 = smov 84   ;;  %s1966_s29 = smov 46  }
  0x47   : > { %500 = vst [vmem:[#allocation4 + $0xa0] sm:$0xf0] %v1958_v3  ;;  %501 = vst [vmem:[#allocation4 + $0xa8] sm:$0xf0] %v1958_v3  ;;  %v1967_v38 = vmov 0.0|0.0   ;;  %s1968_s25 = smov 44  }
  0x48   : > { %502 = vst [vmem:[#allocation4 + $0xb0] sm:$0xf0] %v1958_v3  ;;  %503 = vst [vmem:[#allocation4 + $0xb8] sm:$0xf0] %v1958_v3  ;;  %1613 = vmatprep.subr.bf16.mxu1 %v1967_v38  ;;  %v880_v39 = vld [vmem:[%s2479_s5] sm:$0xff]  ;;  %vm1969_vm0 = vmmov 0  }
  0x49   : > { %504 = vst [vmem:[#allocation4 + $0xc0] sm:$0xf0] %v1958_v3  ;;  %505 = vst [vmem:[#allocation4 + $0xc8] sm:$0xf0] %v1958_v3  ;;  %1573 = vmatprep.mubr.msk.f32.mxu1 %vm1969_vm0, %v1958_v3  ;;  %v889_v40 = vld [vmem:[%s2480_s6] sm:$0xff]  ;;  %vm553_vm1 = vcmask 1014784  }
  0x4a   : > { %506 = vst [vmem:[#allocation4 + $0xd0] sm:$0xf0] %v1958_v3  ;;  %vm577_vm2 = vcmask 719872   ;;  %vm601_vm3 = vcmask 703488   ;;  %vm625_vm4 = vcmask 687104   ;;  %vm649_vm5 = vcmask 392192  }
  0x4b   : > { %vm529_vm6 = vcmask 1031168   ;;  %vm673_vm7 = vcmask 375808   ;;  %vm697_vm8 = vcmask 359424   ;;  %vm735_vm9 = vcmask 588800   ;;  %s2505_s30 = smov 48   ;;  %p2506_p9 = scmp.ne.s32.totalorder %s2498_s26, 0 }
  0x4c   : > { %vm921_vm10 = vcmask 343040   ;;  %vm923_vm11 = vcmask 1047888  }
  0x4d   : > { %922 = vst.msk [vmem:[#allocation3] sm:$0xff] %vm921_vm10, %v1958_v3 }
  0x4e   : > { %924 = vst.msk [vmem:[#allocation3 + $0x18] sm:$0xff] %vm923_vm11, %v1958_v3 }
  0xbd   : > { %v425_v14 = vpop.permute.xlu0 %424 }
  0xbe   : > { %v432_v16 = vrot.slane %v425_v14, %v431_v9 }
  0xc0   : > { %v434_v24 = vmul.f32 %v432_v16, %v420_v17  ;;  %v435_v25 = vmul.f32 %v432_v16, %v421_v18 }
  0xc1   : > { %v439_v23 = vpop.permute.xlu0 %438 }
  0xc2   : > { %v446_v26 = vrot.slane %v439_v23, %v431_v9 }
  0xc4   : > { %v448_v29 = vadd.f32 %v446_v26, %v434_v24  ;;  %v449_v30 = vadd.f32 %v446_v26, %v435_v25 }
  0xc6   : > { %v450_v31 = vmax.f32 %v448_v29, 0.0  ;;  %v451_v32 = vmax.f32 %v449_v30, 0.0 }
  0xc8   : > { %452 = vst [vmem:[%s2205_s19] sm:$0xff] %v450_v31  ;;  %453 = vst [vmem:[%s2205_s19 + $0x8] sm:$0xff] %v451_v32  ;;  %v476_v33 = vmul.f32 %v472_v27, %v450_v31  ;;  %v477_v34 = vmul.f32 %v473_v28, %v451_v32 }
  0xca   : > { %479 = vst [vmem:[#allocation2 + $0x8] sm:$0xff] %v477_v34  ;;  %525 = vrot.lane.b32.xlu1 %v477_v34, %s1960_s17  ;;  %521 = vrot.lane.b32.xlu0 %v476_v33, %s1960_s17  ;;  %v519_v35 = vcombine.high %v476_v33, %v476_v33  ;;  %512 = vst [vmem:[#allocation4] sm:$0xf] %v476_v33  ;;  %v520_v37 = vcombine.high %v477_v34, %v477_v34 }
  0xcc   : > { %513 = vst [vmem:[#allocation4 + $0x8] sm:$0xf] %v519_v35 }
  0xce   : > { %549 = vrot.lane.b32.xlu1 %v477_v34, %s1961_s20  ;;  %545 = vrot.lane.b32.xlu0 %v476_v33, %s1961_s20 }
  0xd1   : > { %v508_v36 = vld [vmem:[#allocation2 + $0x8] sm:$0xf]  ;;  %v708_v26 = vld [vmem:[#allocation4] sm:$0xff] }
  0xd2   : > { %573 = vrot.lane.b32.xlu1 %v477_v34, %s2492_s23  ;;  %593 = vrot.lane.b32.xlu0 %v476_v33, %s2488_s24  ;;  %514 = vst [vmem:[#allocation4 + $0x10] sm:$0xf] %v508_v36 }
  0xd3   : > { %v709_v25 = vld [vmem:[#allocation4 + $0x8] sm:$0xff] }
  0xd6   : > { %569 = vrot.lane.b32.xlu1 %v476_v33, %s2492_s23  ;;  %641 = vrot.lane.b32.xlu0 %v476_v33, %s2490_s22 }
  0xda   : > { %597 = vrot.lane.b32.xlu1 %v477_v34, %s2488_s24  ;;  %547 = vrot.lane.b32.xlu0 %v519_v35, %s1961_s20 }
  0xde   : > { %621 = vrot.lane.b32.xlu1 %v477_v34, %s1965_s12  ;;  %571 = vrot.lane.b32.xlu0 %v519_v35, %s2492_s23 }
  0xe2   : > { %617 = vrot.lane.b32.xlu1 %v476_v33, %s1965_s12  ;;  %551 = vrot.lane.b32.xlu0 %v520_v37, %s1961_s20 }
  0xe6   : > { %645 = vrot.lane.b32.xlu1 %v477_v34, %s2490_s22  ;;  %595 = vrot.lane.b32.xlu0 %v519_v35, %s2488_s24 }
  0xea   : > { %669 = vrot.lane.b32.xlu1 %v477_v34, %s1966_s29  ;;  %619 = vrot.lane.b32.xlu0 %v519_v35, %s1965_s12 }
  0xee   : > { %665 = vrot.lane.b32.xlu1 %v476_v33, %s1966_s29  ;;  %599 = vrot.lane.b32.xlu0 %v520_v37, %s2488_s24  ;;  %s2503_s24 = smov 88  }
  0xf2   : > { %643 = vrot.lane.b32.xlu0 %v519_v35, %s2490_s22  ;;  %523 = vrot.lane.b32.xlu1 %v519_v35, %s1960_s17 }
  0xf6   : > { %667 = vrot.lane.b32.xlu0 %v519_v35, %s1966_s29  ;;  %527 = vrot.lane.b32.xlu1 %v520_v37, %s1960_s17 }
  0xfa   : > { %647 = vrot.lane.b32.xlu0 %v520_v37, %s2490_s22  ;;  %575 = vrot.lane.b32.xlu1 %v520_v37, %s2492_s23  ;;  %s1970_s23 = smov 42   ;;  %s2504_s22 = smov 86  }
  0xfe   : > { %691 = vrot.lane.b32.xlu0 %v519_v35, %s1968_s25  ;;  %623 = vrot.lane.b32.xlu1 %v520_v37, %s1965_s12 }
 0x102   : > { %689 = vrot.lane.b32.xlu0 %v476_v33, %s1968_s25  ;;  %671 = vrot.lane.b32.xlu1 %v520_v37, %s1966_s29 }
 0x106   : > { %883 = vperm.xlu0 %1736, %v880_v39   ;;  %693 = vrot.lane.b32.xlu1 %v477_v34, %s1968_s25 }
 0x10a   : > { %695 = vrot.lane.b32.xlu1 %v520_v37, %s1968_s25 }
 0x10e   : > { %892 = vperm.xlu1 %1737, %v889_v40  }
 0x13c   : > { %v526_v41 = vpop.permute.xlu1 %525  ;;  %v522_v42 = vpop.permute.xlu0 %521 }
 0x140   : > { %v550_v43 = vpop.permute.xlu1 %549  ;;  %v546_v44 = vpop.permute.xlu0 %545 }
 0x144   : > { %v2250_v45 = vpop.permute.xlu1 %573  ;;  %v594_v46 = vpop.permute.xlu0 %593 }
 0x148   : > { %v570_v47 = vpop.permute.xlu1 %569  ;;  %v642_v48 = vpop.permute.xlu0 %641 }
 0x14c   : > { %v598_v49 = vpop.permute.xlu1 %597  ;;  %v548_v50 = vpop.permute.xlu0 %547 }
 0x14d   : > { %v554_v51 = vsel %vm553_vm1, %v546_v44, %v548_v50  ;;  %v555_v52 = vsel %vm553_vm1, %v548_v50, %v550_v43 }
 0x14e   : > { %560 = vst [vmem:[#allocation4 + $0x30] sm:$0xf] %v554_v51  ;;  %561 = vst [vmem:[#allocation4 + $0x38] sm:$0xf] %v555_v52 }
 0x150   : > { %v2254_v53 = vpop.permute.xlu1 %621  ;;  %v572_v54 = vpop.permute.xlu0 %571 }
 0x151   : > { %v578_v55 = vsel %vm577_vm2, %v570_v47, %v572_v54  ;;  %v579_v56 = vsel %vm577_vm2, %v572_v54, %v2250_v45 }
 0x152   : > { %584 = vst [vmem:[#allocation4 + $0x48] sm:$0xf] %v578_v55  ;;  %585 = vst [vmem:[#allocation4 + $0x50] sm:$0xf] %v579_v56 }
 0x154   : > { %v618_v57 = vpop.permute.xlu1 %617  ;;  %v552_v58 = vpop.permute.xlu0 %551 }
 0x155   : > { %v556_v59 = vsel %vm553_vm1, %v550_v43, %v552_v58  ;;  %v715_v34 = vld [vmem:[#allocation4 + $0x38] sm:$0xff] }
 0x156   : > { %562 = vst [vmem:[#allocation4 + $0x40] sm:$0xf] %v556_v59 }
 0x158   : > { %v646_v60 = vpop.permute.xlu1 %645  ;;  %v596_v61 = vpop.permute.xlu0 %595 }
 0x159   : > { %v602_v62 = vsel %vm601_vm3, %v594_v46, %v596_v61  ;;  %v603_v63 = vsel %vm601_vm3, %v596_v61, %v598_v49  ;;  %v718_v31 = vld [vmem:[#allocation4 + $0x50] sm:$0xff]  ;;  %v717_v39 = vld [vmem:[#allocation4 + $0x48] sm:$0xff] }
 0x15a   : > { %608 = vst [vmem:[#allocation4 + $0x60] sm:$0xf] %v602_v62  ;;  %609 = vst [vmem:[#allocation4 + $0x68] sm:$0xf] %v603_v63  ;;  %v1601_v37 = vpack.c.bf16 %v718_v31, %v715_v34 }
 0x15c   : > { %v2262_v0 = vpop.permute.xlu1 %669  ;;  %v620_v1 = vpop.permute.xlu0 %619 }
 0x15d   : > { %v626_v2 = vsel %vm625_vm4, %v618_v57, %v620_v1  ;;  %v627_v4 = vsel %vm625_vm4, %v620_v1, %v2254_v53  ;;  %v716_v54 = vld [vmem:[#allocation4 + $0x40] sm:$0xff] }
 0x15e   : > { %632 = vst [vmem:[#allocation4 + $0x78] sm:$0xf] %v626_v2  ;;  %633 = vst [vmem:[#allocation4 + $0x80] sm:$0xf] %v627_v4 }
 0x160   : > { %v666_v5 = vpop.permute.xlu1 %665  ;;  %v600_v6 = vpop.permute.xlu0 %599 }
 0x161   : > { %v604_v7 = vsel %vm601_vm3, %v598_v49, %v600_v6  ;;  %v721_v47 = vld [vmem:[#allocation4 + $0x68] sm:$0xff]  ;;  %v720_v58 = vld [vmem:[#allocation4 + $0x60] sm:$0xff] }
 0x162   : > { %610 = vst [vmem:[#allocation4 + $0x70] sm:$0xf] %v604_v7 }
 0x164   : > { %v644_v9 = vpop.permute.xlu0 %643  ;;  %v524_v13 = vpop.permute.xlu1 %523 }
 0x165   : > { %v650_v14 = vsel %vm649_vm5, %v642_v48, %v644_v9  ;;  %v651_v15 = vsel %vm649_vm5, %v644_v9, %v646_v60  ;;  %v530_v16 = vsel %vm529_vm6, %v522_v42, %v524_v13  ;;  %v531_v17 = vsel %vm529_vm6, %v524_v13, %v526_v41  ;;  %v724_v43 = vld [vmem:[#allocation4 + $0x80] sm:$0xff]  ;;  %v723_v51 = vld [vmem:[#allocation4 + $0x78] sm:$0xff] }
 0x166   : > { %656 = vst [vmem:[#allocation4 + $0x90] sm:$0xf] %v650_v14  ;;  %657 = vst [vmem:[#allocation4 + $0x98] sm:$0xf] %v651_v15  ;;  %v1605_v50 = vpack.c.bf16 %v724_v43, %v721_v47  ;;  %v1607_v59 = vpack.c.bf16 %v723_v51, %v720_v58 }
 0x167   : > { %536 = vst [vmem:[#allocation4 + $0x18] sm:$0xf] %v530_v16  ;;  %537 = vst [vmem:[#allocation4 + $0x20] sm:$0xf] %v531_v17  ;;  %v707_v17 = vld [vmem:[%s2478_s4] sm:$0xff] }
 0x168   : > { %v668_v18 = vpop.permute.xlu0 %667  ;;  %v528_v19 = vpop.permute.xlu1 %527 }
 0x169   : > { %v674_v20 = vsel %vm673_vm7, %v666_v5, %v668_v18  ;;  %v675_v21 = vsel %vm673_vm7, %v668_v18, %v2262_v0  ;;  %v532_v22 = vsel %vm529_vm6, %v526_v41, %v528_v19  ;;  %v710_v41 = vld [vmem:[#allocation4 + $0x10] sm:$0xff] }
 0x16a   : > { %680 = vst [vmem:[#allocation4 + $0xa8] sm:$0xf] %v674_v20  ;;  %681 = vst [vmem:[#allocation4 + $0xb0] sm:$0xf] %v675_v21 }
 0x16b   : > { %538 = vst [vmem:[#allocation4 + $0x28] sm:$0xf] %v532_v22 }
 0x16c   : > { %v648_v23 = vpop.permute.xlu0 %647  ;;  %v576_v24 = vpop.permute.xlu1 %575 }
 0x16d   : > { %v652_v27 = vsel %vm649_vm5, %v646_v60, %v648_v23  ;;  %v580_v28 = vsel %vm577_vm2, %v2250_v45, %v576_v24  ;;  %v714_v45 = vld [vmem:[#allocation4 + $0x30] sm:$0xff]  ;;  %v727_v60 = vld [vmem:[#allocation4 + $0x98] sm:$0xff] }
 0x16e   : > { %v712_v29 = vld [vmem:[#allocation4 + $0x20] sm:$0xff]  ;;  %v711_v30 = vld [vmem:[#allocation4 + $0x18] sm:$0xff]  ;;  %658 = vst [vmem:[#allocation4 + $0xa0] sm:$0xf] %v652_v27  ;;  %586 = vst [vmem:[#allocation4 + $0x58] sm:$0xf] %v580_v28  ;;  %v1603_v46 = vpack.c.bf16 %v717_v39, %v714_v45 }
 0x16f   : > { %v1597_v32 = vpack.c.bf16 %v712_v29, %v709_v25  ;;  %v1599_v33 = vpack.c.bf16 %v711_v30, %v708_v26  ;;  %v726_v5 = vld [vmem:[#allocation4 + $0x90] sm:$0xff] }
 0x170   : > { %v692_v35 = vpop.permute.xlu0 %691  ;;  %v624_v36 = vpop.permute.xlu1 %623  ;;  %v901_v23 = vld [vmem:[%s2482_s8] sm:$0x7] }
 0x171   : > { %1598 = vmatprep.subr.bf16.mxu0 %v1597_v32  ;;  %v628_v40 = vsel %vm625_vm4, %v2254_v53, %v624_v36  ;;  %v730_v56 = vld [vmem:[#allocation4 + $0xb0] sm:$0xff]  ;;  %v729_v63 = vld [vmem:[#allocation4 + $0xa8] sm:$0xff]  ;;  %v906_v29 = vrot.slane %v901_v23, %v458_v10 }
 0x172   : > { %1600 = vmatpush1.bf16.msra.mxu0 %v1599_v33  ;;  %v713_v42 = vld [vmem:[#allocation4 + $0x28] sm:$0xff]  ;;  %634 = vst [vmem:[#allocation4 + $0x88] sm:$0xf] %v628_v40  ;;  %v1609_v62 = vpack.c.bf16 %v730_v56, %v727_v60  ;;  %v1611_v6 = vpack.c.bf16 %v729_v63, %v726_v5  ;;  %v910_v33 = vrot.slane %v901_v23, %v462_v11 }
 0x173   : > { %1602 = vmatprep.subr.bf16.mxu0 %v1601_v37  ;;  %v1614_v44 = vpack.c.bf16 %v713_v42, %v710_v41  ;;  %v914_v37 = vrot.slane %v901_v23, %v466_v12 }
 0x174   : > { %v690_v48 = vpop.permute.xlu0 %689  ;;  %v672_v49 = vpop.permute.xlu1 %671 }
 0x175   : > { %1615 = vmatpush3.bf16.msra.mxu1 %v1614_v44  ;;  %v698_v52 = vsel %vm697_vm8, %v690_v48, %v692_v35  ;;  %v676_v53 = vsel %vm673_vm7, %v2262_v0, %v672_v49  ;;  %v719_v55 = vld [vmem:[#allocation4 + $0x58] sm:$0xff]  ;;  %v722_v0 = vld [vmem:[#allocation4 + $0x70] sm:$0xff]  ;;  %v728_v13 = vld [vmem:[#allocation4 + $0xa0] sm:$0xff] }
 0x176   : > { %1604 = vmatpush1.bf16.msra.mxu0 %v1603_v46  ;;  %1616 = vmatprep.subr.bf16.mxu1 %v1967_v38  ;;  %704 = vst [vmem:[#allocation4 + $0xc0] sm:$0xf] %v698_v52  ;;  %682 = vst [vmem:[#allocation4 + $0xb8] sm:$0xf] %v676_v53  ;;  %v1617_v57 = vpack.c.bf16 %v719_v55, %v716_v54  ;;  %v1178_v48 = vld [vmem:[%s2145_s21] sm:$0xff] }
 0x177   : > { %1606 = vmatprep.subr.bf16.mxu0 %v1605_v50  ;;  %v1182_v49 = vcombine.high %v1178_v48, %v1178_v48  ;;  %v1179_v50 = vld [vmem:[%s2145_s21 + $0x8] sm:$0xff] }
 0x178   : > { %v694_v61 = vpop.permute.xlu1 %693  ;;  %v1183_v51 = vcombine.high %v1179_v50, %v1179_v50 }
 0x179   : > { %1618 = vmatpush3.bf16.msra.mxu1 %v1617_v57  ;;  %v699_v1 = vsel %vm697_vm8, %v692_v35, %v694_v61  ;;  %v725_v2 = vld [vmem:[#allocation4 + $0x88] sm:$0xff] }
 0x17a   : > { %1608 = vmatpush1.bf16.msra.mxu0 %v1607_v59  ;;  %1619 = vmatprep.subr.bf16.mxu1 %v1967_v38  ;;  %705 = vst [vmem:[#allocation4 + $0xc8] sm:$0xf] %v699_v1  ;;  %v1620_v4 = vpack.c.bf16 %v725_v2, %v722_v0 }
 0x17b   : > { %1610 = vmatprep.subr.bf16.mxu0 %v1609_v62 }
 0x17c   : > { %v696_v7 = vpop.permute.xlu1 %695 }
 0x17d   : > { %1621 = vmatpush3.bf16.msra.mxu1 %v1620_v4  ;;  %v700_v9 = vsel %vm697_vm8, %v694_v61, %v696_v7  ;;  %v731_v14 = vld [vmem:[#allocation4 + $0xb8] sm:$0xff]  ;;  %v732_v18 = vld [vmem:[#allocation4 + $0xc0] sm:$0xff] }
 0x17e   : > { %1612 = vmatpush1.bf16.msra.mxu0 %v1611_v6  ;;  %1622 = vmatprep.subr.bf16.mxu1 %v1967_v38  ;;  %706 = vst [vmem:[#allocation4 + $0xd0] sm:$0xf] %v700_v9  ;;  %v1623_v15 = vpack.c.bf16 %v731_v14, %v728_v13 }
 0x181   : > { %1624 = vmatpush3.bf16.msra.mxu1 %v1623_v15  ;;  %v733_v16 = vld [vmem:[#allocation4 + $0xc8] sm:$0xff] }
 0x182   : > { %1571 = vmatprep.subr.mxu1 %v1958_v3  ;;  %755 = vmatprep.subr.mxu0 %v733_v16 }
 0x183   : > { %756 = vmatpush1.msra.mxu0 %v732_v18 }
 0x184   : > { %1523 = vmatmul.mubr.msk.f32.vlgmr.msra.gmra.mrb[0].mxu0 %vm735_vm9, %v707_v17 }
 0x185   : > { %v734_v19 = vld [vmem:[#allocation4 + $0xd0] sm:$0xff]  ;;  %1265 = vmatprep.mubr.f32.mxu0 %v1958_v3  ;;  %v884_v20 = vpop.permute.xlu0 %883 }
 0x186   : > { %1572 = vmatpush3.msra.mxu1 %v734_v19 }
 0x187   : > { %1574 = vmatmul.mubr.msk.f32.vlgmr.msra.gmra.mrb[0].mxu1 %vm735_vm9, %v707_v17  ;;  %1641 = vmatprep.subr.bf16.mxu1 %v1967_v38 }
 0x188   : > { %1594 = vmatprep.mubr.msk.f32.mxu1 %vm1969_vm0, %v1958_v3 }
 0x18d   : > { %v893_v22 = vpop.permute.xlu1 %892 }
 0x257   : > { %v805_v21 = vpop.f32.mrb[0].mxu0 }
 0x258   : > { %v886_v24 = vmul.f32 %v884_v20, %v805_v21  ;;  %v807_v25 = vpop.f32.mrb[1].mxu0 }
 0x259   : > { %v887_v26 = vmul.f32 %v884_v20, %v807_v25 }
 0x25a   : > { %v895_v27 = vadd.f32 %v893_v22, %v886_v24  ;;  %v876_v28 = vpop.f32.mrb[0].mxu1 }
 0x25b   : > { %v896_v30 = vadd.f32 %v893_v22, %v887_v26  ;;  %v888_v31 = vmul.f32 %v884_v20, %v876_v28  ;;  %v1575_v32 = vpop.f32.mrb[1].mxu1 }
 0x25c   : > { %v898_v34 = vmax.f32 %v895_v27, 0.0 }
 0x25d   : > { %v899_v35 = vmax.f32 %v896_v30, 0.0  ;;  %v897_v36 = vadd.f32 %v893_v22, %v888_v31 }
 0x25e   : > { %v918_v39 = vmul.f32 %v906_v29, %v898_v34 }
 0x25f   : > { %v900_v40 = vmax.f32 %v897_v36, 0.0  ;;  %v919_v41 = vmul.f32 %v910_v33, %v899_v35 }
 0x260   : > { %928 = vrot.lane.b32.xlu0 %v918_v39, %s1970_s23 }
 0x261   : > { %930 = vrot.lane.b32.xlu1 %v919_v41, %s1970_s23  ;;  %v920_v42 = vmul.f32 %v914_v37, %v900_v40 }
 0x264   : > { %932 = vrot.lane.b32.xlu0 %v920_v42, %s1970_s23  ;;  %s1384_s23 = sshll.u32 %s2205_s19, 4  ;;  %s1385_s23 = int_to_ptr.vmem [resolvable:$true] %s1384_s23 }
 0x2d2   : > { %v929_v10 = vpop.permute.xlu0 %928 }
 0x2d3   : > { %940 = vst.msk [vmem:[#allocation3] sm:$0xff] %vm923_vm11, %v929_v10  ;;  %v931_v43 = vpop.permute.xlu1 %930 }
 0x2d4   : > { %v2314_v11 = vsel %vm921_vm10, %v929_v10, %v931_v43 }
 0x2d6   : > { %v933_v44 = vpop.permute.xlu0 %932 }
 0x2d7   : > { %v2317_v45 = vsel %vm921_vm10, %v931_v43, %v933_v44  ;;  %943 = vst.msk [vmem:[#allocation3 + $0x18] sm:$0xff] %vm921_vm10, %v933_v44 }
 0x2d8   : > { %v1778_v47 = vpack.i.bf16 %v2317_v45, %v2314_v11 }
 0x2da   : > { %v2320_v8 = vld [vmem:[#allocation3] sm:$0xff] }
 0x2de   : > { %v953_v12 = vld [vmem:[#allocation3 + $0x18] sm:$0xff] }
 0x2df   : > { %v1738_v46 = vpack.i.bf16 %v953_v12, %v2320_v8 }
 0x2e1   : > { %1739 = vrot.lane.b32.xlu0 %v1738_v46, %s1960_s17  ;;  %1744 = vrot.lane.b32.xlu1 %v1738_v46, %s1961_s20 }
 0x2e5   : > { %1749 = vrot.lane.b32.xlu0 %v1738_v46, %s2503_s24  ;;  %1754 = vrot.lane.b32.xlu1 %v1738_v46, %s2504_s22 }
 0x2e9   : > { %1759 = vrot.lane.b32.xlu0 %v1738_v46, %s1965_s12  ;;  %1764 = vrot.lane.b32.xlu1 %v1738_v46, %s2505_s30 }
 0x2ed   : > { %1779 = vrot.lane.b32.xlu0 %v1778_v47, %s2503_s24  ;;  %1769 = vrot.lane.b32.xlu1 %v1778_v47, %s1960_s17  ;;  %s1354_s24 = scalar_lea.sflag [#allocation11], %s2139_s11 }
 0x2f1   : > { %1789 = vrot.lane.b32.xlu0 %v1778_v47, %s1965_s12  ;;  %1774 = vrot.lane.b32.xlu1 %v1778_v47, %s1961_s20  ;;  %s1534_s20 = sshll.u32 %s1946_s16, 8 }
 0x2f5   : > { %1799 = vrot.lane.b32.xlu0 %v1778_v47, %s1966_s29  ;;  %1784 = vrot.lane.b32.xlu1 %v1778_v47, %s2504_s22 }
 0x2f9   : > { %1804 = vrot.lane.b32.xlu0 %v1738_v46, %s1966_s29  ;;  %1794 = vrot.lane.b32.xlu1 %v1778_v47, %s2505_s30  ;;  %s1971_s30 = smov [#allocation10]  }
 0x2fa   : > { %s1844_s21 = sshll.u32 %s1971_s30, 4  ;;  %s1845_s21 = int_to_ptr.vmem [resolvable:$false] %s1844_s21 }
 0x2fb   : > { %s1846_s17 = scalar_lea.vmem %s1845_s21, 512  ;;  %p1847_p7 = scmp.lt.s32.totalorder %s1385_s23, %s1845_s21 }
 0x2fd   : > { %1137 = vrot.lane.b32.xlu0 %v2317_v45, %s1968_s25  ;;  %1135 = vrot.lane.b32.xlu1 %v2314_v11, %s1968_s25 }
 0x301   : > { %1139 = vrot.lane.b32.xlu0 %v953_v12, %s1968_s25  ;;  %1133 = vrot.lane.b32.xlu1 %v2320_v8, %s1968_s25  ;;  %s2396_s25 = scalar_lea.hbm %s2484_s10, %s1534_s20 }
 0x305   : > { %1184 = vrot.lane.b32.xlu1 %v1178_v48, %s2504_s22  ;;  %1186 = vrot.lane.b32.xlu0 %v1182_v49, %s2504_s22 }
 0x309   : > { %1188 = vrot.lane.b32.xlu1 %v1179_v50, %s2504_s22  ;;  %1190 = vrot.lane.b32.xlu0 %v1183_v51, %s2504_s22  ;;  %s1840_s22 = scalar_lea.vmem %s1385_s23, 256 }
 0x30a   : > { %p1841_p8 = scmp.ne.s32.totalorder %s1385_s23, %s1840_s22  ;;  %p1848_p13 = scmp.lt.s32.totalorder %s1846_s17, %s1840_s22 }
 0x30c   : > { %p1842_p11 = pnand %p1841_p8, %p2506_p9  ;;  %p1849_p3 = por %p1848_p13, %p1847_p7 }
 0x30e   : > { %p1843_p0 = pneg %p1842_p11 }
 0x310   : > { %p1850_p6 = pnand %p1849_p3, %p1843_p0 }
 0x353   : > { %v1740_v52 = vpop.permute.xlu0 %1739  ;;  %v1745_v53 = vpop.permute.xlu1 %1744 }
 0x354   : > { %v1742_v60 = vunpack.i.h.bf16 %v1740_v52  ;;  %v1741_v61 = vunpack.i.l.bf16 %v1740_v52  ;;  %v1747_v1 = vunpack.i.h.bf16 %v1745_v53  ;;  %v1746_v0 = vunpack.i.l.bf16 %v1745_v53 }
 0x357   : > { %v1750_v54 = vpop.permute.xlu0 %1749  ;;  %v1755_v55 = vpop.permute.xlu1 %1754 }
 0x358   : > { %v1752_v2 = vunpack.i.h.bf16 %v1750_v54  ;;  %v1751_v4 = vunpack.i.l.bf16 %v1750_v54  ;;  %v1757_v5 = vunpack.i.h.bf16 %v1755_v55  ;;  %v1756_v13 = vunpack.i.l.bf16 %v1755_v55 }
 0x35b   : > { %v1760_v56 = vpop.permute.xlu0 %1759  ;;  %v2352_v57 = vpop.permute.xlu1 %1764 }
 0x35c   : > { %v1762_v19 = vunpack.i.h.bf16 %v1760_v56  ;;  %v1761_v23 = vunpack.i.l.bf16 %v1760_v56  ;;  %v1767_v27 = vunpack.i.h.bf16 %v2352_v57  ;;  %v1766_v31 = vunpack.i.l.bf16 %v2352_v57 }
 0x35f   : > { %v1780_v58 = vpop.permute.xlu0 %1779  ;;  %v1770_v59 = vpop.permute.xlu1 %1769 }
 0x360   : > { %v1772_v62 = vunpack.i.h.bf16 %v1770_v59  ;;  %v1771_v63 = vunpack.i.l.bf16 %v1770_v59  ;;  %v1782_v6 = vunpack.i.h.bf16 %v1780_v58  ;;  %v1781_v14 = vunpack.i.l.bf16 %v1780_v58 }
 0x362   : > { %v968_v7 = vsel %vm529_vm6, %v1772_v62, %v1742_v60  ;;  %v966_v9 = vsel %vm529_vm6, %v1741_v61, %v1771_v63  ;;  %v967_v18 = vsel %vm529_vm6, %v1771_v63, %v1772_v62  ;;  %v1018_v28 = vsel %vm577_vm2, %v1782_v6, %v1752_v2 }
 0x363   : > { %v1642_v15 = vpack.c.bf16 %v968_v7, %v2317_v45  ;;  %v1790_v16 = vpop.permute.xlu0 %1789  ;;  %v1775_v17 = vpop.permute.xlu1 %1774  ;;  %v1627_v20 = vpack.c.bf16 %v966_v9, %v2320_v8  ;;  %v1625_v26 = vpack.c.bf16 %v967_v18, %v2314_v11  ;;  %v1016_v32 = vsel %vm577_vm2, %v1751_v4, %v1781_v14 }
 0x364   : > { %v1777_v21 = vunpack.i.h.bf16 %v1775_v17  ;;  %v1776_v22 = vunpack.i.l.bf16 %v1775_v17  ;;  %v1792_v24 = vunpack.i.h.bf16 %v1790_v16  ;;  %v1791_v25 = vunpack.i.l.bf16 %v1790_v16 }
 0x365   : > { %1643 = vmatpush3.bf16.msra.mxu1 %v1642_v15  ;;  %1626 = vmatprep.subr.bf16.mxu0 %v1625_v26  ;;  %v1017_v41 = vsel %vm577_vm2, %v1781_v14, %v1782_v6 }
 0x366   : > { %v991_v29 = vsel %vm553_vm1, %v1746_v0, %v1776_v22  ;;  %v993_v30 = vsel %vm553_vm1, %v1777_v21, %v1747_v1  ;;  %1644 = vmatprep.subr.bf16.mxu1 %v1967_v38  ;;  %v992_v36 = vsel %vm553_vm1, %v1776_v22, %v1777_v21  ;;  %1628 = vmatpush1.bf16.msra.mxu0 %v1627_v20 }
 0x367   : > { %v1645_v33 = vpack.c.bf16 %v1018_v28, %v993_v30  ;;  %v1800_v34 = vpop.permute.xlu0 %1799  ;;  %v1785_v35 = vpop.permute.xlu1 %1784  ;;  %v1631_v37 = vpack.c.bf16 %v1016_v32, %v991_v29  ;;  %v1068_v42 = vsel %vm625_vm4, %v1792_v24, %v1762_v19  ;;  %v1066_v10 = vsel %vm625_vm4, %v1761_v23, %v1791_v25 }
 0x368   : > { %v1787_v39 = vunpack.i.h.bf16 %v1785_v35  ;;  %v1786_v40 = vunpack.i.l.bf16 %v1785_v35  ;;  %v1629_v43 = vpack.c.bf16 %v1017_v41, %v992_v36  ;;  %v1067_v11 = vsel %vm625_vm4, %v1791_v25, %v1792_v24 }
 0x369   : > { %1646 = vmatpush3.bf16.msra.mxu1 %v1645_v33  ;;  %v1802_v44 = vunpack.i.h.bf16 %v1800_v34  ;;  %v1801_v46 = vunpack.i.l.bf16 %v1800_v34 }
 0x36a   : > { %v1041_v45 = vsel %vm601_vm3, %v1756_v13, %v1786_v40  ;;  %v1043_v8 = vsel %vm601_vm3, %v1787_v39, %v1757_v5  ;;  %1647 = vmatprep.subr.bf16.mxu1 %v1967_v38  ;;  %v1042_v12 = vsel %vm601_vm3, %v1786_v40, %v1787_v39  ;;  %1630 = vmatprep.subr.bf16.mxu0 %v1629_v43 }
 0x36b   : > { %v1635_v47 = vpack.c.bf16 %v1066_v10, %v1041_v45  ;;  %v1648_v48 = vpack.c.bf16 %v1068_v42, %v1043_v8  ;;  %v1805_v49 = vpop.permute.xlu0 %1804  ;;  %v1795_v50 = vpop.permute.xlu1 %1794  ;;  %v1633_v51 = vpack.c.bf16 %v1067_v11, %v1042_v12  ;;  %1632 = vmatpush1.bf16.msra.mxu0 %v1631_v37  ;;  %v1117_v1 = vsel %vm673_vm7, %v1801_v46, %v1802_v44 }
 0x36c   : > { %v1807_v52 = vunpack.i.h.bf16 %v1805_v49  ;;  %v1806_v53 = vunpack.i.l.bf16 %v1805_v49  ;;  %v1797_v54 = vunpack.i.h.bf16 %v1795_v50  ;;  %v1796_v55 = vunpack.i.l.bf16 %v1795_v50 }
 0x36d   : > { %1634 = vmatprep.subr.bf16.mxu0 %v1633_v51  ;;  %1649 = vmatpush3.bf16.msra.mxu1 %v1648_v48 }
 0x36e   : > { %v1116_v56 = vsel %vm673_vm7, %v1806_v53, %v1801_v46  ;;  %v1118_v57 = vsel %vm673_vm7, %v1802_v44, %v1807_v52  ;;  %v1091_v58 = vsel %vm649_vm5, %v1766_v31, %v1796_v55  ;;  %v1093_v59 = vsel %vm649_vm5, %v1797_v54, %v1767_v27  ;;  %1650 = vmatprep.subr.bf16.mxu1 %v1967_v38  ;;  %v1150_v38 = vld [vmem:[%s2481_s7] sm:$0xf] }
 0x36f   : > { %v1651_v60 = vpack.c.bf16 %v1118_v57, %v1093_v59  ;;  %v1138_v61 = vpop.permute.xlu0 %1137  ;;  %v1136_v62 = vpop.permute.xlu1 %1135  ;;  %v1092_v63 = vsel %vm649_vm5, %v1796_v55, %v1797_v54  ;;  %v1639_v0 = vpack.c.bf16 %v1116_v56, %v1091_v58  ;;  %1636 = vmatpush1.bf16.msra.mxu0 %v1635_v47 }
 0x370   : > { %v1637_v2 = vpack.c.bf16 %v1117_v1, %v1092_v63  ;;  %v1142_v7 = vsel %vm697_vm8, %v1136_v62, %v1138_v61 }
 0x371   : > { %1652 = vmatpush3.bf16.msra.mxu1 %v1651_v60 }
 0x372   : > { %1638 = vmatprep.subr.bf16.mxu0 %v1637_v2  ;;  %1592 = vmatprep.subr.mxu1 %v1958_v3 }
 0x373   : > { %v1140_v4 = vpop.permute.xlu0 %1139  ;;  %v1134_v5 = vpop.permute.xlu1 %1133  ;;  %1640 = vmatpush1.bf16.msra.mxu0 %v1639_v0 }
 0x374   : > { %v1143_v6 = vsel %vm697_vm8, %v1138_v61, %v1140_v4  ;;  %v1141_v9 = vsel %vm697_vm8, %v1134_v5, %v1136_v62  ;;  %1217 = vmatprep.subr.mxu0 %v1142_v7 }
 0x375   : > { %1593 = vmatpush3.msra.mxu1 %v1143_v6 }
 0x376   : > { %1595 = vmatmul.mubr.msk.f32.vlgmr.msra.gmra.mrb[2].mxu1 %vm735_vm9, %v1150_v38 }
 0x377   : > { %1218 = vmatpush1.msra.mxu0 %v1141_v9 }
 0x378   : > { %1525 = vmatmul.mubr.msk.f32.vlgmr.msra.gmra.mrb[2].mxu0 %vm735_vm9, %v1150_v38 }
 0x379   : > { %1853 = shalt.err (!%p1850_p6)
}
 0x37a   : > { %s1854_s19 = scalar_lea.hbm %s2396_s25, 256  ;;  %s1858_s29 = scalar_lea.hbm %s2484_s10, 512 }
 0x37b   : > { %p1855_p4 = scmp.ne.s32.totalorder %s2396_s25, %s1854_s19  ;;  %p1859_p1 = scmp.lt.u32.totalorder %s2396_s25, %s2484_s10 }
 0x37c   : > { %p1860_p2 = scmp.lt.u32.totalorder %s1858_s29, %s1854_s19  ;;  %p1862_p8 = scmp.lt.u32.totalorder %s1854_s19, %s2396_s25 }
 0x37d   : > { %p1856_p10 = pnand %p1855_p4, %p2506_p9 }
 0x37e   : > { %p1861_p5 = por %p1860_p2, %p1859_p1 }
 0x37f   : > { %p1857_p12 = pneg %p1856_p10 }
 0x380   : > { %p1863_p11 = por %p1862_p8, %p1861_p5 }
 0x382   : > { %p1864_p0 = pnand %p1863_p11, %p1857_p12 }
 0x384   : > { %1867 = shalt.err (!%p1864_p0)
}
 0x385   : > { %1658 = dma.vmem_to_hbm [thread:$0]  (%p2506_p9), %s1385_s23, 256, %s2396_s25, %s1354_s24   ;;  %v1187_v3 = vpop.permute.xlu0 %1186  ;;  %v1185_v13 = vpop.permute.xlu1 %1184 }
 0x386   : > { %s1653_s22 = smul.u32 12, %s2139_s11  ;;  %v1192_v20 = vsel %vm601_vm3, %v1185_v13, %v1187_v3  ;;  %s1349_s12 = scalar_lea.sflag [#allocation8], %s2139_s11 }
 0x387   : > { %s1654_s19 = smul.u32 192, %s1946_s16  ;;  %s1972_s29 = smov [#allocation9]  }
 0x388   : > { %s406_s17 = scalar_lea.vmem [#allocation9], %s1653_s22  ;;  %s1872_s30 = sshll.u32 %s1972_s29, 4  ;;  %s1873_s30 = int_to_ptr.vmem [resolvable:$false] %s1872_s30 }
 0x389   : > { %v1191_v14 = vpop.permute.xlu0 %1190  ;;  %v1189_v15 = vpop.permute.xlu1 %1188  ;;  %s1370_s25 = sshll.u32 %s406_s17, 4  ;;  %s2425_s20 = scalar_lea.hbm %s2483_s9, %s1654_s19  ;;  %s2427_s25 = int_to_ptr.vmem [resolvable:$true] %s1370_s25 }
 0x38a   : > { %v1194_v16 = vsel %vm601_vm3, %v1189_v15, %v1191_v14  ;;  %v1193_v23 = vsel %vm601_vm3, %v1187_v3, %v1189_v15  ;;  %s1868_s16 = scalar_lea.vmem %s2427_s25, 192  ;;  %s1874_s21 = scalar_lea.vmem %s1873_s30, 384 }
 0x38b   : > { %p1869_p7 = scmp.ne.s32.totalorder %s2427_s25, %s1868_s16  ;;  %p1875_p6 = scmp.lt.s32.totalorder %s2427_s25, %s1873_s30 }
 0x38c   : > { %p1876_p4 = scmp.lt.s32.totalorder %s1874_s21, %s1868_s16 }
 0x38d   : > { %p1870_p13 = pnand %p1869_p7, %p2506_p9 }
 0x38e   : > { %p1877_p10 = por %p1876_p4, %p1875_p6 }
 0x38f   : > { %p1871_p3 = pneg %p1870_p13 }
 0x391   : > { %p1878_p12 = pnand %p1877_p10, %p1871_p3 }
 0x449   : > { %v1338_v17 = vpop.f32.mrb[2].mxu1 }
 0x44a   : > { %v1339_v18 = vadd.f32 %v1338_v17, %v1194_v16  ;;  %v1596_v19 = vpop.f32.mrb[3].mxu1 }
 0x44b   : > { %v1267_v21 = vpop.f32.mrb[2].mxu0 }
 0x44c   : > { %1347 = vst [vmem:[%s406_s17 + $0x8] sm:$0xf] %v1339_v18  ;;  %v1268_v22 = vadd.f32 %v1267_v21, %v1192_v20  ;;  %v1269_v24 = vpop.f32.mrb[3].mxu0 }
 0x44d   : > { %v1270_v25 = vadd.f32 %v1269_v24, %v1193_v23 }
 0x44f   : > { %v1344_v26 = vcombine.low %v1268_v22, %v1270_v25 }
 0x451   : > { %1346 = vst [vmem:[%s406_s17] sm:$0xff] %v1344_v26 }
 0x452   : > { %1881 = shalt.err (!%p1878_p12)
}
 0x453   : > { %s1882_s11 = scalar_lea.hbm %s2425_s20, 192  ;;  %s1886_s19 = scalar_lea.hbm %s2483_s9, 384 }
 0x454   : > { %p1883_p1 = scmp.ne.s32.totalorder %s2425_s20, %s1882_s11  ;;  %p1887_p8 = scmp.lt.u32.totalorder %s2425_s20, %s2483_s9 }
 0x455   : > { %p1888_p11 = scmp.lt.u32.totalorder %s1886_s19, %s1882_s11  ;;  %p1890_p7 = scmp.lt.u32.totalorder %s1882_s11, %s2425_s20 }
 0x456   : > { %p1884_p2 = pnand %p1883_p1, %p2506_p9 }
 0x457   : > { %p1889_p0 = por %p1888_p11, %p1887_p8 }
 0x458   : > { %p1885_p5 = pneg %p1884_p2 }
 0x459   : > { %p1891_p13 = por %p1890_p7, %p1889_p0 }
 0x45b   : > { %p1892_p3 = pnand %p1891_p13, %p1885_p5 }
 0x45d   : > { %1895 = shalt.err (!%p1892_p3)
}
 0x45e   : > { %1657 = dma.vmem_to_hbm [thread:$0]  (%p2506_p9), %s2427_s25, 192, %s2425_s20, %s1349_s12  }
 0x45f PF: > { %s1396_s16 = sand.u32 1, %s1934_s13   ;;  %p2507_p6 = scmp.ne.s32.totalorder %s2499_s28, 0 }
 0x460   : > { %p2508_p4 = scmp.ge.s32.totalorder %s1954_s18, 2  ;;  %s1397_s29 = scalar_lea.sflag [#allocation8], %s1396_s16 }
 0x462   : > { %p1666_p10 = pnand %p2508_p4, %p2507_p6 }
 0x464   : > { %1925 = dma.done.wait (!%p1666_p10), %s1397_s29, 192  }
 0x465   : > { %1927 = vsyncadd (!%p1666_p10), %s1397_s29, 4294967104  ;;  %s1406_s30 = scalar_lea.sflag [#allocation11], %s1396_s16 }
 0x466   : > { %1929 = dma.done.wait (!%p1666_p10), %s1406_s30, 256  }
 0x467   : > { %1931 = vsyncadd (!%p1666_p10), %s1406_s30, 4294967040  ;;  %s30_s18 = sadd.s32 1, %s1954_s18   ;;  %s2509_s16 = sld [smem:[#allocation15_spill]] }
 0x468   : > { %p27_p12 = scmp.ge.s32.totalorder %s30_s18, 4   ;;  %s2510_s17 = sld [smem:[#allocation16_spill]] }
 0x469   : > { %s2511_s13 = smov %s1938_s14  ;;  %s2512_s14 = smov %s1942_s15 }
 0x46a   : > { %s2513_s15 = smov %s2084_s27  ;;  %29 = sbr.rel (!%p27_p12) target bundleno = 8 (0x8), region = 121 }
 0x471   :  { %1411 = vsyncpa [#allocation7], 1 }
 0x472   :  { %1413 = vsyncpa [#allocation7 + $0x1], 1 }
 0x473   :  { %1414 = vsyncpa [#allocation8], 1 }
 0x474   :  { %1416 = vsyncpa [#allocation8 + $0x1], 1 }
 0x475   :  { %1417 = vsyncpa [#allocation11], 1 }
 0x476   :  { %1419 = vsyncpa [#allocation11 + $0x1], 1 }

</bundles_post_ra>
